<compile_context>
chip_gen: v5e
topology: v5e:2x2
jax: 0.10.0
libtpu: 0.0.40
codegen_flags: <defaults>
</compile_context>

<pallas_src>
import math

import jax
import jax.numpy as jnp
from jax import lax
from jax.experimental import pallas as pl
from jax.experimental.pallas import tpu as pltpu


def _round_up(n, m):
    return ((n + m - 1) // m) * m


# ----------------------------------------------------------------------------
# Fused forward kernel
# ----------------------------------------------------------------------------
def _make_forward_kernel(cfg, L, Bt):
    d_model = cfg["d_model"]
    d_inner = d_model * cfg["expand"]
    d_state = cfg["d_ff"]
    headdim = cfg["headdim"]
    d_conv = cfg["d_conv"]
    nheads = d_inner // headdim
    n_layers = cfg["n_layers"]
    pred_len = cfg["pred_len"]
    c_out = cfg["c_out"]
    R = Bt * L
    f32 = jnp.float32
    bf16 = jnp.bfloat16

    def softplus(x):
        # numerically stable softplus using only max/abs/exp/log
        return jnp.maximum(x, 0.0) + jnp.log(1.0 + jnp.exp(-jnp.abs(x)))

    def silu(x):
        return x * jax.nn.sigmoid(x)

    def kernel(x_ref, mark_ref, pe_ref, bc_ref, bcu_ref, embw_ref, outw_ref,
               wzdt_ref, wxbc_ref, cw_ref, cb_ref, hsm_ref, hvec_ref,
               outpw_ref, lnp_ref, out_ref):
        bc_f = bc_ref[...]                       # (R, R) block-causal (t_row >= t_col, same batch)
        bcu_f = bcu_ref[...]                     # its transpose
        causal = bc_f > 0.5

        # per-row local time index within each batch element
        row = lax.broadcasted_iota(jnp.int32, (R, 1), 0)
        t_local = row % L

        def croll(x, s):
            """x shifted down by s rows within each batch element (zero fill)."""
            if s == 0:
                return x
            return jnp.where(t_local >= s, pltpu.roll(x, s, axis=0), 0.0)

        # -------- RevIN: instance norm over time (biased variance) ---------
        x3 = x_ref[...]                                       # (Bt, L, C)
        C_enc = x3.shape[-1]
        mean_r = jnp.mean(x3, axis=1, keepdims=True)          # (Bt, 1, C)
        xc = x3 - mean_r
        var_r = jnp.mean(xc * xc, axis=1, keepdims=True)
        std_r = jnp.sqrt(var_r + 1e-5)
        xn3 = xc * lax.rsqrt(var_r + 1e-5)
        xn = xn3.reshape(R, C_enc)                            # flatten batch rows

        # -------- DataEmbedding: circular k=3 token conv + timeF + PE ------
        # circular (mod L, per batch element) neighbours via XLU rolls
        is_first = t_local == 0
        is_last = t_local == (L - 1)
        xprev = jnp.where(is_first,
                          pltpu.roll(xn, R - L + 1, axis=0),
                          pltpu.roll(xn, 1, axis=0))          # x[(t-1) mod L]
        xnext = jnp.where(is_last,
                          pltpu.roll(xn, L - 1, axis=0),
                          pltpu.roll(xn, R - 1, axis=0))      # x[(t+1) mod L]
        mark = mark_ref[...].reshape(R, -1)
        emb_in = jnp.concatenate([xprev, xn, xnext, mark], axis=1).astype(bf16)
        u = jnp.dot(emb_in, embw_ref[...], preferred_element_type=f32) + pe_ref[...]
        # dropout -> identity at inference

        # -------- Mamba2 layers (residual + LayerNorm) ----------------------
        for l in range(n_layers):
            ub = u.astype(bf16)
            zdt = jnp.dot(ub, wzdt_ref[l], preferred_element_type=f32)      # (R, pad)
            xbc_pre = jnp.dot(ub, wxbc_ref[l], preferred_element_type=f32)  # (R, pad)
            z = zdt[:, :d_inner]                                            # (R, d_inner)
            dt_raw = zdt[:, d_inner:d_inner + nheads]                       # (R, nheads)

            hs = hsm_ref[l]                                                 # (2, nheads)
            dt = softplus(dt_raw + hs[0:1, :])                              # (R, nheads)
            A_row = -jnp.exp(hs[1:2, :])                                    # (1, nheads)

            # depthwise causal conv + SiLU on concatenated [x|B|C] (XLU shifts)
            cw = cw_ref[l]                                                  # (d_conv, pad)
            acc = cb_ref[l] + xbc_pre * cw[d_conv - 1:d_conv, :]
            for s in range(1, d_conv):
                acc = acc + croll(xbc_pre, s) * cw[d_conv - 1 - s:d_conv - s, :]
            conv_act = silu(acc)
            xact = conv_act[:, :d_inner]
            Bact = conv_act[:, d_inner:d_inner + d_state]
            Cact = conv_act[:, d_inner + d_state:d_inner + 2 * d_state]

            # exact SSD, quadratic ("attention-like") form, block-masked over batch:
            #   y[t] = sum_{s<=t} (C_t.B_s) * exp(cum[t]-cum[s]) * dt_s * x_s + D*x_t
            a = dt * A_row                                                  # (R, nheads)
            cum = jnp.dot(bc_f, a, preferred_element_type=f32)              # (R, nheads)
            cumT = lax.dot_general(a, bcu_f, (((0,), (0,)), ((), ())),
                                   preferred_element_type=f32)              # (nheads, R)
            CB = lax.dot_general(Cact, Bact, (((1,), (1,)), ((), ())),
                                 preferred_element_type=f32)                # (R, R)

            hv = hvec_ref[l]                                                # (2, d_inner)
            ys = []
            for h in range(nheads):
                seg = jnp.where(causal, cum[:, h:h + 1] - cumT[h:h + 1, :], -1e9)
                m_h = CB * jnp.exp(seg)                                     # (R, R)
                xh = xact[:, h * headdim:(h + 1) * headdim] * dt[:, h:h + 1]
                ys.append(jnp.dot(m_h, xh, preferred_element_type=f32))     # (R, headdim)
            y = jnp.concatenate(ys, axis=1) + xact * hv[0:1, :]             # + D skip

            # gated RMSNorm (gate first: norm_before_gate=False), eps = 1e-5
            yg = y * silu(z)
            msq = jnp.mean(yg * yg, axis=-1, keepdims=True)
            ynorm = yg * lax.rsqrt(msq + 1e-5) * hv[1:2, :]

            yo = jnp.dot(ynorm.astype(bf16), outpw_ref[l],
                         preferred_element_type=f32)                        # (R, d_model)

            # residual + LayerNorm (eps = 1e-5)
            lnpl = lnp_ref[l]                                               # (2, d_model)
            xr = u + yo
            mu_ln = jnp.mean(xr, axis=-1, keepdims=True)
            xcl = xr - mu_ln
            var_ln = jnp.mean(xcl * xcl, axis=-1, keepdims=True)
            u = xcl * lax.rsqrt(var_ln + 1e-5) * lnpl[0:1, :] + lnpl[1:2, :]

        # -------- output head + de-normalization + pred_len slice ----------
        out_full = jnp.dot(u.astype(bf16), outw_ref[...],
                           preferred_element_type=f32)                      # (R, c_out)
        out3 = out_full.reshape(Bt, L, c_out) * std_r + mean_r
        out_ref[...] = out3[:, L - pred_len:, :]

    return kernel


_PARAM_ORDER = ("embw", "outw", "wzdt", "wxbc", "cw", "cb",
                "hsm", "hvec", "outpw", "lnp")


def _full_spec(arr):
    rank = arr.ndim
    return pl.BlockSpec(arr.shape, lambda b, _r=rank: (0,) * _r)


def model_forward(prep, x_enc, x_mark_enc, x_dec, x_mark_dec, cfg):
    """Matches Model.forward for 'long_term_forecast' (inference / eval mode)."""
    del x_dec, x_mark_dec                      # unused by the reference forecast path
    B, L, C = x_enc.shape
    d_mark = x_mark_enc.shape[-1]
    d_model = cfg["d_model"]

    # batch-block size: pack rows so R = Bt*L approaches 128 MXU sublanes
    Bt = 1
    for cand in range(min(B, max(1, 128 // L)), 0, -1):
        if B % cand == 0:
            Bt = cand
            break
    R = Bt * L

    # hoisted constants (built once at trace time)
    pe_tiled = jnp.tile(prep["pe"], (Bt, 1))                       # (R, d_model)
    t = jnp.arange(R, dtype=jnp.int32)
    bi, ti = t // L, t % L
    bc = ((bi[:, None] == bi[None, :]) &
          (ti[:, None] >= ti[None, :])).astype(jnp.float32)        # (R, R)
    bcu = jnp.transpose(bc)

    kernel = _make_forward_kernel(cfg, L, Bt)
    plist = [pe_tiled, bc, bcu] + [prep[k] for k in _PARAM_ORDER]
    in_specs = ([pl.BlockSpec((Bt, L, C), lambda b: (b, 0, 0)),
                 pl.BlockSpec((Bt, L, d_mark), lambda b: (b, 0, 0))]
                + [_full_spec(a) for a in plist])
    out_specs = pl.BlockSpec((Bt, cfg["pred_len"], cfg["c_out"]), lambda b: (b, 0, 0))
    return pl.pallas_call(
        kernel,
        out_shape=jax.ShapeDtypeStruct((B, cfg["pred_len"], cfg["c_out"]), jnp.float32),
        grid=(B // Bt,),
        in_specs=in_specs,
        out_specs=out_specs,
        compiler_params=pltpu.CompilerParams(
            dimension_semantics=("parallel",),
            vmem_limit_bytes=32 * 1024 * 1024),
    )(x_enc, x_mark_enc, *plist)


# ----------------------------------------------------------------------------
# Parameter construction (torch-like layout) + kernel-ready re-packing
# ----------------------------------------------------------------------------
def positional_embedding(L, d_model):
    pos = jnp.arange(L, dtype=jnp.float32)[:, None]
    div = jnp.exp(jnp.arange(0, d_model, 2, dtype=jnp.float32)
                  * (-math.log(10000.0) / d_model))
    pe = jnp.zeros((L, d_model), jnp.float32)
    pe = pe.at[:, 0::2].set(jnp.sin(pos * div))
    pe = pe.at[:, 1::2].set(jnp.cos(pos * div))
    return pe


def init_params(key, cfg):
    d_model, enc_in, d_mark = cfg["d_model"], cfg["enc_in"], cfg["d_mark"]
    d_inner = d_model * cfg["expand"]
    d_state, d_conv = cfg["d_ff"], cfg["d_conv"]
    headdim = cfg["headdim"]
    nheads = d_inner // headdim
    conv_dim = d_inner + 2 * d_state
    d_in_proj = 2 * d_inner + 2 * d_state + nheads

    keys = jax.random.split(key, 3 + 8 * cfg["n_layers"])
    ki = iter(keys)
    params = {
        "token_w": 0.1 * jax.random.normal(next(ki), (d_model, enc_in, 3), jnp.float32),
        "temporal_w": 0.02 * jax.random.normal(next(ki), (d_mark, d_model), jnp.float32),
        "out_w": 0.02 * jax.random.normal(next(ki), (d_model, cfg["c_out"]), jnp.float32),
        "layers": [],
    }
    for _ in range(cfg["n_layers"]):
        dt = jnp.exp(jax.random.uniform(next(ki), (nheads,))
                     * (math.log(0.1) - math.log(0.001)) + math.log(0.001))
        dt = jnp.clip(dt, 1e-4)
        dt_bias = dt + jnp.log(-jnp.expm1(-dt))               # inverse softplus
        a_init = 1.0 + 15.0 * jax.random.uniform(next(ki), (nheads,))
        lp = {
            "in_proj_w": 0.02 * jax.random.normal(next(ki), (d_model, d_in_proj), jnp.float32),
            "conv_w": 0.1 * jax.random.normal(next(ki), (d_conv, conv_dim), jnp.float32),
            "conv_b": 0.01 * jax.random.normal(next(ki), (conv_dim,), jnp.float32),
            "dt_bias": dt_bias.astype(jnp.float32),
            "A_log": jnp.log(a_init).astype(jnp.float32),
            "D": jnp.ones((nheads,), jnp.float32),
            "rms_w": jnp.ones((d_inner,), jnp.float32),
            "out_proj_w": 0.02 * jax.random.normal(next(ki), (d_inner, d_model), jnp.float32),
            "ln_w": jnp.ones((d_model,), jnp.float32),
            "ln_b": jnp.zeros((d_model,), jnp.float32),
        }
        params["layers"].append(lp)
    return params


def prep_params(params, cfg, L):
    """Split / restack / pad / cast parameters into the layout the fused kernel expects."""
    d_model = cfg["d_model"]
    enc_in = cfg["enc_in"]
    d_inner = d_model * cfg["expand"]
    d_state = cfg["d_ff"]
    headdim = cfg["headdim"]
    nheads = d_inner // headdim
    conv_dim = d_inner + 2 * d_state
    bf16 = jnp.bfloat16
    di, ds = d_inner, d_state

    zdt_pad = _round_up(di + nheads, 128)
    conv_pad = _round_up(conv_dim, 128)

    def pad_cols(a, width):
        return jnp.pad(a, ((0, 0), (0, width - a.shape[-1])))

    def stack(fn):
        return jnp.stack([fn(lp) for lp in params["layers"]], axis=0)

    # embedding weight: [token tap(-1) | token tap(0) | token tap(+1) | temporal]
    tokw = jnp.transpose(params["token_w"], (2, 1, 0)).reshape(3 * enc_in, d_model)
    embw = jnp.concatenate([tokw, params["temporal_w"]], axis=0).astype(bf16)

    return {
        "pe": positional_embedding(L, d_model),                                  # f32
        "embw": embw,
        "outw": params["out_w"].astype(bf16),
        # in_proj column order [z | x | B | C | dt] fused into 2 lane-dense weights
        "wzdt": stack(lambda lp: pad_cols(jnp.concatenate(
            [lp["in_proj_w"][:, :di], lp["in_proj_w"][:, 2 * di + 2 * ds:]],
            axis=1), zdt_pad)).astype(bf16),
        "wxbc": stack(lambda lp: pad_cols(lp["in_proj_w"][:, di:2 * di + 2 * ds],
                                          conv_pad)).astype(bf16),
        # depthwise conv weights / bias over concatenated [x|B|C] (f32)
        "cw": stack(lambda lp: pad_cols(lp["conv_w"], conv_pad)),
        "cb": stack(lambda lp: pad_cols(lp["conv_b"][None, :], conv_pad)),
        # packed per-layer small vectors (f32)
        "hsm": stack(lambda lp: jnp.stack([lp["dt_bias"], lp["A_log"]], 0)),      # (2, nheads)
        "hvec": stack(lambda lp: jnp.stack([jnp.repeat(lp["D"], headdim),
                                            lp["rms_w"]], 0)),                   # (2, d_inner)
        "outpw": stack(lambda lp: lp["out_proj_w"]).astype(bf16),
        "lnp": stack(lambda lp: jnp.stack([lp["ln_w"], lp["ln_b"]], 0)),          # (2, d_model)
    }


# ----------------------------------------------------------------------------
if __name__ == "__main__":
    cfg = dict(
        task_name="long_term_forecast",
        pred_len=8, seq_len=16,
        enc_in=4, c_out=4, d_mark=4,          # embed='timeF', freq='h' -> 4 marks
        d_model=32, d_ff=16,                  # d_ff plays the role of d_state
        d_conv=4, expand=2, headdim=16,
        n_layers=2, dropout=0.1,
    )
    B, L = 2, cfg["seq_len"]

    key = jax.random.PRNGKey(0)
    kp, k1, k2 = jax.random.split(key, 3)
    params = init_params(kp, cfg)
    prep = prep_params(params, cfg, L)

    x_enc = jax.random.normal(k1, (B, L, cfg["enc_in"]), jnp.float32)
    x_mark_enc = jax.random.normal(k2, (B, L, cfg["d_mark"]), jnp.float32)
    x_dec = jnp.zeros((B, cfg["pred_len"], cfg["enc_in"]), jnp.float32)       # unused
    x_mark_dec = jnp.zeros((B, cfg["pred_len"], cfg["d_mark"]), jnp.float32)  # unused

    fwd = jax.jit(lambda p, a, m, d, md: model_forward(p, a, m, d, md, cfg))
    out = fwd(prep, x_enc, x_mark_enc, x_dec, x_mark_dec)
    out = jax.block_until_ready(out)

    assert out.shape == (B, cfg["pred_len"], cfg["c_out"]), out.shape
    assert bool(jnp.all(jnp.isfinite(out)))
    print("KERNEL_OK")
</pallas_src>

<mosaic_0001>
module attributes {stable_mosaic.version = 11 : i64} {
  func.func @kernel(%arg0: i32, %arg1: memref<2x16x4xf32, #tpu.memory_space<vmem>>, %arg2: memref<2x16x4xf32, #tpu.memory_space<vmem>>, %arg3: memref<32x32xf32, #tpu.memory_space<vmem>>, %arg4: memref<32x32xf32, #tpu.memory_space<vmem>>, %arg5: memref<32x32xf32, #tpu.memory_space<vmem>>, %arg6: memref<16x32xbf16, #tpu.memory_space<vmem>>, %arg7: memref<32x4xbf16, #tpu.memory_space<vmem>>, %arg8: memref<2x32x128xbf16, #tpu.memory_space<vmem>>, %arg9: memref<2x32x128xbf16, #tpu.memory_space<vmem>>, %arg10: memref<2x4x128xf32, #tpu.memory_space<vmem>>, %arg11: memref<2x1x128xf32, #tpu.memory_space<vmem>>, %arg12: memref<2x2x4xf32, #tpu.memory_space<vmem>>, %arg13: memref<2x2x64xf32, #tpu.memory_space<vmem>>, %arg14: memref<2x64x32xbf16, #tpu.memory_space<vmem>>, %arg15: memref<2x2x32xf32, #tpu.memory_space<vmem>>, %arg16: memref<2x8x4xf32, #tpu.memory_space<vmem>>) attributes {dimension_semantics = [#tpu.dimension_semantics<parallel>], iteration_bounds = array<i64: 1>, scalar_prefetch = 0 : i64, scratch_operands = 0 : i64, tpu.core_type = #tpu.core_type<tc>, window_params = [{transform_indices = @transform_0, window_bounds = array<i64: 2, 16, 4>}, {transform_indices = @transform_1, window_bounds = array<i64: 2, 16, 4>}, {pipeline_mode = #tpu.pipeline_mode<synchronous>, transform_indices = @transform_2, window_bounds = array<i64: 32, 32>}, {pipeline_mode = #tpu.pipeline_mode<synchronous>, transform_indices = @transform_3, window_bounds = array<i64: 32, 32>}, {pipeline_mode = #tpu.pipeline_mode<synchronous>, transform_indices = @transform_4, window_bounds = array<i64: 32, 32>}, {pipeline_mode = #tpu.pipeline_mode<synchronous>, transform_indices = @transform_5, window_bounds = array<i64: 16, 32>}, {pipeline_mode = #tpu.pipeline_mode<synchronous>, transform_indices = @transform_6, window_bounds = array<i64: 32, 4>}, {pipeline_mode = #tpu.pipeline_mode<synchronous>, transform_indices = @transform_7, window_bounds = array<i64: 2, 32, 128>}, {pipeline_mode = #tpu.pipeline_mode<synchronous>, transform_indices = @transform_8, window_bounds = array<i64: 2, 32, 128>}, {pipeline_mode = #tpu.pipeline_mode<synchronous>, transform_indices = @transform_9, window_bounds = array<i64: 2, 4, 128>}, {pipeline_mode = #tpu.pipeline_mode<synchronous>, transform_indices = @transform_10, window_bounds = array<i64: 2, 1, 128>}, {pipeline_mode = #tpu.pipeline_mode<synchronous>, transform_indices = @transform_11, window_bounds = array<i64: 2, 2, 4>}, {pipeline_mode = #tpu.pipeline_mode<synchronous>, transform_indices = @transform_12, window_bounds = array<i64: 2, 2, 64>}, {pipeline_mode = #tpu.pipeline_mode<synchronous>, transform_indices = @transform_13, window_bounds = array<i64: 2, 64, 32>}, {pipeline_mode = #tpu.pipeline_mode<synchronous>, transform_indices = @transform_14, window_bounds = array<i64: 2, 2, 32>}, {transform_indices = @transform_15, window_bounds = array<i64: 2, 8, 4>}]} {
    %c0 = arith.constant 0 : index
    %c0_0 = arith.constant 0 : index
    %0 = vector.load %arg4[%c0, %c0_0] : memref<32x32xf32, #tpu.memory_space<vmem>>, vector<32x32xf32>
    %c0_1 = arith.constant 0 : index
    %c0_2 = arith.constant 0 : index
    %1 = vector.load %arg5[%c0_1, %c0_2] : memref<32x32xf32, #tpu.memory_space<vmem>>, vector<32x32xf32>
    %cst = arith.constant 5.000000e-01 : f32
    %2 = vector.broadcast %cst : f32 to vector<32x32xf32>
    %3 = arith.cmpf ogt, %0, %2 : vector<32x32xf32>
    %4 = tpu.iota {dimensions = array<i32: 0>} : vector<32x1xi32>
    %c16_i32 = arith.constant 16 : i32
    %c0_i32 = arith.constant 0 : i32
    %5 = arith.cmpi eq, %c16_i32, %c0_i32 : i32
    %c1_i32 = arith.constant 1 : i32
    %6 = arith.select %5, %c1_i32, %c16_i32 : i32
    %7 = vector.broadcast %6 : i32 to vector<32x1xi32>
    %8 = arith.remsi %4, %7 : vector<32x1xi32>
    %c0_i32_3 = arith.constant 0 : i32
    %9 = vector.broadcast %c0_i32_3 : i32 to vector<32x1xi32>
    %10 = arith.cmpi ne, %8, %9 : vector<32x1xi32>
    %c0_i32_4 = arith.constant 0 : i32
    %11 = vector.broadcast %c0_i32_4 : i32 to vector<32x1xi32>
    %12 = arith.cmpi slt, %8, %11 : vector<32x1xi32>
    %c0_i32_5 = arith.constant 0 : i32
    %13 = arith.cmpi slt, %6, %c0_i32_5 : i32
    %14 = vector.broadcast %13 : i1 to vector<32x1xi1>
    %15 = vector.broadcast %14 : vector<32x1xi1> to vector<32x1xi1>
    %16 = arith.xori %12, %15 : vector<32x1xi1>
    %17 = arith.andi %16, %10 : vector<32x1xi1>
    %18 = vector.broadcast %6 : i32 to vector<32x1xi32>
    %19 = arith.addi %8, %18 : vector<32x1xi32>
    %20 = arith.select %17, %19, %8 : vector<32x1xi1>, vector<32x1xi32>
    %c0_6 = arith.constant 0 : index
    %c0_7 = arith.constant 0 : index
    %c0_8 = arith.constant 0 : index
    %21 = vector.load %arg1[%c0_6, %c0_7, %c0_8] : memref<2x16x4xf32, #tpu.memory_space<vmem>>, vector<2x16x4xf32>
    %cst_9 = arith.constant dense<0.000000e+00> : vector<2x4xf32>
    %22 = vector.multi_reduction <add>, %21, %cst_9 [1] : vector<2x16x4xf32> to vector<2x4xf32>
    %23 = vector.shape_cast %22 : vector<2x4xf32> to vector<2x1x4xf32>
    %cst_10 = arith.constant 1.600000e+01 : f32
    %24 = vector.broadcast %cst_10 : f32 to vector<2x1x4xf32>
    %25 = arith.divf %23, %24 : vector<2x1x4xf32>
    %26 = vector.broadcast %25 : vector<2x1x4xf32> to vector<2x16x4xf32>
    %27 = arith.subf %21, %26 : vector<2x16x4xf32>
    %28 = arith.mulf %27, %27 : vector<2x16x4xf32>
    %cst_11 = arith.constant dense<0.000000e+00> : vector<2x4xf32>
    %29 = vector.multi_reduction <add>, %28, %cst_11 [1] : vector<2x16x4xf32> to vector<2x4xf32>
    %30 = vector.shape_cast %29 : vector<2x4xf32> to vector<2x1x4xf32>
    %cst_12 = arith.constant 1.600000e+01 : f32
    %31 = vector.broadcast %cst_12 : f32 to vector<2x1x4xf32>
    %32 = arith.divf %30, %31 : vector<2x1x4xf32>
    %cst_13 = arith.constant 9.99999974E-6 : f32
    %33 = vector.broadcast %cst_13 : f32 to vector<2x1x4xf32>
    %34 = arith.addf %32, %33 : vector<2x1x4xf32>
    %35 = math.sqrt %34 : vector<2x1x4xf32>
    %cst_14 = arith.constant 9.99999974E-6 : f32
    %36 = vector.broadcast %cst_14 : f32 to vector<2x1x4xf32>
    %37 = arith.addf %32, %36 : vector<2x1x4xf32>
    %38 = math.rsqrt %37 : vector<2x1x4xf32>
    %39 = vector.broadcast %38 : vector<2x1x4xf32> to vector<2x16x4xf32>
    %40 = arith.mulf %27, %39 : vector<2x16x4xf32>
    %41 = vector.shape_cast %40 : vector<2x16x4xf32> to vector<32x4xf32>
    %c0_i32_15 = arith.constant 0 : i32
    %42 = vector.broadcast %c0_i32_15 : i32 to vector<32x1xi32>
    %43 = arith.cmpi eq, %20, %42 : vector<32x1xi32>
    %c15_i32 = arith.constant 15 : i32
    %44 = vector.broadcast %c15_i32 : i32 to vector<32x1xi32>
    %45 = arith.cmpi eq, %20, %44 : vector<32x1xi32>
    %c17_i32 = arith.constant 17 : i32
    %46 = tpu.dynamic_rotate %41 by %c17_i32 dim 0 : vector<32x4xf32>, i32 -> vector<32x4xf32>
    %c1_i32_16 = arith.constant 1 : i32
    %47 = tpu.dynamic_rotate %41 by %c1_i32_16 dim 0 : vector<32x4xf32>, i32 -> vector<32x4xf32>
    %48 = vector.shape_cast %43 : vector<32x1xi1> to vector<32x1xi1>
    %49 = vector.broadcast %48 : vector<32x1xi1> to vector<32x4xi1>
    %50 = arith.select %49, %46, %47 : vector<32x4xi1>, vector<32x4xf32>
    %c15_i32_17 = arith.constant 15 : i32
    %51 = tpu.dynamic_rotate %41 by %c15_i32_17 dim 0 : vector<32x4xf32>, i32 -> vector<32x4xf32>
    %c31_i32 = arith.constant 31 : i32
    %52 = tpu.dynamic_rotate %41 by %c31_i32 dim 0 : vector<32x4xf32>, i32 -> vector<32x4xf32>
    %53 = vector.shape_cast %45 : vector<32x1xi1> to vector<32x1xi1>
    %54 = vector.broadcast %53 : vector<32x1xi1> to vector<32x4xi1>
    %55 = arith.select %54, %51, %52 : vector<32x4xi1>, vector<32x4xf32>
    %c0_18 = arith.constant 0 : index
    %c0_19 = arith.constant 0 : index
    %c0_20 = arith.constant 0 : index
    %56 = vector.load %arg2[%c0_18, %c0_19, %c0_20] : memref<2x16x4xf32, #tpu.memory_space<vmem>>, vector<2x16x4xf32>
    %57 = vector.shape_cast %56 : vector<2x16x4xf32> to vector<32x4xf32>
    %58 = tpu.concatenate %50, %41, %55, %57 in 1 : vector<32x4xf32>, vector<32x4xf32>, vector<32x4xf32>, vector<32x4xf32> -> vector<32x16xf32>
    %59 = arith.truncf %58 : vector<32x16xf32> to vector<32x16xbf16>
    %c0_21 = arith.constant 0 : index
    %c0_22 = arith.constant 0 : index
    %60 = vector.load %arg6[%c0_21, %c0_22] : memref<16x32xbf16, #tpu.memory_space<vmem>>, vector<16x32xbf16>
    %cst_23 = arith.constant dense<0.000000e+00> : vector<32x32xf32>
    %61 = tpu.matmul %59, %60, %cst_23 {dimension_numbers = #tpu.dot_dimension_numbers<[1], [0], [0], [1], [0, 0, 1, 1], [], []>} : vector<32x16xbf16>, vector<16x32xbf16>, vector<32x32xf32> -> vector<32x32xf32>
    %c0_24 = arith.constant 0 : index
    %c0_25 = arith.constant 0 : index
    %62 = vector.load %arg3[%c0_24, %c0_25] : memref<32x32xf32, #tpu.memory_space<vmem>>, vector<32x32xf32>
    %63 = arith.addf %61, %62 : vector<32x32xf32>
    %64 = arith.truncf %63 : vector<32x32xf32> to vector<32x32xbf16>
    %c0_26 = arith.constant 0 : index
    %c0_27 = arith.constant 0 : index
    %c0_28 = arith.constant 0 : index
    %65 = vector.load %arg8[%c0_26, %c0_27, %c0_28] : memref<2x32x128xbf16, #tpu.memory_space<vmem>>, vector<1x32x128xbf16>
    %66 = vector.shape_cast %65 : vector<1x32x128xbf16> to vector<32x128xbf16>
    %cst_29 = arith.constant dense<0.000000e+00> : vector<32x128xf32>
    %67 = tpu.matmul %64, %66, %cst_29 {dimension_numbers = #tpu.dot_dimension_numbers<[1], [0], [0], [1], [0, 0, 1, 1], [], []>} : vector<32x32xbf16>, vector<32x128xbf16>, vector<32x128xf32> -> vector<32x128xf32>
    %c0_30 = arith.constant 0 : index
    %c0_31 = arith.constant 0 : index
    %c0_32 = arith.constant 0 : index
    %68 = vector.load %arg9[%c0_30, %c0_31, %c0_32] : memref<2x32x128xbf16, #tpu.memory_space<vmem>>, vector<1x32x128xbf16>
    %69 = vector.shape_cast %68 : vector<1x32x128xbf16> to vector<32x128xbf16>
    %cst_33 = arith.constant dense<0.000000e+00> : vector<32x128xf32>
    %70 = tpu.matmul %64, %69, %cst_33 {dimension_numbers = #tpu.dot_dimension_numbers<[1], [0], [0], [1], [0, 0, 1, 1], [], []>} : vector<32x32xbf16>, vector<32x128xbf16>, vector<32x128xf32> -> vector<32x128xf32>
    %71 = vector.extract_strided_slice %67 {offsets = [0, 0], sizes = [32, 64], strides = [1, 1]} : vector<32x128xf32> to vector<32x64xf32>
    %72 = vector.extract_strided_slice %67 {offsets = [0, 64], sizes = [32, 4], strides = [1, 1]} : vector<32x128xf32> to vector<32x4xf32>
    %c0_34 = arith.constant 0 : index
    %c0_35 = arith.constant 0 : index
    %c0_36 = arith.constant 0 : index
    %73 = vector.load %arg12[%c0_34, %c0_35, %c0_36] : memref<2x2x4xf32, #tpu.memory_space<vmem>>, vector<1x2x4xf32>
    %74 = vector.shape_cast %73 : vector<1x2x4xf32> to vector<2x4xf32>
    %75 = vector.extract_strided_slice %74 {offsets = [0, 0], sizes = [1, 4], strides = [1, 1]} : vector<2x4xf32> to vector<1x4xf32>
    %76 = vector.broadcast %75 : vector<1x4xf32> to vector<32x4xf32>
    %77 = arith.addf %72, %76 : vector<32x4xf32>
    %cst_37 = arith.constant 0.000000e+00 : f32
    %78 = vector.broadcast %cst_37 : f32 to vector<32x4xf32>
    %79 = arith.maximumf %77, %78 : vector<32x4xf32>
    %80 = math.absf %77 : vector<32x4xf32>
    %cst_38 = arith.constant 0.000000e+00 : f32
    %81 = vector.broadcast %cst_38 : f32 to vector<32x4xf32>
    %82 = arith.subf %81, %80 : vector<32x4xf32>
    %83 = math.exp %82 : vector<32x4xf32>
    %cst_39 = arith.constant 1.000000e+00 : f32
    %84 = vector.broadcast %cst_39 : f32 to vector<32x4xf32>
    %85 = arith.addf %84, %83 : vector<32x4xf32>
    %86 = math.log %85 : vector<32x4xf32>
    %87 = arith.addf %79, %86 : vector<32x4xf32>
    %88 = vector.extract_strided_slice %74 {offsets = [1, 0], sizes = [1, 4], strides = [1, 1]} : vector<2x4xf32> to vector<1x4xf32>
    %89 = math.exp %88 : vector<1x4xf32>
    %cst_40 = arith.constant 0.000000e+00 : f32
    %90 = vector.broadcast %cst_40 : f32 to vector<1x4xf32>
    %91 = arith.subf %90, %89 : vector<1x4xf32>
    %c0_41 = arith.constant 0 : index
    %c0_42 = arith.constant 0 : index
    %c0_43 = arith.constant 0 : index
    %92 = vector.load %arg10[%c0_41, %c0_42, %c0_43] : memref<2x4x128xf32, #tpu.memory_space<vmem>>, vector<1x4x128xf32>
    %93 = vector.shape_cast %92 : vector<1x4x128xf32> to vector<4x128xf32>
    %c0_44 = arith.constant 0 : index
    %c0_45 = arith.constant 0 : index
    %c0_46 = arith.constant 0 : index
    %94 = vector.load %arg11[%c0_44, %c0_45, %c0_46] : memref<2x1x128xf32, #tpu.memory_space<vmem>>, vector<1x1x128xf32>
    %95 = vector.shape_cast %94 : vector<1x1x128xf32> to vector<1x128xf32>
    %96 = vector.extract_strided_slice %93 {offsets = [3, 0], sizes = [1, 128], strides = [1, 1]} : vector<4x128xf32> to vector<1x128xf32>
    %97 = vector.broadcast %96 : vector<1x128xf32> to vector<32x128xf32>
    %98 = arith.mulf %70, %97 : vector<32x128xf32>
    %99 = vector.broadcast %95 : vector<1x128xf32> to vector<32x128xf32>
    %100 = arith.addf %99, %98 : vector<32x128xf32>
    %c1_i32_47 = arith.constant 1 : i32
    %101 = vector.broadcast %c1_i32_47 : i32 to vector<32x1xi32>
    %102 = arith.cmpi sge, %20, %101 : vector<32x1xi32>
    %c1_i32_48 = arith.constant 1 : i32
    %103 = tpu.dynamic_rotate %70 by %c1_i32_48 dim 0 : vector<32x128xf32>, i32 -> vector<32x128xf32>
    %cst_49 = arith.constant 0.000000e+00 : f32
    %104 = vector.shape_cast %102 : vector<32x1xi1> to vector<32x1xi1>
    %105 = vector.broadcast %104 : vector<32x1xi1> to vector<32x128xi1>
    %106 = vector.broadcast %cst_49 : f32 to vector<32x128xf32>
    %107 = arith.select %105, %103, %106 : vector<32x128xi1>, vector<32x128xf32>
    %108 = vector.extract_strided_slice %93 {offsets = [2, 0], sizes = [1, 128], strides = [1, 1]} : vector<4x128xf32> to vector<1x128xf32>
    %109 = vector.broadcast %108 : vector<1x128xf32> to vector<32x128xf32>
    %110 = arith.mulf %107, %109 : vector<32x128xf32>
    %111 = arith.addf %100, %110 : vector<32x128xf32>
    %c2_i32 = arith.constant 2 : i32
    %112 = vector.broadcast %c2_i32 : i32 to vector<32x1xi32>
    %113 = arith.cmpi sge, %20, %112 : vector<32x1xi32>
    %c2_i32_50 = arith.constant 2 : i32
    %114 = tpu.dynamic_rotate %70 by %c2_i32_50 dim 0 : vector<32x128xf32>, i32 -> vector<32x128xf32>
    %cst_51 = arith.constant 0.000000e+00 : f32
    %115 = vector.shape_cast %113 : vector<32x1xi1> to vector<32x1xi1>
    %116 = vector.broadcast %115 : vector<32x1xi1> to vector<32x128xi1>
    %117 = vector.broadcast %cst_51 : f32 to vector<32x128xf32>
    %118 = arith.select %116, %114, %117 : vector<32x128xi1>, vector<32x128xf32>
    %119 = vector.extract_strided_slice %93 {offsets = [1, 0], sizes = [1, 128], strides = [1, 1]} : vector<4x128xf32> to vector<1x128xf32>
    %120 = vector.broadcast %119 : vector<1x128xf32> to vector<32x128xf32>
    %121 = arith.mulf %118, %120 : vector<32x128xf32>
    %122 = arith.addf %111, %121 : vector<32x128xf32>
    %c3_i32 = arith.constant 3 : i32
    %123 = vector.broadcast %c3_i32 : i32 to vector<32x1xi32>
    %124 = arith.cmpi sge, %20, %123 : vector<32x1xi32>
    %c3_i32_52 = arith.constant 3 : i32
    %125 = tpu.dynamic_rotate %70 by %c3_i32_52 dim 0 : vector<32x128xf32>, i32 -> vector<32x128xf32>
    %cst_53 = arith.constant 0.000000e+00 : f32
    %126 = vector.shape_cast %124 : vector<32x1xi1> to vector<32x1xi1>
    %127 = vector.broadcast %126 : vector<32x1xi1> to vector<32x128xi1>
    %128 = vector.broadcast %cst_53 : f32 to vector<32x128xf32>
    %129 = arith.select %127, %125, %128 : vector<32x128xi1>, vector<32x128xf32>
    %130 = vector.extract_strided_slice %93 {offsets = [0, 0], sizes = [1, 128], strides = [1, 1]} : vector<4x128xf32> to vector<1x128xf32>
    %131 = vector.broadcast %130 : vector<1x128xf32> to vector<32x128xf32>
    %132 = arith.mulf %129, %131 : vector<32x128xf32>
    %133 = arith.addf %122, %132 : vector<32x128xf32>
    %134 = arith.negf %133 : vector<32x128xf32>
    %135 = math.exp %134 : vector<32x128xf32>
    %cst_54 = arith.constant 1.000000e+00 : f32
    %136 = vector.broadcast %cst_54 : f32 to vector<32x128xf32>
    %137 = arith.addf %136, %135 : vector<32x128xf32>
    %138 = arith.divf %136, %137 : vector<32x128xf32>
    %139 = arith.mulf %133, %138 : vector<32x128xf32>
    %140 = vector.extract_strided_slice %139 {offsets = [0, 0], sizes = [32, 64], strides = [1, 1]} : vector<32x128xf32> to vector<32x64xf32>
    %141 = vector.extract_strided_slice %139 {offsets = [0, 64], sizes = [32, 16], strides = [1, 1]} : vector<32x128xf32> to vector<32x16xf32>
    %142 = vector.extract_strided_slice %139 {offsets = [0, 80], sizes = [32, 16], strides = [1, 1]} : vector<32x128xf32> to vector<32x16xf32>
    %143 = vector.broadcast %91 : vector<1x4xf32> to vector<32x4xf32>
    %144 = arith.mulf %87, %143 : vector<32x4xf32>
    %cst_55 = arith.constant dense<0.000000e+00> : vector<32x4xf32>
    %145 = tpu.matmul %0, %144, %cst_55 {dimension_numbers = #tpu.dot_dimension_numbers<[1], [0], [0], [1], [0, 0, 1, 1], [], []>} : vector<32x32xf32>, vector<32x4xf32>, vector<32x4xf32> -> vector<32x4xf32>
    %cst_56 = arith.constant dense<0.000000e+00> : vector<4x32xf32>
    %146 = tpu.matmul %144, %1, %cst_56 {dimension_numbers = #tpu.dot_dimension_numbers<[0], [0], [1], [1], [0, 1, 1, 1], [], []>} : vector<32x4xf32>, vector<32x32xf32>, vector<4x32xf32> -> vector<4x32xf32>
    %cst_57 = arith.constant dense<0.000000e+00> : vector<32x32xf32>
    %147 = tpu.matmul %142, %141, %cst_57 {dimension_numbers = #tpu.dot_dimension_numbers<[1], [1], [0], [0], [0, 0, 1, 0], [], []>} : vector<32x16xf32>, vector<32x16xf32>, vector<32x32xf32> -> vector<32x32xf32>
    %c0_58 = arith.constant 0 : index
    %c0_59 = arith.constant 0 : index
    %c0_60 = arith.constant 0 : index
    %148 = vector.load %arg13[%c0_58, %c0_59, %c0_60] : memref<2x2x64xf32, #tpu.memory_space<vmem>>, vector<1x2x64xf32>
    %149 = vector.shape_cast %148 : vector<1x2x64xf32> to vector<2x64xf32>
    %150 = vector.extract_strided_slice %145 {offsets = [0, 0], sizes = [32, 1], strides = [1, 1]} : vector<32x4xf32> to vector<32x1xf32>
    %151 = vector.extract_strided_slice %146 {offsets = [0, 0], sizes = [1, 32], strides = [1, 1]} : vector<4x32xf32> to vector<1x32xf32>
    %152 = vector.broadcast %150 : vector<32x1xf32> to vector<32x32xf32>
    %153 = vector.broadcast %151 : vector<1x32xf32> to vector<32x32xf32>
    %154 = arith.subf %152, %153 : vector<32x32xf32>
    %cst_61 = arith.constant -1.000000e+09 : f32
    %155 = vector.broadcast %cst_61 : f32 to vector<32x32xf32>
    %156 = arith.select %3, %154, %155 : vector<32x32xi1>, vector<32x32xf32>
    %157 = math.exp %156 : vector<32x32xf32>
    %158 = arith.mulf %147, %157 : vector<32x32xf32>
    %159 = vector.extract_strided_slice %140 {offsets = [0, 0], sizes = [32, 16], strides = [1, 1]} : vector<32x64xf32> to vector<32x16xf32>
    %160 = vector.extract_strided_slice %87 {offsets = [0, 0], sizes = [32, 1], strides = [1, 1]} : vector<32x4xf32> to vector<32x1xf32>
    %161 = vector.broadcast %160 : vector<32x1xf32> to vector<32x16xf32>
    %162 = arith.mulf %159, %161 : vector<32x16xf32>
    %cst_62 = arith.constant dense<0.000000e+00> : vector<32x16xf32>
    %163 = tpu.matmul %158, %162, %cst_62 {dimension_numbers = #tpu.dot_dimension_numbers<[1], [0], [0], [1], [0, 0, 1, 1], [], []>} : vector<32x32xf32>, vector<32x16xf32>, vector<32x16xf32> -> vector<32x16xf32>
    %164 = vector.extract_strided_slice %145 {offsets = [0, 1], sizes = [32, 1], strides = [1, 1]} : vector<32x4xf32> to vector<32x1xf32>
    %165 = vector.extract_strided_slice %146 {offsets = [1, 0], sizes = [1, 32], strides = [1, 1]} : vector<4x32xf32> to vector<1x32xf32>
    %166 = vector.broadcast %164 : vector<32x1xf32> to vector<32x32xf32>
    %167 = vector.broadcast %165 : vector<1x32xf32> to vector<32x32xf32>
    %168 = arith.subf %166, %167 : vector<32x32xf32>
    %cst_63 = arith.constant -1.000000e+09 : f32
    %169 = vector.broadcast %cst_63 : f32 to vector<32x32xf32>
    %170 = arith.select %3, %168, %169 : vector<32x32xi1>, vector<32x32xf32>
    %171 = math.exp %170 : vector<32x32xf32>
    %172 = arith.mulf %147, %171 : vector<32x32xf32>
    %173 = vector.extract_strided_slice %140 {offsets = [0, 16], sizes = [32, 16], strides = [1, 1]} : vector<32x64xf32> to vector<32x16xf32>
    %174 = vector.extract_strided_slice %87 {offsets = [0, 1], sizes = [32, 1], strides = [1, 1]} : vector<32x4xf32> to vector<32x1xf32>
    %175 = vector.broadcast %174 : vector<32x1xf32> to vector<32x16xf32>
    %176 = arith.mulf %173, %175 : vector<32x16xf32>
    %cst_64 = arith.constant dense<0.000000e+00> : vector<32x16xf32>
    %177 = tpu.matmul %172, %176, %cst_64 {dimension_numbers = #tpu.dot_dimension_numbers<[1], [0], [0], [1], [0, 0, 1, 1], [], []>} : vector<32x32xf32>, vector<32x16xf32>, vector<32x16xf32> -> vector<32x16xf32>
    %178 = vector.extract_strided_slice %145 {offsets = [0, 2], sizes = [32, 1], strides = [1, 1]} : vector<32x4xf32> to vector<32x1xf32>
    %179 = vector.extract_strided_slice %146 {offsets = [2, 0], sizes = [1, 32], strides = [1, 1]} : vector<4x32xf32> to vector<1x32xf32>
    %180 = vector.broadcast %178 : vector<32x1xf32> to vector<32x32xf32>
    %181 = vector.broadcast %179 : vector<1x32xf32> to vector<32x32xf32>
    %182 = arith.subf %180, %181 : vector<32x32xf32>
    %cst_65 = arith.constant -1.000000e+09 : f32
    %183 = vector.broadcast %cst_65 : f32 to vector<32x32xf32>
    %184 = arith.select %3, %182, %183 : vector<32x32xi1>, vector<32x32xf32>
    %185 = math.exp %184 : vector<32x32xf32>
    %186 = arith.mulf %147, %185 : vector<32x32xf32>
    %187 = vector.extract_strided_slice %140 {offsets = [0, 32], sizes = [32, 16], strides = [1, 1]} : vector<32x64xf32> to vector<32x16xf32>
    %188 = vector.extract_strided_slice %87 {offsets = [0, 2], sizes = [32, 1], strides = [1, 1]} : vector<32x4xf32> to vector<32x1xf32>
    %189 = vector.broadcast %188 : vector<32x1xf32> to vector<32x16xf32>
    %190 = arith.mulf %187, %189 : vector<32x16xf32>
    %cst_66 = arith.constant dense<0.000000e+00> : vector<32x16xf32>
    %191 = tpu.matmul %186, %190, %cst_66 {dimension_numbers = #tpu.dot_dimension_numbers<[1], [0], [0], [1], [0, 0, 1, 1], [], []>} : vector<32x32xf32>, vector<32x16xf32>, vector<32x16xf32> -> vector<32x16xf32>
    %192 = vector.extract_strided_slice %145 {offsets = [0, 3], sizes = [32, 1], strides = [1, 1]} : vector<32x4xf32> to vector<32x1xf32>
    %193 = vector.extract_strided_slice %146 {offsets = [3, 0], sizes = [1, 32], strides = [1, 1]} : vector<4x32xf32> to vector<1x32xf32>
    %194 = vector.broadcast %192 : vector<32x1xf32> to vector<32x32xf32>
    %195 = vector.broadcast %193 : vector<1x32xf32> to vector<32x32xf32>
    %196 = arith.subf %194, %195 : vector<32x32xf32>
    %cst_67 = arith.constant -1.000000e+09 : f32
    %197 = vector.broadcast %cst_67 : f32 to vector<32x32xf32>
    %198 = arith.select %3, %196, %197 : vector<32x32xi1>, vector<32x32xf32>
    %199 = math.exp %198 : vector<32x32xf32>
    %200 = arith.mulf %147, %199 : vector<32x32xf32>
    %201 = vector.extract_strided_slice %140 {offsets = [0, 48], sizes = [32, 16], strides = [1, 1]} : vector<32x64xf32> to vector<32x16xf32>
    %202 = vector.extract_strided_slice %87 {offsets = [0, 3], sizes = [32, 1], strides = [1, 1]} : vector<32x4xf32> to vector<32x1xf32>
    %203 = vector.broadcast %202 : vector<32x1xf32> to vector<32x16xf32>
    %204 = arith.mulf %201, %203 : vector<32x16xf32>
    %cst_68 = arith.constant dense<0.000000e+00> : vector<32x16xf32>
    %205 = tpu.matmul %200, %204, %cst_68 {dimension_numbers = #tpu.dot_dimension_numbers<[1], [0], [0], [1], [0, 0, 1, 1], [], []>} : vector<32x32xf32>, vector<32x16xf32>, vector<32x16xf32> -> vector<32x16xf32>
    %206 = tpu.concatenate %163, %177, %191, %205 in 1 : vector<32x16xf32>, vector<32x16xf32>, vector<32x16xf32>, vector<32x16xf32> -> vector<32x64xf32>
    %207 = vector.extract_strided_slice %149 {offsets = [0, 0], sizes = [1, 64], strides = [1, 1]} : vector<2x64xf32> to vector<1x64xf32>
    %208 = vector.broadcast %207 : vector<1x64xf32> to vector<32x64xf32>
    %209 = arith.mulf %140, %208 : vector<32x64xf32>
    %210 = arith.addf %206, %209 : vector<32x64xf32>
    %211 = arith.negf %71 : vector<32x64xf32>
    %212 = math.exp %211 : vector<32x64xf32>
    %cst_69 = arith.constant 1.000000e+00 : f32
    %213 = vector.broadcast %cst_69 : f32 to vector<32x64xf32>
    %214 = arith.addf %213, %212 : vector<32x64xf32>
    %215 = arith.divf %213, %214 : vector<32x64xf32>
    %216 = arith.mulf %71, %215 : vector<32x64xf32>
    %217 = arith.mulf %210, %216 : vector<32x64xf32>
    %218 = arith.mulf %217, %217 : vector<32x64xf32>
    %cst_70 = arith.constant dense<0.000000e+00> : vector<32xf32>
    %219 = vector.multi_reduction <add>, %218, %cst_70 [1] : vector<32x64xf32> to vector<32xf32>
    %220 = vector.shape_cast %219 : vector<32xf32> to vector<32x1xf32>
    %cst_71 = arith.constant 6.400000e+01 : f32
    %221 = vector.broadcast %cst_71 : f32 to vector<32x1xf32>
    %222 = arith.divf %220, %221 : vector<32x1xf32>
    %cst_72 = arith.constant 9.99999974E-6 : f32
    %223 = vector.broadcast %cst_72 : f32 to vector<32x1xf32>
    %224 = arith.addf %222, %223 : vector<32x1xf32>
    %225 = math.rsqrt %224 : vector<32x1xf32>
    %226 = vector.broadcast %225 : vector<32x1xf32> to vector<32x64xf32>
    %227 = arith.mulf %217, %226 : vector<32x64xf32>
    %228 = vector.extract_strided_slice %149 {offsets = [1, 0], sizes = [1, 64], strides = [1, 1]} : vector<2x64xf32> to vector<1x64xf32>
    %229 = vector.broadcast %228 : vector<1x64xf32> to vector<32x64xf32>
    %230 = arith.mulf %227, %229 : vector<32x64xf32>
    %231 = arith.truncf %230 : vector<32x64xf32> to vector<32x64xbf16>
    %c0_73 = arith.constant 0 : index
    %c0_74 = arith.constant 0 : index
    %c0_75 = arith.constant 0 : index
    %232 = vector.load %arg14[%c0_73, %c0_74, %c0_75] : memref<2x64x32xbf16, #tpu.memory_space<vmem>>, vector<1x64x32xbf16>
    %233 = vector.shape_cast %232 : vector<1x64x32xbf16> to vector<64x32xbf16>
    %cst_76 = arith.constant dense<0.000000e+00> : vector<32x32xf32>
    %234 = tpu.matmul %231, %233, %cst_76 {dimension_numbers = #tpu.dot_dimension_numbers<[1], [0], [0], [1], [0, 0, 1, 1], [], []>} : vector<32x64xbf16>, vector<64x32xbf16>, vector<32x32xf32> -> vector<32x32xf32>
    %c0_77 = arith.constant 0 : index
    %c0_78 = arith.constant 0 : index
    %c0_79 = arith.constant 0 : index
    %235 = vector.load %arg15[%c0_77, %c0_78, %c0_79] : memref<2x2x32xf32, #tpu.memory_space<vmem>>, vector<1x2x32xf32>
    %236 = vector.shape_cast %235 : vector<1x2x32xf32> to vector<2x32xf32>
    %237 = arith.addf %63, %234 : vector<32x32xf32>
    %cst_80 = arith.constant dense<0.000000e+00> : vector<32xf32>
    %238 = vector.multi_reduction <add>, %237, %cst_80 [1] : vector<32x32xf32> to vector<32xf32>
    %239 = vector.shape_cast %238 : vector<32xf32> to vector<32x1xf32>
    %cst_81 = arith.constant 3.200000e+01 : f32
    %240 = vector.broadcast %cst_81 : f32 to vector<32x1xf32>
    %241 = arith.divf %239, %240 : vector<32x1xf32>
    %242 = vector.broadcast %241 : vector<32x1xf32> to vector<32x32xf32>
    %243 = arith.subf %237, %242 : vector<32x32xf32>
    %244 = arith.mulf %243, %243 : vector<32x32xf32>
    %cst_82 = arith.constant dense<0.000000e+00> : vector<32xf32>
    %245 = vector.multi_reduction <add>, %244, %cst_82 [1] : vector<32x32xf32> to vector<32xf32>
    %246 = vector.shape_cast %245 : vector<32xf32> to vector<32x1xf32>
    %cst_83 = arith.constant 3.200000e+01 : f32
    %247 = vector.broadcast %cst_83 : f32 to vector<32x1xf32>
    %248 = arith.divf %246, %247 : vector<32x1xf32>
    %cst_84 = arith.constant 9.99999974E-6 : f32
    %249 = vector.broadcast %cst_84 : f32 to vector<32x1xf32>
    %250 = arith.addf %248, %249 : vector<32x1xf32>
    %251 = math.rsqrt %250 : vector<32x1xf32>
    %252 = vector.broadcast %251 : vector<32x1xf32> to vector<32x32xf32>
    %253 = arith.mulf %243, %252 : vector<32x32xf32>
    %254 = vector.extract_strided_slice %236 {offsets = [0, 0], sizes = [1, 32], strides = [1, 1]} : vector<2x32xf32> to vector<1x32xf32>
    %255 = vector.broadcast %254 : vector<1x32xf32> to vector<32x32xf32>
    %256 = arith.mulf %253, %255 : vector<32x32xf32>
    %257 = vector.extract_strided_slice %236 {offsets = [1, 0], sizes = [1, 32], strides = [1, 1]} : vector<2x32xf32> to vector<1x32xf32>
    %258 = vector.broadcast %257 : vector<1x32xf32> to vector<32x32xf32>
    %259 = arith.addf %256, %258 : vector<32x32xf32>
    %260 = arith.truncf %259 : vector<32x32xf32> to vector<32x32xbf16>
    %c1 = arith.constant 1 : index
    %c0_85 = arith.constant 0 : index
    %c0_86 = arith.constant 0 : index
    %261 = vector.load %arg8[%c1, %c0_85, %c0_86] : memref<2x32x128xbf16, #tpu.memory_space<vmem>>, vector<1x32x128xbf16>
    %262 = vector.shape_cast %261 : vector<1x32x128xbf16> to vector<32x128xbf16>
    %cst_87 = arith.constant dense<0.000000e+00> : vector<32x128xf32>
    %263 = tpu.matmul %260, %262, %cst_87 {dimension_numbers = #tpu.dot_dimension_numbers<[1], [0], [0], [1], [0, 0, 1, 1], [], []>} : vector<32x32xbf16>, vector<32x128xbf16>, vector<32x128xf32> -> vector<32x128xf32>
    %c1_88 = arith.constant 1 : index
    %c0_89 = arith.constant 0 : index
    %c0_90 = arith.constant 0 : index
    %264 = vector.load %arg9[%c1_88, %c0_89, %c0_90] : memref<2x32x128xbf16, #tpu.memory_space<vmem>>, vector<1x32x128xbf16>
    %265 = vector.shape_cast %264 : vector<1x32x128xbf16> to vector<32x128xbf16>
    %cst_91 = arith.constant dense<0.000000e+00> : vector<32x128xf32>
    %266 = tpu.matmul %260, %265, %cst_91 {dimension_numbers = #tpu.dot_dimension_numbers<[1], [0], [0], [1], [0, 0, 1, 1], [], []>} : vector<32x32xbf16>, vector<32x128xbf16>, vector<32x128xf32> -> vector<32x128xf32>
    %267 = vector.extract_strided_slice %263 {offsets = [0, 0], sizes = [32, 64], strides = [1, 1]} : vector<32x128xf32> to vector<32x64xf32>
    %268 = vector.extract_strided_slice %263 {offsets = [0, 64], sizes = [32, 4], strides = [1, 1]} : vector<32x128xf32> to vector<32x4xf32>
    %c1_92 = arith.constant 1 : index
    %c0_93 = arith.constant 0 : index
    %c0_94 = arith.constant 0 : index
    %269 = vector.load %arg12[%c1_92, %c0_93, %c0_94] : memref<2x2x4xf32, #tpu.memory_space<vmem>>, vector<1x2x4xf32>
    %270 = vector.shape_cast %269 : vector<1x2x4xf32> to vector<2x4xf32>
    %271 = vector.extract_strided_slice %270 {offsets = [0, 0], sizes = [1, 4], strides = [1, 1]} : vector<2x4xf32> to vector<1x4xf32>
    %272 = vector.broadcast %271 : vector<1x4xf32> to vector<32x4xf32>
    %273 = arith.addf %268, %272 : vector<32x4xf32>
    %cst_95 = arith.constant 0.000000e+00 : f32
    %274 = vector.broadcast %cst_95 : f32 to vector<32x4xf32>
    %275 = arith.maximumf %273, %274 : vector<32x4xf32>
    %276 = math.absf %273 : vector<32x4xf32>
    %cst_96 = arith.constant 0.000000e+00 : f32
    %277 = vector.broadcast %cst_96 : f32 to vector<32x4xf32>
    %278 = arith.subf %277, %276 : vector<32x4xf32>
    %279 = math.exp %278 : vector<32x4xf32>
    %cst_97 = arith.constant 1.000000e+00 : f32
    %280 = vector.broadcast %cst_97 : f32 to vector<32x4xf32>
    %281 = arith.addf %280, %279 : vector<32x4xf32>
    %282 = math.log %281 : vector<32x4xf32>
    %283 = arith.addf %275, %282 : vector<32x4xf32>
    %284 = vector.extract_strided_slice %270 {offsets = [1, 0], sizes = [1, 4], strides = [1, 1]} : vector<2x4xf32> to vector<1x4xf32>
    %285 = math.exp %284 : vector<1x4xf32>
    %cst_98 = arith.constant 0.000000e+00 : f32
    %286 = vector.broadcast %cst_98 : f32 to vector<1x4xf32>
    %287 = arith.subf %286, %285 : vector<1x4xf32>
    %c1_99 = arith.constant 1 : index
    %c0_100 = arith.constant 0 : index
    %c0_101 = arith.constant 0 : index
    %288 = vector.load %arg10[%c1_99, %c0_100, %c0_101] : memref<2x4x128xf32, #tpu.memory_space<vmem>>, vector<1x4x128xf32>
    %289 = vector.shape_cast %288 : vector<1x4x128xf32> to vector<4x128xf32>
    %c1_102 = arith.constant 1 : index
    %c0_103 = arith.constant 0 : index
    %c0_104 = arith.constant 0 : index
    %290 = vector.load %arg11[%c1_102, %c0_103, %c0_104] : memref<2x1x128xf32, #tpu.memory_space<vmem>>, vector<1x1x128xf32>
    %291 = vector.shape_cast %290 : vector<1x1x128xf32> to vector<1x128xf32>
    %292 = vector.extract_strided_slice %289 {offsets = [3, 0], sizes = [1, 128], strides = [1, 1]} : vector<4x128xf32> to vector<1x128xf32>
    %293 = vector.broadcast %292 : vector<1x128xf32> to vector<32x128xf32>
    %294 = arith.mulf %266, %293 : vector<32x128xf32>
    %295 = vector.broadcast %291 : vector<1x128xf32> to vector<32x128xf32>
    %296 = arith.addf %295, %294 : vector<32x128xf32>
    %c1_i32_105 = arith.constant 1 : i32
    %297 = vector.broadcast %c1_i32_105 : i32 to vector<32x1xi32>
    %298 = arith.cmpi sge, %20, %297 : vector<32x1xi32>
    %c1_i32_106 = arith.constant 1 : i32
    %299 = tpu.dynamic_rotate %266 by %c1_i32_106 dim 0 : vector<32x128xf32>, i32 -> vector<32x128xf32>
    %cst_107 = arith.constant 0.000000e+00 : f32
    %300 = vector.shape_cast %298 : vector<32x1xi1> to vector<32x1xi1>
    %301 = vector.broadcast %300 : vector<32x1xi1> to vector<32x128xi1>
    %302 = vector.broadcast %cst_107 : f32 to vector<32x128xf32>
    %303 = arith.select %301, %299, %302 : vector<32x128xi1>, vector<32x128xf32>
    %304 = vector.extract_strided_slice %289 {offsets = [2, 0], sizes = [1, 128], strides = [1, 1]} : vector<4x128xf32> to vector<1x128xf32>
    %305 = vector.broadcast %304 : vector<1x128xf32> to vector<32x128xf32>
    %306 = arith.mulf %303, %305 : vector<32x128xf32>
    %307 = arith.addf %296, %306 : vector<32x128xf32>
    %c2_i32_108 = arith.constant 2 : i32
    %308 = vector.broadcast %c2_i32_108 : i32 to vector<32x1xi32>
    %309 = arith.cmpi sge, %20, %308 : vector<32x1xi32>
    %c2_i32_109 = arith.constant 2 : i32
    %310 = tpu.dynamic_rotate %266 by %c2_i32_109 dim 0 : vector<32x128xf32>, i32 -> vector<32x128xf32>
    %cst_110 = arith.constant 0.000000e+00 : f32
    %311 = vector.shape_cast %309 : vector<32x1xi1> to vector<32x1xi1>
    %312 = vector.broadcast %311 : vector<32x1xi1> to vector<32x128xi1>
    %313 = vector.broadcast %cst_110 : f32 to vector<32x128xf32>
    %314 = arith.select %312, %310, %313 : vector<32x128xi1>, vector<32x128xf32>
    %315 = vector.extract_strided_slice %289 {offsets = [1, 0], sizes = [1, 128], strides = [1, 1]} : vector<4x128xf32> to vector<1x128xf32>
    %316 = vector.broadcast %315 : vector<1x128xf32> to vector<32x128xf32>
    %317 = arith.mulf %314, %316 : vector<32x128xf32>
    %318 = arith.addf %307, %317 : vector<32x128xf32>
    %c3_i32_111 = arith.constant 3 : i32
    %319 = vector.broadcast %c3_i32_111 : i32 to vector<32x1xi32>
    %320 = arith.cmpi sge, %20, %319 : vector<32x1xi32>
    %c3_i32_112 = arith.constant 3 : i32
    %321 = tpu.dynamic_rotate %266 by %c3_i32_112 dim 0 : vector<32x128xf32>, i32 -> vector<32x128xf32>
    %cst_113 = arith.constant 0.000000e+00 : f32
    %322 = vector.shape_cast %320 : vector<32x1xi1> to vector<32x1xi1>
    %323 = vector.broadcast %322 : vector<32x1xi1> to vector<32x128xi1>
    %324 = vector.broadcast %cst_113 : f32 to vector<32x128xf32>
    %325 = arith.select %323, %321, %324 : vector<32x128xi1>, vector<32x128xf32>
    %326 = vector.extract_strided_slice %289 {offsets = [0, 0], sizes = [1, 128], strides = [1, 1]} : vector<4x128xf32> to vector<1x128xf32>
    %327 = vector.broadcast %326 : vector<1x128xf32> to vector<32x128xf32>
    %328 = arith.mulf %325, %327 : vector<32x128xf32>
    %329 = arith.addf %318, %328 : vector<32x128xf32>
    %330 = arith.negf %329 : vector<32x128xf32>
    %331 = math.exp %330 : vector<32x128xf32>
    %cst_114 = arith.constant 1.000000e+00 : f32
    %332 = vector.broadcast %cst_114 : f32 to vector<32x128xf32>
    %333 = arith.addf %332, %331 : vector<32x128xf32>
    %334 = arith.divf %332, %333 : vector<32x128xf32>
    %335 = arith.mulf %329, %334 : vector<32x128xf32>
    %336 = vector.extract_strided_slice %335 {offsets = [0, 0], sizes = [32, 64], strides = [1, 1]} : vector<32x128xf32> to vector<32x64xf32>
    %337 = vector.extract_strided_slice %335 {offsets = [0, 64], sizes = [32, 16], strides = [1, 1]} : vector<32x128xf32> to vector<32x16xf32>
    %338 = vector.extract_strided_slice %335 {offsets = [0, 80], sizes = [32, 16], strides = [1, 1]} : vector<32x128xf32> to vector<32x16xf32>
    %339 = vector.broadcast %287 : vector<1x4xf32> to vector<32x4xf32>
    %340 = arith.mulf %283, %339 : vector<32x4xf32>
    %cst_115 = arith.constant dense<0.000000e+00> : vector<32x4xf32>
    %341 = tpu.matmul %0, %340, %cst_115 {dimension_numbers = #tpu.dot_dimension_numbers<[1], [0], [0], [1], [0, 0, 1, 1], [], []>} : vector<32x32xf32>, vector<32x4xf32>, vector<32x4xf32> -> vector<32x4xf32>
    %cst_116 = arith.constant dense<0.000000e+00> : vector<4x32xf32>
    %342 = tpu.matmul %340, %1, %cst_116 {dimension_numbers = #tpu.dot_dimension_numbers<[0], [0], [1], [1], [0, 1, 1, 1], [], []>} : vector<32x4xf32>, vector<32x32xf32>, vector<4x32xf32> -> vector<4x32xf32>
    %cst_117 = arith.constant dense<0.000000e+00> : vector<32x32xf32>
    %343 = tpu.matmul %338, %337, %cst_117 {dimension_numbers = #tpu.dot_dimension_numbers<[1], [1], [0], [0], [0, 0, 1, 0], [], []>} : vector<32x16xf32>, vector<32x16xf32>, vector<32x32xf32> -> vector<32x32xf32>
    %c1_118 = arith.constant 1 : index
    %c0_119 = arith.constant 0 : index
    %c0_120 = arith.constant 0 : index
    %344 = vector.load %arg13[%c1_118, %c0_119, %c0_120] : memref<2x2x64xf32, #tpu.memory_space<vmem>>, vector<1x2x64xf32>
    %345 = vector.shape_cast %344 : vector<1x2x64xf32> to vector<2x64xf32>
    %346 = vector.extract_strided_slice %341 {offsets = [0, 0], sizes = [32, 1], strides = [1, 1]} : vector<32x4xf32> to vector<32x1xf32>
    %347 = vector.extract_strided_slice %342 {offsets = [0, 0], sizes = [1, 32], strides = [1, 1]} : vector<4x32xf32> to vector<1x32xf32>
    %348 = vector.broadcast %346 : vector<32x1xf32> to vector<32x32xf32>
    %349 = vector.broadcast %347 : vector<1x32xf32> to vector<32x32xf32>
    %350 = arith.subf %348, %349 : vector<32x32xf32>
    %cst_121 = arith.constant -1.000000e+09 : f32
    %351 = vector.broadcast %cst_121 : f32 to vector<32x32xf32>
    %352 = arith.select %3, %350, %351 : vector<32x32xi1>, vector<32x32xf32>
    %353 = math.exp %352 : vector<32x32xf32>
    %354 = arith.mulf %343, %353 : vector<32x32xf32>
    %355 = vector.extract_strided_slice %336 {offsets = [0, 0], sizes = [32, 16], strides = [1, 1]} : vector<32x64xf32> to vector<32x16xf32>
    %356 = vector.extract_strided_slice %283 {offsets = [0, 0], sizes = [32, 1], strides = [1, 1]} : vector<32x4xf32> to vector<32x1xf32>
    %357 = vector.broadcast %356 : vector<32x1xf32> to vector<32x16xf32>
    %358 = arith.mulf %355, %357 : vector<32x16xf32>
    %cst_122 = arith.constant dense<0.000000e+00> : vector<32x16xf32>
    %359 = tpu.matmul %354, %358, %cst_122 {dimension_numbers = #tpu.dot_dimension_numbers<[1], [0], [0], [1], [0, 0, 1, 1], [], []>} : vector<32x32xf32>, vector<32x16xf32>, vector<32x16xf32> -> vector<32x16xf32>
    %360 = vector.extract_strided_slice %341 {offsets = [0, 1], sizes = [32, 1], strides = [1, 1]} : vector<32x4xf32> to vector<32x1xf32>
    %361 = vector.extract_strided_slice %342 {offsets = [1, 0], sizes = [1, 32], strides = [1, 1]} : vector<4x32xf32> to vector<1x32xf32>
    %362 = vector.broadcast %360 : vector<32x1xf32> to vector<32x32xf32>
    %363 = vector.broadcast %361 : vector<1x32xf32> to vector<32x32xf32>
    %364 = arith.subf %362, %363 : vector<32x32xf32>
    %cst_123 = arith.constant -1.000000e+09 : f32
    %365 = vector.broadcast %cst_123 : f32 to vector<32x32xf32>
    %366 = arith.select %3, %364, %365 : vector<32x32xi1>, vector<32x32xf32>
    %367 = math.exp %366 : vector<32x32xf32>
    %368 = arith.mulf %343, %367 : vector<32x32xf32>
    %369 = vector.extract_strided_slice %336 {offsets = [0, 16], sizes = [32, 16], strides = [1, 1]} : vector<32x64xf32> to vector<32x16xf32>
    %370 = vector.extract_strided_slice %283 {offsets = [0, 1], sizes = [32, 1], strides = [1, 1]} : vector<32x4xf32> to vector<32x1xf32>
    %371 = vector.broadcast %370 : vector<32x1xf32> to vector<32x16xf32>
    %372 = arith.mulf %369, %371 : vector<32x16xf32>
    %cst_124 = arith.constant dense<0.000000e+00> : vector<32x16xf32>
    %373 = tpu.matmul %368, %372, %cst_124 {dimension_numbers = #tpu.dot_dimension_numbers<[1], [0], [0], [1], [0, 0, 1, 1], [], []>} : vector<32x32xf32>, vector<32x16xf32>, vector<32x16xf32> -> vector<32x16xf32>
    %374 = vector.extract_strided_slice %341 {offsets = [0, 2], sizes = [32, 1], strides = [1, 1]} : vector<32x4xf32> to vector<32x1xf32>
    %375 = vector.extract_strided_slice %342 {offsets = [2, 0], sizes = [1, 32], strides = [1, 1]} : vector<4x32xf32> to vector<1x32xf32>
    %376 = vector.broadcast %374 : vector<32x1xf32> to vector<32x32xf32>
    %377 = vector.broadcast %375 : vector<1x32xf32> to vector<32x32xf32>
    %378 = arith.subf %376, %377 : vector<32x32xf32>
    %cst_125 = arith.constant -1.000000e+09 : f32
    %379 = vector.broadcast %cst_125 : f32 to vector<32x32xf32>
    %380 = arith.select %3, %378, %379 : vector<32x32xi1>, vector<32x32xf32>
    %381 = math.exp %380 : vector<32x32xf32>
    %382 = arith.mulf %343, %381 : vector<32x32xf32>
    %383 = vector.extract_strided_slice %336 {offsets = [0, 32], sizes = [32, 16], strides = [1, 1]} : vector<32x64xf32> to vector<32x16xf32>
    %384 = vector.extract_strided_slice %283 {offsets = [0, 2], sizes = [32, 1], strides = [1, 1]} : vector<32x4xf32> to vector<32x1xf32>
    %385 = vector.broadcast %384 : vector<32x1xf32> to vector<32x16xf32>
    %386 = arith.mulf %383, %385 : vector<32x16xf32>
    %cst_126 = arith.constant dense<0.000000e+00> : vector<32x16xf32>
    %387 = tpu.matmul %382, %386, %cst_126 {dimension_numbers = #tpu.dot_dimension_numbers<[1], [0], [0], [1], [0, 0, 1, 1], [], []>} : vector<32x32xf32>, vector<32x16xf32>, vector<32x16xf32> -> vector<32x16xf32>
    %388 = vector.extract_strided_slice %341 {offsets = [0, 3], sizes = [32, 1], strides = [1, 1]} : vector<32x4xf32> to vector<32x1xf32>
    %389 = vector.extract_strided_slice %342 {offsets = [3, 0], sizes = [1, 32], strides = [1, 1]} : vector<4x32xf32> to vector<1x32xf32>
    %390 = vector.broadcast %388 : vector<32x1xf32> to vector<32x32xf32>
    %391 = vector.broadcast %389 : vector<1x32xf32> to vector<32x32xf32>
    %392 = arith.subf %390, %391 : vector<32x32xf32>
    %cst_127 = arith.constant -1.000000e+09 : f32
    %393 = vector.broadcast %cst_127 : f32 to vector<32x32xf32>
    %394 = arith.select %3, %392, %393 : vector<32x32xi1>, vector<32x32xf32>
    %395 = math.exp %394 : vector<32x32xf32>
    %396 = arith.mulf %343, %395 : vector<32x32xf32>
    %397 = vector.extract_strided_slice %336 {offsets = [0, 48], sizes = [32, 16], strides = [1, 1]} : vector<32x64xf32> to vector<32x16xf32>
    %398 = vector.extract_strided_slice %283 {offsets = [0, 3], sizes = [32, 1], strides = [1, 1]} : vector<32x4xf32> to vector<32x1xf32>
    %399 = vector.broadcast %398 : vector<32x1xf32> to vector<32x16xf32>
    %400 = arith.mulf %397, %399 : vector<32x16xf32>
    %cst_128 = arith.constant dense<0.000000e+00> : vector<32x16xf32>
    %401 = tpu.matmul %396, %400, %cst_128 {dimension_numbers = #tpu.dot_dimension_numbers<[1], [0], [0], [1], [0, 0, 1, 1], [], []>} : vector<32x32xf32>, vector<32x16xf32>, vector<32x16xf32> -> vector<32x16xf32>
    %402 = tpu.concatenate %359, %373, %387, %401 in 1 : vector<32x16xf32>, vector<32x16xf32>, vector<32x16xf32>, vector<32x16xf32> -> vector<32x64xf32>
    %403 = vector.extract_strided_slice %345 {offsets = [0, 0], sizes = [1, 64], strides = [1, 1]} : vector<2x64xf32> to vector<1x64xf32>
    %404 = vector.broadcast %403 : vector<1x64xf32> to vector<32x64xf32>
    %405 = arith.mulf %336, %404 : vector<32x64xf32>
    %406 = arith.addf %402, %405 : vector<32x64xf32>
    %407 = arith.negf %267 : vector<32x64xf32>
    %408 = math.exp %407 : vector<32x64xf32>
    %cst_129 = arith.constant 1.000000e+00 : f32
    %409 = vector.broadcast %cst_129 : f32 to vector<32x64xf32>
    %410 = arith.addf %409, %408 : vector<32x64xf32>
    %411 = arith.divf %409, %410 : vector<32x64xf32>
    %412 = arith.mulf %267, %411 : vector<32x64xf32>
    %413 = arith.mulf %406, %412 : vector<32x64xf32>
    %414 = arith.mulf %413, %413 : vector<32x64xf32>
    %cst_130 = arith.constant dense<0.000000e+00> : vector<32xf32>
    %415 = vector.multi_reduction <add>, %414, %cst_130 [1] : vector<32x64xf32> to vector<32xf32>
    %416 = vector.shape_cast %415 : vector<32xf32> to vector<32x1xf32>
    %cst_131 = arith.constant 6.400000e+01 : f32
    %417 = vector.broadcast %cst_131 : f32 to vector<32x1xf32>
    %418 = arith.divf %416, %417 : vector<32x1xf32>
    %cst_132 = arith.constant 9.99999974E-6 : f32
    %419 = vector.broadcast %cst_132 : f32 to vector<32x1xf32>
    %420 = arith.addf %418, %419 : vector<32x1xf32>
    %421 = math.rsqrt %420 : vector<32x1xf32>
    %422 = vector.broadcast %421 : vector<32x1xf32> to vector<32x64xf32>
    %423 = arith.mulf %413, %422 : vector<32x64xf32>
    %424 = vector.extract_strided_slice %345 {offsets = [1, 0], sizes = [1, 64], strides = [1, 1]} : vector<2x64xf32> to vector<1x64xf32>
    %425 = vector.broadcast %424 : vector<1x64xf32> to vector<32x64xf32>
    %426 = arith.mulf %423, %425 : vector<32x64xf32>
    %427 = arith.truncf %426 : vector<32x64xf32> to vector<32x64xbf16>
    %c1_133 = arith.constant 1 : index
    %c0_134 = arith.constant 0 : index
    %c0_135 = arith.constant 0 : index
    %428 = vector.load %arg14[%c1_133, %c0_134, %c0_135] : memref<2x64x32xbf16, #tpu.memory_space<vmem>>, vector<1x64x32xbf16>
    %429 = vector.shape_cast %428 : vector<1x64x32xbf16> to vector<64x32xbf16>
    %cst_136 = arith.constant dense<0.000000e+00> : vector<32x32xf32>
    %430 = tpu.matmul %427, %429, %cst_136 {dimension_numbers = #tpu.dot_dimension_numbers<[1], [0], [0], [1], [0, 0, 1, 1], [], []>} : vector<32x64xbf16>, vector<64x32xbf16>, vector<32x32xf32> -> vector<32x32xf32>
    %c1_137 = arith.constant 1 : index
    %c0_138 = arith.constant 0 : index
    %c0_139 = arith.constant 0 : index
    %431 = vector.load %arg15[%c1_137, %c0_138, %c0_139] : memref<2x2x32xf32, #tpu.memory_space<vmem>>, vector<1x2x32xf32>
    %432 = vector.shape_cast %431 : vector<1x2x32xf32> to vector<2x32xf32>
    %433 = arith.addf %259, %430 : vector<32x32xf32>
    %cst_140 = arith.constant dense<0.000000e+00> : vector<32xf32>
    %434 = vector.multi_reduction <add>, %433, %cst_140 [1] : vector<32x32xf32> to vector<32xf32>
    %435 = vector.shape_cast %434 : vector<32xf32> to vector<32x1xf32>
    %cst_141 = arith.constant 3.200000e+01 : f32
    %436 = vector.broadcast %cst_141 : f32 to vector<32x1xf32>
    %437 = arith.divf %435, %436 : vector<32x1xf32>
    %438 = vector.broadcast %437 : vector<32x1xf32> to vector<32x32xf32>
    %439 = arith.subf %433, %438 : vector<32x32xf32>
    %440 = arith.mulf %439, %439 : vector<32x32xf32>
    %cst_142 = arith.constant dense<0.000000e+00> : vector<32xf32>
    %441 = vector.multi_reduction <add>, %440, %cst_142 [1] : vector<32x32xf32> to vector<32xf32>
    %442 = vector.shape_cast %441 : vector<32xf32> to vector<32x1xf32>
    %cst_143 = arith.constant 3.200000e+01 : f32
    %443 = vector.broadcast %cst_143 : f32 to vector<32x1xf32>
    %444 = arith.divf %442, %443 : vector<32x1xf32>
    %cst_144 = arith.constant 9.99999974E-6 : f32
    %445 = vector.broadcast %cst_144 : f32 to vector<32x1xf32>
    %446 = arith.addf %444, %445 : vector<32x1xf32>
    %447 = math.rsqrt %446 : vector<32x1xf32>
    %448 = vector.broadcast %447 : vector<32x1xf32> to vector<32x32xf32>
    %449 = arith.mulf %439, %448 : vector<32x32xf32>
    %450 = vector.extract_strided_slice %432 {offsets = [0, 0], sizes = [1, 32], strides = [1, 1]} : vector<2x32xf32> to vector<1x32xf32>
    %451 = vector.broadcast %450 : vector<1x32xf32> to vector<32x32xf32>
    %452 = arith.mulf %449, %451 : vector<32x32xf32>
    %453 = vector.extract_strided_slice %432 {offsets = [1, 0], sizes = [1, 32], strides = [1, 1]} : vector<2x32xf32> to vector<1x32xf32>
    %454 = vector.broadcast %453 : vector<1x32xf32> to vector<32x32xf32>
    %455 = arith.addf %452, %454 : vector<32x32xf32>
    %456 = arith.truncf %455 : vector<32x32xf32> to vector<32x32xbf16>
    %c0_145 = arith.constant 0 : index
    %c0_146 = arith.constant 0 : index
    %457 = vector.load %arg7[%c0_145, %c0_146] : memref<32x4xbf16, #tpu.memory_space<vmem>>, vector<32x4xbf16>
    %cst_147 = arith.constant dense<0.000000e+00> : vector<32x4xf32>
    %458 = tpu.matmul %456, %457, %cst_147 {dimension_numbers = #tpu.dot_dimension_numbers<[1], [0], [0], [1], [0, 0, 1, 1], [], []>} : vector<32x32xbf16>, vector<32x4xbf16>, vector<32x4xf32> -> vector<32x4xf32>
    %459 = vector.shape_cast %458 : vector<32x4xf32> to vector<2x16x4xf32>
    %460 = vector.broadcast %35 : vector<2x1x4xf32> to vector<2x16x4xf32>
    %461 = arith.mulf %459, %460 : vector<2x16x4xf32>
    %462 = vector.broadcast %25 : vector<2x1x4xf32> to vector<2x16x4xf32>
    %463 = arith.addf %461, %462 : vector<2x16x4xf32>
    %464 = vector.extract_strided_slice %463 {offsets = [0, 8, 0], sizes = [2, 8, 4], strides = [1, 1, 1]} : vector<2x16x4xf32> to vector<2x8x4xf32>
    %c0_148 = arith.constant 0 : index
    %c0_149 = arith.constant 0 : index
    %c0_150 = arith.constant 0 : index
    %465 = vector.load %arg16[%c0_148, %c0_149, %c0_150] : memref<2x8x4xf32, #tpu.memory_space<vmem>>, vector<2x8x4xf32>
    tpu.vector_store %arg16[%c0_148, %c0_149, %c0_150], %464 {strides = array<i32>} : memref<2x8x4xf32, #tpu.memory_space<vmem>>, vector<2x8x4xf32>,
    return
  }
  func.func @transform_0(%arg0: i32) -> (i32, i32, i32) {
    %c0_i32 = arith.constant 0 : i32
    %c0_i32_0 = arith.constant 0 : i32
    %c0_i32_1 = arith.constant 0 : i32
    return %arg0, %c0_i32, %c0_i32_0 : i32, i32, i32
  }
  func.func @transform_1(%arg0: i32) -> (i32, i32, i32) {
    %c0_i32 = arith.constant 0 : i32
    %c0_i32_0 = arith.constant 0 : i32
    %c0_i32_1 = arith.constant 0 : i32
    return %arg0, %c0_i32, %c0_i32_0 : i32, i32, i32
  }
  func.func @transform_2(%arg0: i32) -> (i32, i32) {
    %c0_i32 = arith.constant 0 : i32
    %c0_i32_0 = arith.constant 0 : i32
    %c0_i32_1 = arith.constant 0 : i32
    return %c0_i32, %c0_i32_0 : i32, i32
  }
  func.func @transform_3(%arg0: i32) -> (i32, i32) {
    %c0_i32 = arith.constant 0 : i32
    %c0_i32_0 = arith.constant 0 : i32
    %c0_i32_1 = arith.constant 0 : i32
    return %c0_i32, %c0_i32_0 : i32, i32
  }
  func.func @transform_4(%arg0: i32) -> (i32, i32) {
    %c0_i32 = arith.constant 0 : i32
    %c0_i32_0 = arith.constant 0 : i32
    %c0_i32_1 = arith.constant 0 : i32
    return %c0_i32, %c0_i32_0 : i32, i32
  }
  func.func @transform_5(%arg0: i32) -> (i32, i32) {
    %c0_i32 = arith.constant 0 : i32
    %c0_i32_0 = arith.constant 0 : i32
    %c0_i32_1 = arith.constant 0 : i32
    return %c0_i32, %c0_i32_0 : i32, i32
  }
  func.func @transform_6(%arg0: i32) -> (i32, i32) {
    %c0_i32 = arith.constant 0 : i32
    %c0_i32_0 = arith.constant 0 : i32
    %c0_i32_1 = arith.constant 0 : i32
    return %c0_i32, %c0_i32_0 : i32, i32
  }
  func.func @transform_7(%arg0: i32) -> (i32, i32, i32) {
    %c0_i32 = arith.constant 0 : i32
    %c0_i32_0 = arith.constant 0 : i32
    %c0_i32_1 = arith.constant 0 : i32
    %c0_i32_2 = arith.constant 0 : i32
    return %c0_i32, %c0_i32_0, %c0_i32_1 : i32, i32, i32
  }
  func.func @transform_8(%arg0: i32) -> (i32, i32, i32) {
    %c0_i32 = arith.constant 0 : i32
    %c0_i32_0 = arith.constant 0 : i32
    %c0_i32_1 = arith.constant 0 : i32
    %c0_i32_2 = arith.constant 0 : i32
    return %c0_i32, %c0_i32_0, %c0_i32_1 : i32, i32, i32
  }
  func.func @transform_9(%arg0: i32) -> (i32, i32, i32) {
    %c0_i32 = arith.constant 0 : i32
    %c0_i32_0 = arith.constant 0 : i32
    %c0_i32_1 = arith.constant 0 : i32
    %c0_i32_2 = arith.constant 0 : i32
    return %c0_i32, %c0_i32_0, %c0_i32_1 : i32, i32, i32
  }
  func.func @transform_10(%arg0: i32) -> (i32, i32, i32) {
    %c0_i32 = arith.constant 0 : i32
    %c0_i32_0 = arith.constant 0 : i32
    %c0_i32_1 = arith.constant 0 : i32
    %c0_i32_2 = arith.constant 0 : i32
    return %c0_i32, %c0_i32_0, %c0_i32_1 : i32, i32, i32
  }
  func.func @transform_11(%arg0: i32) -> (i32, i32, i32) {
    %c0_i32 = arith.constant 0 : i32
    %c0_i32_0 = arith.constant 0 : i32
    %c0_i32_1 = arith.constant 0 : i32
    %c0_i32_2 = arith.constant 0 : i32
    return %c0_i32, %c0_i32_0, %c0_i32_1 : i32, i32, i32
  }
  func.func @transform_12(%arg0: i32) -> (i32, i32, i32) {
    %c0_i32 = arith.constant 0 : i32
    %c0_i32_0 = arith.constant 0 : i32
    %c0_i32_1 = arith.constant 0 : i32
    %c0_i32_2 = arith.constant 0 : i32
    return %c0_i32, %c0_i32_0, %c0_i32_1 : i32, i32, i32
  }
  func.func @transform_13(%arg0: i32) -> (i32, i32, i32) {
    %c0_i32 = arith.constant 0 : i32
    %c0_i32_0 = arith.constant 0 : i32
    %c0_i32_1 = arith.constant 0 : i32
    %c0_i32_2 = arith.constant 0 : i32
    return %c0_i32, %c0_i32_0, %c0_i32_1 : i32, i32, i32
  }
  func.func @transform_14(%arg0: i32) -> (i32, i32, i32) {
    %c0_i32 = arith.constant 0 : i32
    %c0_i32_0 = arith.constant 0 : i32
    %c0_i32_1 = arith.constant 0 : i32
    %c0_i32_2 = arith.constant 0 : i32
    return %c0_i32, %c0_i32_0, %c0_i32_1 : i32, i32, i32
  }
  func.func @transform_15(%arg0: i32) -> (i32, i32, i32) {
    %c0_i32 = arith.constant 0 : i32
    %c0_i32_0 = arith.constant 0 : i32
    %c0_i32_1 = arith.constant 0 : i32
    return %arg0, %c0_i32, %c0_i32_0 : i32, i32, i32
  }
}

</mosaic_0001>

<bundles_post_ra>
// kernel: _lambda_.1
= control target key start
LH: loop header
LB: loop body
LE: loop exit
PB: predicated region body
PF: predicated region fallthrough
CT: control target
= control target key end

     0   :  { %vm5129_vm0 = vcmask 31744   ;;  %v3673_v3 = vmov 16.0   ;;  %s3674_s29 = smov 12   ;;  %s3675_s30 = smov 4   ;;  %vm332_vm14 = vcmask 64512   ;;  %vm337_vm15 = vcmask 97280   ;;  %s5113_s0 = inlined_call_operand.vmem [shape: f32[2,16,4], index: 0, kind: input, shape index: {}]   ;;  %s5114_s1 = inlined_call_operand.vmem [shape: f32[2,16,4], index: 1, kind: input, shape index: {}]   ;;  %s5115_s5 = inlined_call_operand.vmem [shape: bf16[16,32], index: 5, kind: input, shape index: {}]   ;;  %s5116_s7 = inlined_call_operand.vmem [shape: bf16[2,32,128], index: 7, kind: input, shape index: {}]   ;;  %s5117_s8 = inlined_call_operand.vmem [shape: bf16[2,32,128], index: 8, kind: input, shape index: {}]   ;;  %s5118_s11 = inlined_call_operand.vmem [shape: f32[2,2,4], index: 11, kind: input, shape index: {}]   ;;  %s5119_s2 = inlined_call_operand.vmem [shape: f32[32,32], index: 2, kind: input, shape index: {}]   ;;  %s5120_s10 = inlined_call_operand.vmem [shape: f32[2,1,128], index: 10, kind: input, shape index: {}]   ;;  %s5121_s9 = inlined_call_operand.vmem [shape: f32[2,4,128], index: 9, kind: input, shape index: {}]   ;;  %s5122_s3 = inlined_call_operand.vmem [shape: f32[32,32], index: 3, kind: input, shape index: {}]   ;;  %s5123_s4 = inlined_call_operand.vmem [shape: f32[32,32], index: 4, kind: input, shape index: {}]   ;;  %s5124_s12 = inlined_call_operand.vmem [shape: f32[2,2,64], index: 12, kind: input, shape index: {}]   ;;  %s5125_s13 = inlined_call_operand.vmem [shape: bf16[2,64,32], index: 13, kind: input, shape index: {}]   ;;  %s5126_s14 = inlined_call_operand.vmem [shape: f32[2,2,32], index: 14, kind: input, shape index: {}]   ;;  %s5127_s6 = inlined_call_operand.vmem [shape: bf16[32,4], index: 6, kind: input, shape index: {}]   ;;  %s5128_s15 = inlined_call_operand.vmem [shape: f32[2,8,4], index: 15, kind: output, shape index: {}]  }
   0x1   :  { %v116_v0 = vld [vmem:[%s5113_s0] sm:$0xff]  ;;  %v117_v1 = vld [vmem:[%s5113_s0 + $0x8] sm:$0xff]  ;;  %v118_v2 = vld [vmem:[%s5113_s0 + $0x10] sm:$0xff]  ;;  %3463 = vrcp.f32 %v3673_v3  ;;  %s3676_s16 = smov 8   ;;  %s3679_s25 = smov 48  }
   0x2   :  { %v119_v4 = vld [vmem:[%s5113_s0 + $0x18] sm:$0xff]  ;;  %v121_v5 = vsel %vm5129_vm0, %v116_v0, 0.0  ;;  %v122_v6 = vsel %vm5129_vm0, %v117_v1, 0.0  ;;  %v130_v7 = vsel %vm5129_vm0, %v118_v2, 0.0  ;;  %v276_v52 = vld [vmem:[%s5114_s1] sm:$0xff]  ;;  %v277_v53 = vld [vmem:[%s5114_s1 + $0x8] sm:$0xff] }
   0x3   :  { %v123_v8 = vadd.f32 %v122_v6, %v121_v5  ;;  %v131_v9 = vsel %vm5129_vm0, %v119_v4, 0.0  ;;  %v3336_v55 = vpack.i.bf16 %v277_v53, %v276_v52  ;;  %s3682_s19 = smov 112   ;;  %s3686_s22 = smov 80  }
   0x4   :  { %v132_v10 = vadd.f32 %v131_v9, %v130_v7  ;;  %s3691_s27 = smov 16  }
   0x5   :  { %v124_v11 = vrot.slane %v123_v8, 4  ;;  %3337 = vrot.lane.b32.xlu1 %v3336_v55, %s3674_s29 }
   0x6   :  { %v133_v12 = vrot.slane %v132_v10, 4 }
   0x7   :  { %v3464_v13 = vpop.eup %3463  ;;  %v125_v14 = vadd.f32 %v124_v11, %v123_v8 }
   0x8   :  { %v134_v15 = vadd.f32 %v133_v12, %v132_v10  ;;  %v140_v16 = vmul.f32 16.0, %v3464_v13  ;;  %vm144_vm1 = vweird.f32 %v3464_v13 }
   0x9   :  { %v126_v17 = vrot.slane %v125_v14, 2 }
   0xa   :  { %v135_v18 = vrot.slane %v134_v15, 2  ;;  %v141_v19 = vsub.f32 1.0, %v140_v16 }
   0xb   :  { %v127_v20 = vadd.f32 %v126_v17, %v125_v14 }
   0xc   :  { %v136_v21 = vadd.f32 %v135_v18, %v134_v15  ;;  %v142_v22 = vmul.f32 %v3464_v13, %v141_v19 }
   0xd   :  { %v128_v23 = vrot.slane %v127_v20, 1 }
   0xe   :  { %v137_v24 = vrot.slane %v136_v21, 1  ;;  %v143_v25 = vadd.f32 %v3464_v13, %v142_v22 }
   0xf   :  { %v129_v26 = vadd.f32 %v128_v23, %v127_v20 }
  0x10   :  { %v138_v27 = vadd.f32 %v137_v24, %v136_v21  ;;  %v145_v28 = vsel %vm144_vm1, %v3464_v13, %v143_v25  ;;  %vm356_vm1 = vcmask 130048  }
  0x11   :  { %v3790_v29 = vmul.f32 %v145_v28, %v129_v26 }
  0x12   :  { %v3792_v30 = vmul.f32 %v145_v28, %v138_v27 }
  0x13   :  { %v3795_v31 = vsub.f32 %v116_v0, %v3790_v29  ;;  %v3798_v32 = vsub.f32 %v117_v1, %v3790_v29  ;;  %v63_v0 = vlaneseq }
  0x14   :  { %v3801_v33 = vsub.f32 %v118_v2, %v3792_v30  ;;  %v3804_v34 = vsub.f32 %v119_v4, %v3792_v30 }
  0x15   :  { %v152_v35 = vmul.f32 %v3795_v31, %v3795_v31  ;;  %v153_v36 = vmul.f32 %v3798_v32, %v3798_v32  ;;  %v3831_v2 = vshrl.u32 %v63_v0, 7 }
  0x16   :  { %v154_v37 = vmul.f32 %v3801_v33, %v3801_v33  ;;  %v155_v38 = vmul.f32 %v3804_v34, %v3804_v34 }
  0x17   :  { %v156_v39 = vsel %vm5129_vm0, %v152_v35, 0.0  ;;  %v157_v40 = vsel %vm5129_vm0, %v153_v36, 0.0  ;;  %v65_v7 = vadd.s32 8, %v3831_v2  ;;  %v67_v10 = vadd.s32 24, %v3831_v2 }
  0x18   :  { %v158_v41 = vadd.f32 %v157_v40, %v156_v39  ;;  %v165_v42 = vsel %vm5129_vm0, %v154_v37, 0.0  ;;  %v166_v43 = vsel %vm5129_vm0, %v155_v38, 0.0  ;;  %vm259_vm8 = vcmp.lt.s32.totalorder %v3831_v2, 7 }
  0x19   :  { %v167_v44 = vadd.f32 %v166_v43, %v165_v42  ;;  %v79_v15 = vand.u32 15, %v65_v7  ;;  %v93_v16 = vand.u32 15, %v67_v10  ;;  %vm238_vm11 = vcmp.lt.s32.totalorder %v3831_v2, 1 }
  0x1a   :  { %v159_v45 = vrot.slane %v158_v41, 4  ;;  %v66_v55 = vadd.s32 16, %v3831_v2 }
  0x1b   :  { %v168_v46 = vrot.slane %v167_v44, 4  ;;  %vm3850_vm9 = vcmp.eq.s32.totalorder %v79_v15, 15  ;;  %vm3854_vm10 = vcmp.eq.s32.totalorder %v93_v16, 15 }
  0x1c   :  { %v160_v47 = vadd.f32 %v159_v45, %v158_v41  ;;  %v278_v45 = vld [vmem:[%s5114_s1 + $0x10] sm:$0xff] }
  0x1d   :  { %v169_v48 = vadd.f32 %v168_v46, %v167_v44  ;;  %v279_v46 = vld [vmem:[%s5114_s1 + $0x18] sm:$0xff] }
  0x1e   :  { %v161_v49 = vrot.slane %v160_v47, 2 }
  0x1f   :  { %v170_v50 = vrot.slane %v169_v48, 2 }
  0x20   :  { %v162_v51 = vadd.f32 %v161_v49, %v160_v47  ;;  %v3351_v47 = vpack.i.bf16 %v279_v46, %v278_v45  ;;  %v347_v45 = vld [vmem:[%s5119_s2 + $0x8] sm:$0xff] }
  0x21   :  { %v171_v54 = vadd.f32 %v170_v50, %v169_v48  ;;  %v3881_v48 = vand.u32 15, %v3831_v2 }
  0x22   :  { %v163_v56 = vrot.slane %v162_v51, 1 }
  0x23   :  { %v172_v57 = vrot.slane %v171_v54, 1  ;;  %vm226_vm12 = vcmp.eq.s32.totalorder %v3881_v48, 0 }
  0x24   :  { %v164_v58 = vadd.f32 %v163_v56, %v162_v51  ;;  %v3892_v56 = vand.u32 15, %v66_v55 }
  0x25   :  { %v173_v59 = vadd.f32 %v172_v57, %v171_v54  ;;  %v3285_v54 = vld [vmem:[%s5115_s5] sm:$0xff] }
  0x26   :  { %v174_v60 = vmul.f32 %v164_v58, %v145_v28  ;;  %370 = vmatpush.bf16.msra.mxu0 %v3285_v54  ;;  %vm228_vm13 = vcmp.eq.s32.totalorder %v3892_v56, 0  ;;  %v349_v54 = vld [vmem:[%s5119_s2 + $0x18] sm:$0xff] }
  0x27   :  { %v175_v61 = vmul.f32 %v173_v59, %v145_v28 }
  0x28   :  { %v3825_v62 = vadd.f32 1e-05, %v174_v60 }
  0x29   :  { %v3827_v63 = vadd.f32 1e-05, %v175_v61 }
  0x2a   :  { %3465 = vrsqrt.f32 %v3825_v62  ;;  %vm208_vm2 = vweird.f32 %v3825_v62 }
  0x2b   :  { %3467 = vrsqrt.f32 %v3827_v63  ;;  %vm218_vm4 = vweird.f32 %v3827_v63 }
  0x30   :  { %v3466_v1 = vpop.eup %3465 }
  0x31   :  { %v3468_v3 = vpop.eup %3467  ;;  %v179_v4 = vmul.f32 %v3466_v1, %v3825_v62  ;;  %vm209_vm3 = vweird.f32 %v3466_v1 }
  0x32   :  { %v191_v5 = vmul.f32 %v3468_v3, %v3827_v63  ;;  %vm219_vm5 = vweird.f32 %v3468_v3  ;;  %vm210_vm6 = vmor %vm208_vm2, %vm209_vm3  ;;  %vm400_vm2 = vcmask 261120   ;;  %vm565_vm3 = vcmp.lt.s32.totalorder %v3831_v2, 2 }
  0x33   :  { %v180_v6 = vmul.f32 %v3466_v1, %v179_v4  ;;  %vm220_vm7 = vmor %vm218_vm4, %vm219_vm5  ;;  %vm599_vm4 = vcmp.lt.s32.totalorder %v3831_v2, 3  ;;  %vm526_vm5 = vcmp.ge.s32.totalorder %v3892_v56, 1 }
  0x34   :  { %v192_v8 = vmul.f32 %v3468_v3, %v191_v5 }
  0x35   :  { %v181_v9 = vmul.f32 0.5, %v180_v6 }
  0x36   :  { %v193_v11 = vmul.f32 0.5, %v192_v8 }
  0x37   :  { %v182_v12 = vsub.f32 1.5, %v181_v9 }
  0x38   :  { %v194_v13 = vsub.f32 1.5, %v193_v11 }
  0x39   :  { %v3839_v14 = vmul.f32 %v3466_v1, %v182_v12 }
  0x3a   :  { %v3841_v17 = vmul.f32 %v3468_v3, %v194_v13 }
  0x3b   :  { %v211_v18 = vsel %vm210_vm6, %v3466_v1, %v3839_v14  ;;  %vm559_vm6 = vcmp.ge.s32.totalorder %v3892_v56, 2 }
  0x3c   :  { %v222_v19 = vmul.f32 %v211_v18, %v3795_v31  ;;  %v223_v20 = vmul.f32 %v211_v18, %v3798_v32  ;;  %v221_v21 = vsel %vm220_vm7, %v3468_v3, %v3841_v17  ;;  %vm593_vm7 = vcmp.ge.s32.totalorder %v3892_v56, 3 }
  0x3d   :  { %v224_v22 = vmul.f32 %v221_v21, %v3801_v33  ;;  %v225_v23 = vmul.f32 %v221_v21, %v3804_v34 }
  0x3e   :  { %v235_v26 = vrot.slane %v223_v20, 7  ;;  %v3326_v27 = vpack.i.bf16 %v223_v20, %v222_v19  ;;  %v255_v28 = vrot.slane %v222_v19, 1  ;;  %v256_v31 = vrot.slane %v223_v20, 1 }
  0x3f   :  { %v257_v32 = vrot.slane %v224_v22, 1  ;;  %v258_v35 = vrot.slane %v225_v23, 1  ;;  %v3341_v36 = vpack.i.bf16 %v225_v23, %v224_v22  ;;  %v236_v33 = vrot.slane %v224_v22, 7 }
  0x40   :  { %3327 = vrot.lane.b32.xlu0 %v3326_v27, %s3675_s30  ;;  %v262_v37 = vsel %vm259_vm8, %v255_v28, %v256_v31  ;;  %v234_v49 = vrot.slane %v222_v19, 7  ;;  %v237_v50 = vrot.slane %v225_v23, 7 }
  0x41   :  { %v261_v34 = vsel %vm259_vm8, %v256_v31, %v257_v32  ;;  %v263_v38 = vsel %vm259_vm8, %v258_v35, %v255_v28  ;;  %3342 = vrot.lane.b32.xlu1 %v3341_v36, %s3675_s30  ;;  %v260_v39 = vsel %vm259_vm8, %v257_v32, %v258_v35  ;;  %v240_v42 = vsel %vm238_vm11, %v235_v26, %v236_v33  ;;  %v3287_v36 = vld [vmem:[%s5116_s7 + $0x8] sm:$0xff]  ;;  %s3677_s30 = smov 64  }
  0x42   :  { %v273_v40 = vsel %vm3850_vm9, %v263_v38, %v261_v34  ;;  %v275_v41 = vsel %vm3854_vm10, %v261_v34, %v263_v38  ;;  %v241_v51 = vsel %vm238_vm11, %v234_v49, %v235_v26  ;;  %v242_v52 = vsel %vm238_vm11, %v237_v50, %v234_v49  ;;  %413 = vmatpush.bf16.msra.mxu1 %v3287_v36  ;;  %v3286_v34 = vld [vmem:[%s5116_s7] sm:$0xff] }
  0x43   :  { %v3346_v43 = vpack.i.bf16 %v275_v41, %v260_v39  ;;  %v3331_v44 = vpack.i.bf16 %v273_v40, %v262_v37  ;;  %v251_v53 = vsel %vm226_vm12, %v240_v42, %v242_v52  ;;  %v239_v57 = vsel %vm238_vm11, %v236_v33, %v237_v50  ;;  %v3289_v33 = vld [vmem:[%s5117_s8 + $0x8] sm:$0xff]  ;;  %v3288_v37 = vld [vmem:[%s5117_s8] sm:$0xff] }
  0x44   :  { %v253_v58 = vsel %vm228_vm13, %v242_v52, %v240_v42  ;;  %448 = vmatpush.bf16.msra.mxu2 %v3289_v33  ;;  %v461_v38 = vld [vmem:[%s5118_s11] sm:$0x3]  ;;  %vm5132_vm8 = vcmp.ge.s32.totalorder %v3881_v48, 1  ;;  %vm5131_vm9 = vcmp.ge.s32.totalorder %v3881_v48, 2  ;;  %vm5130_vm10 = vcmp.ge.s32.totalorder %v3881_v48, 3 }
  0x45   :  { %3347 = vrot.lane.b32.xlu2 %v3346_v43, %s3676_s16  ;;  %v462_v39 = vperm.slane %v461_v38, 0  ;;  %v507_v40 = vmul.f32 1.442695, %v461_v38 }
  0x46   :  { %414 = vmatpush.bf16.msra.mxu1 %v3286_v34 }
  0x47   :  { %3469 = vpow2.f32 %v507_v40 }
  0x48   :  { %3332 = vrot.lane.b32.xlu0 %v3331_v44, %s3676_s16  ;;  %449 = vmatpush.bf16.msra.mxu2 %v3288_v37  ;;  %v346_v44 = vld [vmem:[%s5119_s2] sm:$0xff] }
  0x4d   :  { %3352 = vrot.lane.b32.xlu2 %v3351_v47, %s3674_s29  ;;  %v3470_v42 = vpop.eup %3469 }
  0x4e   :  { %v509_v43 = vsub.f32 0.0, %v3470_v42 }
  0x50   :  { %464 = vrot.lane.b32.xlu0 %v462_v39, %s3677_s30  ;;  %v705_v46 = vperm.slane %v509_v43, 1 }
  0x52   :  { %707 = vrot.lane.b32.xlu1 %v705_v46, %s3677_s30 }
  0x77   :  { %v3338_v60 = vpop.permute.xlu1 %3337 }
  0x78   :  { %v3340_v20 = vunpack.i.h.bf16 %v3338_v60  ;;  %v3339_v21 = vunpack.i.l.bf16 %v3338_v60 }
  0x9f   :  { %v3348_v59 = vpop.permute.xlu2 %3347 }
  0xa0   :  { %v3350_v1 = vunpack.i.h.bf16 %v3348_v59  ;;  %v3349_v3 = vunpack.i.l.bf16 %v3348_v59 }
  0xa7   :  { %v3353_v61 = vpop.permute.xlu2 %3352 }
  0xa8   :  { %v3355_v7 = vunpack.i.h.bf16 %v3353_v61  ;;  %v3354_v8 = vunpack.i.l.bf16 %v3353_v61 }
  0xb2   :  { %v3328_v0 = vpop.permute.xlu0 %3327 }
  0xb3   :  { %v3343_v4 = vpop.permute.xlu1 %3342  ;;  %v3330_v13 = vunpack.i.h.bf16 %v3328_v0  ;;  %v3329_v15 = vunpack.i.l.bf16 %v3328_v0 }
  0xb4   :  { %v3345_v5 = vunpack.i.h.bf16 %v3343_v4  ;;  %v3344_v6 = vunpack.i.l.bf16 %v3343_v4  ;;  %v510_v4 = vld [vmem:[%s5121_s9] sm:$0xf] }
  0xb5   :  { %v328_v25 = vsel %vm5129_vm0, %v251_v53, %v3329_v15  ;;  %v329_v26 = vsel %vm5129_vm0, %v241_v51, %v3330_v13  ;;  %v348_v53 = vld [vmem:[%s5119_s2 + $0x10] sm:$0xff]  ;;  %s3685_s2 = smov 96  }
  0xb6   :  { %v330_v9 = vsel %vm5129_vm0, %v253_v58, %v3344_v6  ;;  %v331_v10 = vsel %vm5129_vm0, %v239_v57, %v3345_v5  ;;  %v3969_v6 = vperm.slane %v510_v4, 3 }
  0xb7   :  { %v335_v11 = vsel %vm332_vm14, %v330_v9, %v3349_v3  ;;  %v336_v12 = vsel %vm332_vm14, %v331_v10, %v3350_v1  ;;  %v3972_v10 = vperm.slane %v510_v4, 2 }
  0xb8   :  { %v340_v16 = vsel %vm337_vm15, %v335_v11, %v3354_v8  ;;  %v341_v18 = vsel %vm337_vm15, %v336_v12, %v3355_v7  ;;  %v3978_v11 = vld [vmem:[%s5120_s10] ss:$0 sm:$0xff] }
  0xb9   :  { %v343_v19 = vpack.c.bf16 %v341_v18, %v340_v16 }
  0xba   :  { %v3333_v22 = vpop.permute.xlu0 %3332 }
  0xbb   :  { %v3335_v23 = vunpack.i.h.bf16 %v3333_v22  ;;  %v3334_v24 = vunpack.i.l.bf16 %v3333_v22 }
  0xbd   :  { %v333_v27 = vsel %vm332_vm14, %v328_v25, %v3334_v24  ;;  %v334_v28 = vsel %vm332_vm14, %v329_v26, %v3335_v23 }
  0xbe   :  { %v338_v31 = vsel %vm337_vm15, %v333_v27, %v3339_v21  ;;  %v339_v32 = vsel %vm337_vm15, %v334_v28, %v3340_v20  ;;  %v3998_v27 = vperm.slane %v510_v4, 0 }
  0xbf   :  { %v342_v35 = vpack.c.bf16 %v339_v32, %v338_v31 }
  0xc1   :  { %3102 = vmatmul.msk.bf16.vlgmr.msra.gmra.mxu0 %vm356_vm1, %v342_v35 }
  0xc2   :  { %v465_v0 = vpop.permute.xlu0 %464 }
  0xd1   :  { %3103 = vmatmul.msk.bf16.gmra.mxu0 %vm356_vm1, %v343_v19  ;;  %v3982_v19 = vperm.slane %v510_v4, 1 }
 0x13e   :  { %v372_v41 = vpop.f32.mrf.mxu0 }
 0x13f   :  { %v3934_v49 = vadd.f32 %v372_v41, %v346_v44 }
 0x146   :  { %v374_v47 = vpop.f32.mrf.mxu0 }
 0x147   :  { %v3936_v50 = vadd.f32 %v374_v47, %v347_v45 }
 0x149   :  { %v382_v51 = vpack.c.bf16 %v3936_v50, %v3934_v49 }
 0x14b   :  { %3112 = vmatmul.msk.bf16.vlgmr.msra.gmra.mxu1 %vm400_vm2, %v382_v51  ;;  %3122 = vmatmul.msk.bf16.vlgmr.msra.gmra.mxu2 %vm400_vm2, %v382_v51 }
 0x14e   :  { %v377_v52 = vpop.f32.mrf.mxu0 }
 0x14f   :  { %v3948_v57 = vadd.f32 %v377_v52, %v348_v53 }
 0x156   :  { %v379_v55 = vpop.f32.mrf.mxu0 }
 0x157   :  { %v3950_v58 = vadd.f32 %v379_v55, %v349_v54 }
 0x159   :  { %v383_v59 = vpack.c.bf16 %v3950_v58, %v3948_v57 }
 0x15b   :  { %3113 = vmatmul.msk.bf16.gmra.mxu1 %vm400_vm2, %v383_v59  ;;  %3123 = vmatmul.msk.bf16.gmra.mxu2 %vm400_vm2, %v383_v59 }
 0x1c8   :  { %v3956_v60 = vpop.f32.mrf.mxu1 }
 0x1c9   :  { %v4008_v32 = vadd.f32 %v465_v0, %v3956_v60 }
 0x1cb   :  { %v475_v44 = vand.u32 2147483647, %v4008_v32 }
 0x1cd   :  { %v479_v59 = vsub.f32 0.0, %v475_v44 }
 0x1ce   :  { %v3958_v61 = vpop.f32.mrf.mxu2 }
 0x1cf   :  { %v528_v8 = vrot.slane %v3958_v61, 7  ;;  %v561_v18 = vrot.slane %v3958_v61, 6  ;;  %v595_v24 = vrot.slane %v3958_v61, 5 }
 0x1d0   :  { %v3960_v1 = vpop.f32.mrf.mxu1 }
 0x1d1   :  { %v3963_v3 = vadd.f32 %v465_v0, %v3960_v1 }
 0x1d3   :  { %v476_v5 = vand.u32 2147483647, %v3963_v3 }
 0x1d5   :  { %v480_v7 = vsub.f32 0.0, %v476_v5 }
 0x1d6   :  { %v453_v9 = vpop.f32.mrf.mxu2 }
 0x1d7   :  { %v485_v12 = vmul.f32 1.442695, %v480_v7  ;;  %v514_v13 = vmul.f32 %v3969_v6, %v453_v9  ;;  %v529_v15 = vrot.slane %v453_v9, 7  ;;  %v562_v16 = vrot.slane %v453_v9, 6 }
 0x1d8   :  { %v596_v20 = vrot.slane %v453_v9, 5  ;;  %v3984_v21 = vpop.f32.mrf.mxu1 }
 0x1d9   :  { %3471 = vpow2.f32 %v485_v12  ;;  %v521_v22 = vadd.f32 %v3978_v11, %v514_v13  ;;  %v534_v23 = vsel %vm238_vm11, %v528_v8, %v529_v15  ;;  %v568_v26 = vsel %vm565_vm3, %v561_v18, %v562_v16 }
 0x1da   :  { %v550_v25 = vmul.f32 %v3972_v10, %v534_v23  ;;  %v4001_v28 = vadd.f32 %v465_v0, %v3984_v21  ;;  %v602_v31 = vsel %vm599_vm4, %v595_v24, %v596_v20  ;;  %v584_v36 = vmul.f32 %v3982_v19, %v568_v26 }
 0x1db   :  { %v618_v39 = vmul.f32 %v3998_v27, %v602_v31 }
 0x1dc   :  { %v554_v35 = vadd.f32 %v550_v25, %v521_v22  ;;  %v477_v33 = vand.u32 2147483647, %v4001_v28  ;;  %v483_v25 = vmul.f32 1.442695, %v479_v59 }
 0x1de   :  { %v4012_v34 = vpop.f32.mrf.mxu2  ;;  %v588_v38 = vadd.f32 %v584_v36, %v554_v35  ;;  %v481_v42 = vsub.f32 0.0, %v477_v33 }
 0x1df   :  { %v3472_v37 = vpop.eup %3471  ;;  %v530_v40 = vrot.slane %v4012_v34, 7  ;;  %v563_v43 = vrot.slane %v4012_v34, 6  ;;  %v515_v46 = vmul.f32 %v3969_v6, %v4012_v34  ;;  %v597_v9 = vrot.slane %v4012_v34, 5 }
 0x1e0   :  { %v492_v41 = vadd.f32 1.0, %v3472_v37  ;;  %v4018_v45 = vadd.f32 %v618_v39, %v588_v38  ;;  %v487_v47 = vmul.f32 1.442695, %v481_v42  ;;  %v4030_v53 = vpop.f32.mrf.mxu1 }
 0x1e1   :  { %v533_v51 = vsel %vm238_vm11, %v529_v15, %v530_v40  ;;  %v567_v52 = vsel %vm565_vm3, %v562_v16, %v563_v43  ;;  %v522_v4 = vadd.f32 %v3978_v11, %v515_v46  ;;  %v4041_v12 = vadd.f32 %v465_v0, %v4030_v53 }
 0x1e2   :  { %3473 = vlog2.f32 %v492_v41  ;;  %v3125_v54 = vmul.f32 -1.442695, %v4018_v45  ;;  %v546_v55 = vsel %vm526_vm5, %v533_v51, 0.0  ;;  %v580_v7 = vsel %vm559_vm6, %v567_v52, 0.0 }
 0x1e3   :  { %3475 = vpow2.f32 %v487_v47  ;;  %v551_v5 = vmul.f32 %v3972_v10, %v546_v55  ;;  %v585_v15 = vmul.f32 %v3982_v19, %v580_v7  ;;  %v601_v16 = vsel %vm599_vm4, %v596_v20, %v597_v9  ;;  %v4067_v55 = vpop.permute.xlu1 %707 }
 0x1e4   :  { %3477 = vpow2.f32 %v3125_v54  ;;  %v478_v22 = vand.u32 2147483647, %v4041_v12  ;;  %v614_v0 = vsel %vm593_vm7, %v601_v16, 0.0  ;;  %v472_v20 = vmax.f32 %v3963_v3, 0.0 }
 0x1e5   :  { %v555_v13 = vadd.f32 %v551_v5, %v522_v4  ;;  %v619_v36 = vmul.f32 %v3998_v27, %v614_v0  ;;  %3479 = vpow2.f32 %v483_v25  ;;  %v513_v7 = vmul.f32 %v3969_v6, %v3958_v61 }
 0x1e6   :  { %v458_v33 = vpop.f32.mrf.mxu2  ;;  %v482_v38 = vsub.f32 0.0, %v478_v22  ;;  %v474_v61 = vmax.f32 %v4041_v12, 0.0 }
 0x1e7   :  { %v589_v31 = vadd.f32 %v585_v15, %v555_v13  ;;  %v531_v44 = vrot.slane %v458_v33, 7  ;;  %v516_v3 = vmul.f32 %v3969_v6, %v458_v33  ;;  %v564_v4 = vrot.slane %v458_v33, 6 }
 0x1e8   :  { %v3474_v23 = vpop.eup %3473  ;;  %v489_v42 = vmul.f32 1.442695, %v482_v38  ;;  %v520_v0 = vadd.f32 %v3978_v11, %v513_v7 }
 0x1e9   :  { %v3476_v26 = vpop.eup %3475  ;;  %v498_v37 = vmul.f32 0.6931472, %v3474_v23  ;;  %v4053_v39 = vadd.f32 %v619_v36, %v589_v31  ;;  %v535_v52 = vsel %vm238_vm11, %v531_v44, %v528_v8  ;;  %v532_v59 = vsel %vm238_vm11, %v530_v40, %v531_v44 }
 0x1ea   :  { %v493_v35 = vadd.f32 1.0, %v3476_v26  ;;  %v3478_v41 = vpop.eup %3477  ;;  %v544_v13 = vsel %vm5132_vm8, %v535_v52, 0.0  ;;  %v523_v22 = vadd.f32 %v3978_v11, %v516_v3  ;;  %v552_v23 = vmul.f32 %v3972_v10, %v532_v59 }
 0x1eb   :  { %v4056_v46 = vadd.f32 %v498_v37, %v472_v20  ;;  %v3126_v47 = vmul.f32 -1.442695, %v4053_v39  ;;  %v4059_v51 = vadd.f32 1.0, %v3478_v41  ;;  %v3480_v54 = vpop.eup %3479  ;;  %v549_v25 = vmul.f32 %v3972_v10, %v544_v13 }
 0x1ec   :  { %3481 = vlog2.f32 %v493_v35  ;;  %v491_v16 = vadd.f32 1.0, %v3480_v54  ;;  %v569_v26 = vsel %vm565_vm3, %v564_v4, %v561_v18  ;;  %v598_v35 = vrot.slane %v458_v33, 5 }
 0x1ed   :  { %3483 = vpow2.f32 %v489_v42  ;;  %v711_v8 = vmul.f32 %v4067_v55, %v4056_v46  ;;  %v473_v36 = vmax.f32 %v4001_v28, 0.0  ;;  %v566_v38 = vsel %vm565_vm3, %v563_v43, %v564_v4 }
 0x1ee   :  { %3485 = vpow2.f32 %v3126_v47  ;;  %v556_v10 = vadd.f32 %v552_v23, %v523_v22  ;;  %v578_v41 = vsel %vm5131_vm9, %v569_v26, 0.0  ;;  %v553_v11 = vadd.f32 %v549_v25, %v520_v0 }
 0x1ef   :  { %3487 = vrcp.f32 %v4059_v51  ;;  %720 = vrot.lane.b32.xlu1 %v711_v8, %s3677_s30  ;;  %v586_v28 = vmul.f32 %v3982_v19, %v566_v38  ;;  %v600_v43 = vsel %vm599_vm4, %v597_v9, %v598_v35  ;;  %v583_v33 = vmul.f32 %v3982_v19, %v578_v41 }
 0x1f0   :  { %v603_v42 = vsel %vm599_vm4, %v598_v35, %v595_v24  ;;  %v620_v34 = vmul.f32 %v3998_v27, %v600_v43  ;;  %v667_v41 = vand.u32 2147483648, %v4059_v51 }
 0x1f1   :  { %v590_v47 = vadd.f32 %v586_v28, %v556_v10  ;;  %v587_v3 = vadd.f32 %v583_v33, %v553_v11  ;;  %v612_v54 = vsel %vm5130_vm10, %v603_v42, 0.0  ;;  %vm661_vm10 = vweird.f32 %v4059_v51 }
 0x1f2   :  { %v3482_v5 = vpop.eup %3481  ;;  %v617_v24 = vmul.f32 %v3998_v27, %v612_v54  ;;  %v665_v28 = vand.u32 2147483647, %v4059_v51  ;;  %v3678_v42 = vmov 65  }
 0x1f3   :  { %v3484_v15 = vpop.eup %3483  ;;  %v500_v40 = vmul.f32 0.6931472, %v3482_v5  ;;  %v4119_v5 = vadd.f32 %v620_v34, %v590_v47  ;;  %3356 = vset.pattern.permute.xlu1 %v3678_v42  ;;  %3357 = vset.pattern.permute.xlu2 %v3678_v42 }
 0x1f4   :  { %v494_v6 = vadd.f32 1.0, %v3484_v15  ;;  %v3486_v31 = vpop.eup %3485  ;;  %v4124_v15 = vadd.f32 %v617_v24, %v587_v3 }
 0x1f5   :  { %v639_v37 = vadd.f32 1.0, %v3486_v31  ;;  %v4095_v20 = vpop.eup %3487  ;;  %v4097_v18 = vadd.f32 %v500_v40, %v473_v36  ;;  %v471_v40 = vmax.f32 %v4008_v32, 0.0 }
 0x1f6   :  { %3489 = vlog2.f32 %v494_v6  ;;  %v657_v44 = vmul.f32 %v4095_v20, %v4059_v51  ;;  %v3124_v6 = vmul.f32 -1.442695, %v4124_v15  ;;  %vm662_vm15 = vweird.f32 %v4095_v20 }
 0x1f7   :  { %3491 = vlog2.f32 %v491_v16  ;;  %v712_v9 = vmul.f32 %v4067_v55, %v4097_v18  ;;  %v3127_v16 = vmul.f32 -1.442695, %v4119_v5  ;;  %v682_v27 = vand.u32 2147483648, %v639_v37 }
 0x1f8   :  { %3493 = vrcp.f32 %v639_v37  ;;  %v658_v7 = vsub.f32 1.0, %v657_v44  ;;  %v680_v31 = vand.u32 2147483647, %v639_v37  ;;  %vm676_vm13 = vweird.f32 %v639_v37 }
 0x1f9   :  { %722 = vrot.lane.b32.xlu0 %v712_v9, %s3677_s30  ;;  %3495 = vpow2.f32 %v3127_v16  ;;  %v683_v36 = vor.u32 1.1754944e-38, %v682_v27 }
 0x1fa   :  { %v659_v25 = vmul.f32 %v4095_v20, %v658_v7  ;;  %3497 = vpow2.f32 %v3124_v6  ;;  %vm681_vm0 = vcmp.eq.f32.partialorder %v680_v31, 8.507059e+37 }
 0x1fc   :  { %v3490_v52 = vpop.eup %3489  ;;  %v660_v32 = vadd.f32 %v4095_v20, %v659_v25 }
 0x1fd   :  { %v3492_v19 = vpop.eup %3491  ;;  %v502_v59 = vmul.f32 0.6931472, %v3490_v52 }
 0x1fe   :  { %v3494_v4 = vpop.eup %3493  ;;  %v496_v22 = vmul.f32 0.6931472, %v3492_v19 }
 0x1ff   :  { %v672_v13 = vmul.f32 %v3494_v4, %v639_v37  ;;  %v4122_v8 = vadd.f32 %v502_v59, %v474_v61  ;;  %vm677_vm12 = vweird.f32 %v3494_v4  ;;  %v3496_v10 = vpop.eup %3495 }
 0x200   :  { %v4133_v0 = vadd.f32 %v496_v22, %v471_v40  ;;  %vm678_vm14 = vmor %vm676_vm13, %vm677_vm12  ;;  %v640_v37 = vadd.f32 1.0, %v3496_v10  ;;  %v3498_v44 = vpop.eup %3497 }
 0x201   :  { %v673_v23 = vsub.f32 1.0, %v672_v13  ;;  %v713_v12 = vmul.f32 %v4067_v55, %v4122_v8  ;;  %vm663_vm12 = vmor %vm661_vm10, %vm662_vm15  ;;  %v637_v52 = vadd.f32 1.0, %v3498_v44  ;;  %v4214_v44 = vld [vmem:[%s5122_s3 + $0x18] sm:$0xff] }
 0x202   :  { %v710_v33 = vmul.f32 %v4067_v55, %v4133_v0  ;;  %v664_v47 = vsel %vm663_vm12, %v4095_v20, %v660_v32  ;;  %3499 = vrcp.f32 %v640_v37  ;;  %v697_v19 = vand.u32 2147483648, %v640_v37 }
 0x203   :  { %v674_v26 = vmul.f32 %v3494_v4, %v673_v23  ;;  %724 = vrot.lane.b32.xlu2 %v713_v12, %s3677_s30  ;;  %3501 = vrcp.f32 %v637_v52  ;;  %v652_v24 = vand.u32 2147483648, %v637_v52  ;;  %vm691_vm13 = vweird.f32 %v640_v37 }
 0x204   :  { %v650_v13 = vand.u32 2147483647, %v637_v52  ;;  %vm646_vm12 = vweird.f32 %v637_v52 }
 0x205   :  { %v675_v35 = vadd.f32 %v3494_v4, %v674_v26  ;;  %v653_v12 = vor.u32 1.1754944e-38, %v652_v24  ;;  %v4236_v24 = vld [vmem:[%s5123_s4 + $0x10] sm:$0xff] }
 0x206   :  { %vm651_vm8 = vcmp.eq.f32.partialorder %v650_v13, 8.507059e+37  ;;  %v3684_v13 = vmov 3  }
 0x207   :  { %v679_v38 = vsel %vm678_vm14, %v3494_v4, %v675_v35  ;;  %v695_v4 = vand.u32 2147483647, %v640_v37 }
 0x208   :  { %v684_v11 = vsel %vm681_vm0, %v683_v36, %v679_v38  ;;  %vm666_vm0 = vcmp.eq.f32.partialorder %v665_v28, 8.507059e+37  ;;  %v3500_v55 = vpop.eup %3499  ;;  %v4193_v38 = vld [vmem:[%s5122_s3] sm:$0xff]  ;;  %v4207_v28 = vld [vmem:[%s5122_s3 + $0x10] sm:$0xff] }
 0x209   :  { %v4141_v43 = vmul.f32 %v684_v11, %v4053_v39  ;;  %v668_v39 = vor.u32 1.1754944e-38, %v667_v41  ;;  %v687_v54 = vmul.f32 %v3500_v55, %v640_v37  ;;  %v3502_v34 = vpop.eup %3501  ;;  %vm692_vm10 = vweird.f32 %v3500_v55  ;;  %v4200_v41 = vld [vmem:[%s5122_s3 + $0x8] sm:$0xff] }
 0x20a   :  { %v642_v20 = vmul.f32 %v3502_v34, %v637_v52  ;;  %vm647_vm14 = vweird.f32 %v3502_v34  ;;  %vm693_vm15 = vmor %vm691_vm13, %vm692_vm10  ;;  %vm5134_vm10 = vcmp.gt.f32.partialorder %v4207_v28, 0.5  ;;  %vm5133_vm13 = vcmp.gt.f32.partialorder %v4214_v44, 0.5 }
 0x20b   :  { %718 = vrot.lane.b32.xlu2 %v710_v33, %s3677_s30  ;;  %842 = vrot.lane.b32.xlu1 %v4141_v43, %s3677_s30  ;;  %v669_v51 = vsel %vm666_vm0, %v668_v39, %v664_v47  ;;  %v688_v9 = vsub.f32 1.0, %v687_v54  ;;  %vm696_vm0 = vcmp.eq.f32.partialorder %v695_v4, 8.507059e+37  ;;  %vm648_vm9 = vmor %vm646_vm12, %vm647_vm14  ;;  %v4231_v4 = vld [vmem:[%s5123_s4 + $0x18] sm:$0xff] }
 0x20c   :  { %v4154_v3 = vmul.f32 %v669_v51, %v4018_v45  ;;  %v643_v61 = vsub.f32 1.0, %v642_v20  ;;  %v698_v45 = vor.u32 1.1754944e-38, %v697_v19  ;;  %818 = vmatpush.msrb.mxu0 %v4231_v4 }
 0x20d   :  { %v689_v59 = vmul.f32 %v3500_v55, %v688_v9 }
 0x20e   :  { %v644_v7 = vmul.f32 %v3502_v34, %v643_v61  ;;  %819 = vmatpush.msrb.mxu0 %v4236_v24 }
 0x20f   :  { %v690_v16 = vadd.f32 %v3500_v55, %v689_v59 }
 0x210   :  { %v645_v22 = vadd.f32 %v3502_v34, %v644_v7  ;;  %v3683_v7 = vmov 1  }
 0x211   :  { %v694_v23 = vsel %vm693_vm15, %v3500_v55, %v690_v16 }
 0x212   :  { %v699_v40 = vsel %vm696_vm0, %v698_v45, %v694_v23  ;;  %v649_v27 = vsel %vm648_vm9, %v3502_v34, %v645_v22  ;;  %vm5135_vm9 = vcmp.gt.f32.partialorder %v4200_v41, 0.5 }
 0x213   :  { %840 = vrot.lane.b32.xlu2 %v4154_v3, %s3677_s30  ;;  %v4161_v6 = vmul.f32 %v699_v40, %v4119_v5  ;;  %v654_v25 = vsel %vm651_vm8, %v653_v12, %v649_v27  ;;  %v3680_v5 = vmov 67   ;;  %vm5136_vm8 = vcmp.gt.f32.partialorder %v4193_v38, 0.5 }
 0x214   :  { %v4164_v26 = vmul.f32 %v654_v25, %v4124_v15  ;;  %v3681_v15 = vmov 66  }
 0x215   :  { %844 = vrot.lane.b32.xlu0 %v4161_v6, %s3677_s30 }
 0x216   :  { %830 = vrot.lane.b32.xlu1 %v4164_v26, %s3679_s25 }
 0x21b   :  { %832 = vrot.lane.b32.xlu2 %v4154_v3, %s3679_s25 }
 0x21d   :  { %838 = vrot.lane.b32.xlu0 %v4164_v26, %s3677_s30 }
 0x21e   :  { %834 = vrot.lane.b32.xlu1 %v4141_v43, %s3679_s25 }
 0x223   :  { %836 = vrot.lane.b32.xlu2 %v4161_v6, %s3679_s25 }
 0x226   :  { %1048 = vperm.xlu1 %3356, %v4122_v8  }
 0x22b   :  { %1044 = vperm.xlu2 %3357, %v4097_v18  }
 0x22e   :  { %1040 = vperm.xlu1 %3356, %v4056_v46  }
 0x233   :  { %1036 = vperm.xlu2 %3357, %v4133_v0  }
 0x236   :  { %3358 = vset.pattern.permute.xlu1 %v3681_v15 }
 0x237   :  { %1162 = vperm.xlu1 %3358, %v4122_v8  }
 0x23b   :  { %3359 = vset.pattern.permute.xlu2 %v3680_v5 }
 0x23c   :  { %1276 = vperm.xlu2 %3359, %v4122_v8  }
 0x23f   :  { %1158 = vperm.xlu1 %3358, %v4097_v18  }
 0x244   :  { %1272 = vperm.xlu2 %3359, %v4097_v18  }
 0x247   :  { %1154 = vperm.xlu1 %3358, %v4056_v46  }
 0x24c   :  { %1268 = vperm.xlu2 %3359, %v4056_v46  }
 0x24f   :  { %1150 = vperm.xlu1 %3358, %v4133_v0  }
 0x254   :  { %1264 = vperm.xlu2 %3359, %v4133_v0  }
 0x257   :  { %3365 = vset.pattern.permute.xlu1 %v3683_v7 }
 0x25c   :  { %3392 = vset.pattern.permute.xlu2 %v3684_v13 }
 0x25d   :  { %v725_v31 = vpop.permute.xlu2 %724 }
 0x25e   :  { %754 = vmatpush.msra.mxu3 %v725_v31 }
 0x261   :  { %v721_v36 = vpop.permute.xlu1 %720 }
 0x265   :  { %v719_v35 = vpop.permute.xlu2 %718 }
 0x266   :  { %771 = vxpose.xlu0.b32.start [1/4] (short) (narrow) %v719_v35, 8 }
 0x26b   :  { %v723_v32 = vpop.permute.xlu0 %722 }
 0x26c   :  { %755 = vmatpush.msra.mxu3 %v723_v32 }
 0x26d   :  { %v841_v10 = vpop.permute.xlu2 %840 }
 0x26e   :  { %772 = vxpose.xlu0.b32.cont [2/4] (short) (narrow) %v721_v36, 8  ;;  %756 = vmatpush.msra.mxu3 %v721_v36 }
 0x270   :  { %757 = vmatpush.msra.mxu3 %v719_v35 }
 0x271   :  { %3128 = vmatmul.msk.f32.vlgmr.msra.gmra.mxu3 %vm400_vm2, %v4193_v38 }
 0x275   :  { %v833_v11 = vpop.permute.xlu2 %832 }
 0x276   :  { %773 = vxpose.xlu0.b32.cont [3/4] (short) (narrow) %v723_v32, 8 }
 0x279   :  { %3129 = vmatmul.msk.f32.gmra.mxu3 %vm400_vm2, %v4200_v41 }
 0x27d   :  { %v843_v37 = vpop.permute.xlu1 %842  ;;  %v837_v33 = vpop.permute.xlu2 %836 }
 0x27e   :  { %774 = vxpose.xlu0.b32.end [4/4] (short) (narrow) %v725_v31, 8 }
 0x281   :  { %3130 = vmatmul.msk.f32.gmra.mxu3 %vm400_vm2, %v4207_v28 }
 0x285   :  { %v1045_v39 = vpop.permute.xlu2 %1044 }
 0x286   :  { %v1053_v20 = vmul.f32 %v1045_v39, %v4141_v43 }
 0x287   :  { %v845_v47 = vpop.permute.xlu0 %844 }
 0x288   :  { %3133 = vmatpush.xpose.msk.msrb.mxu1 %vm356_vm1, %v845_v47  ;;  %v831_v52 = vpop.permute.xlu1 %830  ;;  %v3687_v47 = vmov 2  }
 0x289   :  { %3131 = vmatmul.msk.f32.gmra.mxu3 %vm400_vm2, %v4214_v44 }
 0x28c   :  { %3134 = vmatpush.xpose.msk.msrb.mxu1 %vm356_vm1, %v843_v37  ;;  %v4255_v37 = vld [vmem:[%s5123_s4 + $0x8] sm:$0xff] }
 0x28d   :  { %v1037_v54 = vpop.permute.xlu2 %1036  ;;  %820 = vmatpush.msrb.mxu0 %v4255_v37 }
 0x28f   :  { %v839_v55 = vpop.permute.xlu0 %838 }
 0x290   :  { %3135 = vmatpush.xpose.msk.msrb.mxu1 %vm356_vm1, %v841_v10  ;;  %v835_v51 = vpop.permute.xlu1 %834 }
 0x294   :  { %3136 = vmatpush.xpose.msk.msrb.mxu1 %vm356_vm1, %v839_v55  ;;  %v1051_v55 = vmul.f32 %v1037_v54, %v4164_v26 }
 0x296   :  { %v1277_v61 = vpop.permute.xlu2 %1276 }
 0x297   :  { %3137 = vmatmul.msk.f32.vlgmr.msrb.gmra.mxu1 %vm356_vm1, %v831_v52  ;;  %v1282_v31 = vmul.f32 %v1277_v61, %v4161_v6 }
 0x298   :  { %v1049_v34 = vpop.permute.xlu1 %1048 }
 0x299   :  { %v1054_v9 = vmul.f32 %v1049_v34, %v4161_v6 }
 0x29b   :  { %v3360_v19 = vpack.i.bf16 %v1053_v20, %v1054_v9 }
 0x29d   :  { %3361 = vrot.lane.b32.xlu2 %v3360_v19, %s3682_s19 }
 0x29e   :  { %v1273_v16 = vpop.permute.xlu2 %1272 }
 0x29f   :  { %3138 = vmatmul.msk.f32.gmra.mxu1 %vm356_vm1, %v833_v11  ;;  %v1281_v25 = vmul.f32 %v1273_v16, %v4141_v43  ;;  %v5139_v16 = vmov 0  }
 0x2a0   :  { %v1041_v59 = vpop.permute.xlu1 %1040 }
 0x2a1   :  { %v3377_v35 = vpack.i.bf16 %v1281_v25, %v1282_v31 }
 0x2a6   :  { %v1269_v40 = vpop.permute.xlu2 %1268 }
 0x2a7   :  { %3139 = vmatmul.msk.f32.gmra.mxu1 %vm356_vm1, %v835_v51  ;;  %v1280_v10 = vmul.f32 %v1269_v40, %v4154_v3  ;;  %v1052_v51 = vmul.f32 %v1041_v59, %v4154_v3 }
 0x2a9   :  { %v1163_v45 = vpop.permute.xlu1 %1162  ;;  %v3367_v34 = vpack.i.bf16 %v1051_v55, %v1052_v51 }
 0x2aa   :  { %v1168_v23 = vmul.f32 %v1163_v45, %v4161_v6 }
 0x2ae   :  { %v1265_v36 = vpop.permute.xlu2 %1264 }
 0x2af   :  { %3140 = vmatmul.msk.f32.gmra.mxu1 %vm356_vm1, %v837_v33  ;;  %v1279_v32 = vmul.f32 %v1265_v36, %v4164_v26  ;;  %v4261_v33 = vld [vmem:[%s5123_s4] sm:$0xff]  ;;  %s3690_s4 = smov 32  }
 0x2b0   :  { %821 = vmatpush.msrb.mxu0 %v4261_v33 }
 0x2b1   :  { %v1159_v22 = vpop.permute.xlu1 %1158  ;;  %v3387_v11 = vpack.i.bf16 %v1279_v32, %v1280_v10  ;;  %v5137_v10 = vmov 64  }
 0x2b2   :  { %v1167_v12 = vmul.f32 %v1159_v22, %v4141_v43 }
 0x2b4   :  { %v3372_v27 = vpack.i.bf16 %v1167_v12, %v1168_v23 }
 0x2b6   :  { %3373 = vrot.lane.b32.xlu2 %v3372_v27, %s3685_s2 }
 0x2b9   :  { %v1155_v52 = vpop.permute.xlu1 %1154 }
 0x2ba   :  { %v1166_v23 = vmul.f32 %v1155_v52, %v4154_v3 }
 0x2be   :  { %3378 = vrot.lane.b32.xlu2 %v3377_v35, %s3686_s22 }
 0x2c1   :  { %v1151_v20 = vpop.permute.xlu1 %1150 }
 0x2c2   :  { %v1165_v45 = vmul.f32 %v1151_v20, %v4164_v26 }
 0x2c4   :  { %v3382_v59 = vpack.i.bf16 %v1165_v45, %v1166_v23 }
 0x2c6   :  { %3388 = vrot.lane.b32.xlu2 %v3387_v11, %s3686_s22 }
 0x2e5   :  { %3366 = vset.pattern.permute.xlu0 %v3687_v47 }
 0x2f4   :  { %v759_v39 = vpop.f32.mrf.mxu3 }
 0x2f5   :  { %999 = vperm.xlu1 %3365, %v759_v39   ;;  %1227 = vperm.xlu2 %3392, %v759_v39  }
 0x2f6   :  { %1113 = vperm.xlu0 %3366, %v759_v39  }
 0x2f7   :  { %v3362_v9 = vpop.permute.xlu2 %3361 }
 0x2f8   :  { %v3363_v61 = vunpack.i.l.bf16 %v3362_v9  ;;  %v3364_v22 = vunpack.i.h.bf16 %v3362_v9 }
 0x2fa   :  { %1095 = vmatpush.msrb.mxu3 %v3363_v61 }
 0x2fc   :  { %v762_v19 = vpop.f32.mrf.mxu3  ;;  %1096 = vmatpush.msrb.mxu3 %v3364_v22 }
 0x2fd   :  { %3368 = vrot.lane.b32.xlu1 %v3367_v34, %s3682_s19  ;;  %3393 = vset.pattern.permute.xlu2 %v5139_v16 }
 0x2fe   :  { %894 = vperm.xlu2 %3393, %v759_v39  }
 0x304   :  { %v765_v54 = vpop.f32.mrf.mxu3 }
 0x305   :  { %3383 = vrot.lane.b32.xlu1 %v3382_v59, %s3685_s2 }
 0x306   :  { %3395 = vset.pattern.permute.xlu2 %v3684_v13 }
 0x307   :  { %1231 = vperm.xlu2 %3395, %v762_v19  }
 0x30a   :  { %v787_v12 = vpop.trf.xlu0 }
 0x30b   :  { %3132 = vmatmul.msk.f32.vlgmr.msrb.gmra.mxu0 %vm400_vm2, %v787_v12 }
 0x30c   :  { %v768_v40 = vpop.f32.mrf.mxu3 }
 0x30d   :  { %1003 = vperm.xlu1 %3365, %v762_v19  }
 0x30f   :  { %3399 = vset.pattern.permute.xlu2 %v3683_v7 }
 0x310   :  { %1011 = vperm.xlu2 %3399, %v768_v40   ;;  %v3374_v27 = vpop.permute.xlu2 %3373 }
 0x311   :  { %v3375_v25 = vunpack.i.l.bf16 %v3374_v27  ;;  %v3376_v31 = vunpack.i.h.bf16 %v3374_v27 }
 0x313   :  { %1209 = vmatpush.msra.mxu0 %v3375_v25 }
 0x315   :  { %3394 = vset.pattern.permute.xlu1 %v3687_v47  ;;  %1210 = vmatpush.msra.mxu0 %v3376_v31 }
 0x316   :  { %1117 = vperm.xlu1 %3394, %v762_v19  }
 0x318   :  { %3400 = vset.pattern.permute.xlu2 %v3687_v47  ;;  %v3379_v35 = vpop.permute.xlu2 %3378 }
 0x319   :  { %1125 = vperm.xlu2 %3400, %v768_v40   ;;  %v3380_v36 = vunpack.i.l.bf16 %v3379_v35  ;;  %v3381_v32 = vunpack.i.h.bf16 %v3379_v35 }
 0x31b   :  { %1323 = vmatpush.msra.mxu1 %v3380_v36 }
 0x31d   :  { %1324 = vmatpush.msra.mxu1 %v3381_v32 }
 0x31e   :  { %3396 = vset.pattern.permute.xlu1 %v3683_v7 }
 0x31f   :  { %1007 = vperm.xlu1 %3396, %v765_v54  }
 0x320   :  { %v3389_v11 = vpop.permute.xlu2 %3388 }
 0x321   :  { %3402 = vset.pattern.permute.xlu2 %v5137_v10  ;;  %v3390_v52 = vunpack.i.l.bf16 %v3389_v11  ;;  %v3391_v39 = vunpack.i.h.bf16 %v3389_v11 }
 0x322   :  { %945 = vperm.xlu2 %3402, %v4097_v18  }
 0x323   :  { %1325 = vmatpush.msra.mxu1 %v3390_v52 }
 0x325   :  { %1326 = vmatpush.msra.mxu1 %v3391_v39 }
 0x327   :  { %3397 = vset.pattern.permute.xlu1 %v3687_v47 }
 0x328   :  { %1121 = vperm.xlu1 %3397, %v765_v54  }
 0x32a   :  { %940 = vperm.xlu2 %3402, %v4056_v46  }
 0x330   :  { %3398 = vset.pattern.permute.xlu1 %v3684_v13 }
 0x331   :  { %1235 = vperm.xlu1 %3398, %v765_v54  }
 0x332   :  { %3405 = vset.pattern.permute.xlu2 %v5139_v16 }
 0x333   :  { %904 = vperm.xlu2 %3405, %v765_v54  }
 0x339   :  { %1239 = vperm.xlu1 %3398, %v768_v40  }
 0x33b   :  { %3407 = vset.pattern.permute.xlu2 %v3678_v42 }
 0x341   :  { %3401 = vset.pattern.permute.xlu1 %v5137_v10 }
 0x342   :  { %950 = vperm.xlu1 %3401, %v4122_v8  }
 0x34a   :  { %3403 = vset.pattern.permute.xlu1 %v5139_v16 }
 0x34b   :  { %899 = vperm.xlu1 %3403, %v762_v19  }
 0x34f   :  { %v1228_v34 = vpop.permute.xlu2 %1227 }
 0x353   :  { %3404 = vset.pattern.permute.xlu1 %v5137_v10 }
 0x354   :  { %935 = vperm.xlu1 %3404, %v4133_v0  }
 0x358   :  { %v4292_v19 = vpop.permute.xlu2 %894 }
 0x35c   :  { %3406 = vset.pattern.permute.xlu1 %v5139_v16 }
 0x35d   :  { %909 = vperm.xlu1 %3406, %v768_v40  }
 0x361   :  { %v1232_v59 = vpop.permute.xlu2 %1231 }
 0x365   :  { %3408 = vset.pattern.permute.xlu1 %v3678_v42 }
 0x367   :  { %v1000_v46 = vpop.permute.xlu1 %999 }
 0x368   :  { %v1114_v23 = vpop.permute.xlu0 %1113 }
 0x36f   :  { %v3369_v18 = vpop.permute.xlu1 %3368 }
 0x370   :  { %v3370_v51 = vunpack.i.l.bf16 %v3369_v18  ;;  %v3371_v55 = vunpack.i.h.bf16 %v3369_v18 }
 0x372   :  { %1097 = vmatpush.msrb.mxu3 %v3370_v51 }
 0x374   :  { %1098 = vmatpush.msrb.mxu3 %v3371_v55 }
 0x377   :  { %v3384_v8 = vpop.permute.xlu1 %3383 }
 0x378   :  { %v3385_v20 = vunpack.i.l.bf16 %v3384_v8  ;;  %v3386_v9 = vunpack.i.h.bf16 %v3384_v8 }
 0x37a   :  { %1211 = vmatpush.msra.mxu0 %v3385_v20 }
 0x37c   :  { %1212 = vmatpush.msra.mxu0 %v3386_v9 }
 0x37f   :  { %v1004_v0 = vpop.permute.xlu1 %1003 }
 0x388   :  { %v4294_v61 = vpop.f32.mrf.mxu0  ;;  %v1118_v35 = vpop.permute.xlu1 %1117 }
 0x389   :  { %v4297_v45 = vperm.slane %v4294_v61, 1  ;;  %v4300_v42 = vperm.slane %v4294_v61, 2  ;;  %v4303_v22 = vperm.slane %v4294_v61, 3 }
 0x38b   :  { %v1015_v54 = vsub.f32 %v1000_v46, %v4297_v45  ;;  %v1129_v12 = vsub.f32 %v1114_v23, %v4300_v42  ;;  %v1243_v40 = vsub.f32 %v1228_v34, %v4303_v22  ;;  %v1244_v27 = vsub.f32 %v1232_v59, %v4303_v22  ;;  %v4325_v34 = vpop.f32.mrf.mxu1 }
 0x38c   :  { %v1016_v32 = vsub.f32 %v1004_v0, %v4297_v45  ;;  %v1130_v39 = vsub.f32 %v1118_v35, %v4300_v42  ;;  %v1012_v0 = vpop.permute.xlu2 %1011 }
 0x38d   :  { %v1133_v25 = vsel %vm5136_vm8, %v1129_v12, -1e+09  ;;  %v1247_v31 = vsel %vm5136_vm8, %v1243_v40, -1e+09  ;;  %v1019_v36 = vsel %vm5136_vm8, %v1015_v54, -1e+09 }
 0x38e   :  { %v1137_v11 = vmul.f32 1.442695, %v1133_v25  ;;  %v1251_v52 = vmul.f32 1.442695, %v1247_v31  ;;  %v1023_v46 = vmul.f32 1.442695, %v1019_v36 }
 0x38f   :  { %v1134_v18 = vsel %vm5135_vm9, %v1130_v39, -1e+09  ;;  %v1248_v51 = vsel %vm5135_vm9, %v1244_v27, -1e+09  ;;  %v1020_v55 = vsel %vm5135_vm9, %v1016_v32, -1e+09  ;;  %v1018_v39 = vsub.f32 %v1012_v0, %v4297_v45 }
 0x390   :  { %3503 = vpow2.f32 %v1137_v11  ;;  %v1139_v8 = vmul.f32 1.442695, %v1134_v18  ;;  %v1253_v20 = vmul.f32 1.442695, %v1248_v51  ;;  %v1025_v9 = vmul.f32 1.442695, %v1020_v55 }
 0x391   :  { %3505 = vpow2.f32 %v1251_v52  ;;  %v1008_v59 = vpop.permute.xlu1 %1007 }
 0x392   :  { %3507 = vpow2.f32 %v1023_v46  ;;  %v1017_v12 = vsub.f32 %v1008_v59, %v4297_v45  ;;  %v1022_v45 = vsel %vm5133_vm13, %v1018_v39, -1e+09 }
 0x393   :  { %3509 = vpow2.f32 %v1139_v8  ;;  %v4337_v32 = vpop.f32.mrf.mxu1 }
 0x394   :  { %3511 = vpow2.f32 %v1253_v20  ;;  %v1021_v31 = vsel %vm5134_vm10, %v1017_v12, -1e+09  ;;  %v1126_v18 = vpop.permute.xlu2 %1125 }
 0x395   :  { %3513 = vpow2.f32 %v1025_v9  ;;  %v1027_v11 = vmul.f32 1.442695, %v1021_v31  ;;  %v1132_v9 = vsub.f32 %v1126_v18, %v4300_v42 }
 0x396   :  { %v3504_v23 = vpop.eup %3503 }
 0x397   :  { %v3506_v54 = vpop.eup %3505  ;;  %v1145_v40 = vmul.f32 %v3504_v23, %v4325_v34  ;;  %3515 = vpow2.f32 %v1027_v11  ;;  %v1136_v12 = vsel %vm5133_vm13, %v1132_v9, -1e+09 }
 0x398   :  { %v3508_v27 = vpop.eup %3507  ;;  %v1259_v25 = vmul.f32 %v3506_v54, %v4325_v34  ;;  %v1029_v54 = vmul.f32 1.442695, %v1022_v45 }
 0x399   :  { %v1031_v35 = vmul.f32 %v3508_v27, %v4325_v34  ;;  %3149 = vmatmul.msk.f32.vlgmr.msra.gmra.mxu0 %vm400_vm2, %v1145_v40  ;;  %v3510_v36 = vpop.eup %3509  ;;  %v1143_v27 = vmul.f32 1.442695, %v1136_v12 }
 0x39a   :  { %3153 = vmatmul.msk.f32.vlgmr.msra.gmra.mxu1 %vm400_vm2, %v1259_v25  ;;  %v3512_v52 = vpop.eup %3511  ;;  %v1122_v51 = vpop.permute.xlu1 %1121  ;;  %v1146_v55 = vmul.f32 %v3510_v36, %v4337_v32 }
 0x39b   :  { %3145 = vmatmul.msk.f32.vlgmr.msrb.gmra.mxu3 %vm400_vm2, %v1031_v35  ;;  %v3514_v46 = vpop.eup %3513  ;;  %v1131_v8 = vsub.f32 %v1122_v51, %v4300_v42  ;;  %v1260_v20 = vmul.f32 %v3512_v52, %v4337_v32  ;;  %v4355_v40 = vpop.f32.mrf.mxu1 }
 0x39c   :  { %v1032_v23 = vmul.f32 %v3514_v46, %v4337_v32 }
 0x39d   :  { %v1135_v0 = vsel %vm5134_vm10, %v1131_v8, -1e+09  ;;  %v3516_v42 = vpop.eup %3515  ;;  %v946_v8 = vpop.permute.xlu2 %945 }
 0x39e   :  { %v1141_v59 = vmul.f32 1.442695, %v1135_v0  ;;  %v1033_v35 = vmul.f32 %v3516_v42, %v4355_v40 }
 0x3a0   :  { %3517 = vpow2.f32 %v1141_v59 }
 0x3a1   :  { %3150 = vmatmul.msk.f32.gmra.mxu0 %vm400_vm2, %v1146_v55  ;;  %3519 = vpow2.f32 %v1029_v54  ;;  %v912_v54 = vperm.slane %v4294_v61, 0 }
 0x3a2   :  { %3154 = vmatmul.msk.f32.gmra.mxu1 %vm400_vm2, %v1260_v20  ;;  %3521 = vpow2.f32 %v1143_v27 }
 0x3a3   :  { %3146 = vmatmul.msk.f32.gmra.mxu3 %vm400_vm2, %v1032_v23  ;;  %v1236_v25 = vpop.permute.xlu1 %1235  ;;  %v888_v18 = vpop.f32.mrf.mxu1 }
 0x3a4   :  { %v1245_v31 = vsub.f32 %v1236_v25, %v4303_v22 }
 0x3a5   :  { %v941_v25 = vpop.permute.xlu2 %940 }
 0x3a6   :  { %v3518_v36 = vpop.eup %3517  ;;  %v1249_v11 = vsel %vm5134_vm10, %v1245_v31, -1e+09 }
 0x3a7   :  { %v1255_v52 = vmul.f32 1.442695, %v1249_v11  ;;  %v1147_v39 = vmul.f32 %v3518_v36, %v4355_v40  ;;  %v3520_v46 = vpop.eup %3519  ;;  %v954_v11 = vmul.f32 %v941_v25, %v4154_v3 }
 0x3a8   :  { %v3522_v55 = vpop.eup %3521  ;;  %v1034_v9 = vmul.f32 %v3520_v46, %v888_v18 }
 0x3a9   :  { %3523 = vpow2.f32 %v1255_v52  ;;  %3151 = vmatmul.msk.f32.gmra.mxu0 %vm400_vm2, %v1147_v39  ;;  %v1148_v59 = vmul.f32 %v3522_v55, %v888_v18 }
 0x3ab   :  { %3147 = vmatmul.msk.f32.gmra.mxu3 %vm400_vm2, %v1033_v35  ;;  %v1240_v51 = vpop.permute.xlu1 %1239  ;;  %v955_v35 = vmul.f32 %v946_v8, %v4141_v43 }
 0x3ac   :  { %v1246_v20 = vsub.f32 %v1240_v51, %v4303_v22  ;;  %v913_v22 = vsub.f32 %v4292_v19, %v912_v54 }
 0x3ad   :  { %v905_v51 = vpop.permute.xlu2 %904 }
 0x3ae   :  { %v1250_v23 = vsel %vm5133_vm13, %v1246_v20, -1e+09  ;;  %v917_v61 = vsel %vm5136_vm8, %v913_v22, -1e+09  ;;  %v915_v8 = vsub.f32 %v905_v51, %v912_v54 }
 0x3af   :  { %v3524_v45 = vpop.eup %3523  ;;  %v1257_v0 = vmul.f32 1.442695, %v1250_v23  ;;  %v921_v52 = vmul.f32 1.442695, %v917_v61 }
 0x3b0   :  { %v1261_v12 = vmul.f32 %v3524_v45, %v4355_v40  ;;  %v919_v45 = vsel %vm5134_vm10, %v915_v8, -1e+09  ;;  %vm1396_vm10 = vcmask 392192  }
 0x3b1   :  { %3525 = vpow2.f32 %v1257_v0  ;;  %3152 = vmatmul.msk.f32.gmra.mxu0 %vm400_vm2, %v1148_v59  ;;  %v925_v59 = vmul.f32 1.442695, %v919_v45 }
 0x3b2   :  { %3155 = vmatmul.msk.f32.gmra.mxu1 %vm400_vm2, %v1261_v12  ;;  %3527 = vpow2.f32 %v921_v52 }
 0x3b3   :  { %3148 = vmatmul.msk.f32.gmra.mxu3 %vm400_vm2, %v1034_v9 }
 0x3b4   :  { %v951_v42 = vpop.permute.xlu1 %950 }
 0x3b5   :  { %v956_v27 = vmul.f32 %v951_v42, %v4161_v6 }
 0x3b7   :  { %v3526_v31 = vpop.eup %3525  ;;  %981 = vmatpush.msrb.mxu2 %v956_v27 }
 0x3b8   :  { %v1262_v36 = vmul.f32 %v3526_v31, %v888_v18  ;;  %v3528_v20 = vpop.eup %3527 }
 0x3b9   :  { %982 = vmatpush.msrb.mxu2 %v955_v35  ;;  %v929_v0 = vmul.f32 %v3528_v20, %v4325_v34  ;;  %v3158_v20 = vmul.f32 -1.442695, %v3960_v1 }
 0x3ba   :  { %3156 = vmatmul.msk.f32.gmra.mxu1 %vm400_vm2, %v1262_v36 }
 0x3bb   :  { %983 = vmatpush.msrb.mxu2 %v954_v11 }
 0x3bd   :  { %v900_v19 = vpop.permute.xlu1 %899 }
 0x3be   :  { %v914_v39 = vsub.f32 %v900_v19, %v912_v54 }
 0x3c0   :  { %v918_v46 = vsel %vm5135_vm9, %v914_v39, -1e+09 }
 0x3c1   :  { %v923_v55 = vmul.f32 1.442695, %v918_v46 }
 0x3c3   :  { %3529 = vpow2.f32 %v923_v55 }
 0x3c4   :  { %3531 = vpow2.f32 %v925_v59 }
 0x3c6   :  { %v936_v9 = vpop.permute.xlu1 %935 }
 0x3c7   :  { %v953_v23 = vmul.f32 %v936_v9, %v4164_v26  ;;  %v3157_v9 = vmul.f32 -1.442695, %v3956_v60 }
 0x3c9   :  { %984 = vmatpush.msrb.mxu2 %v953_v23  ;;  %v3530_v12 = vpop.eup %3529 }
 0x3ca   :  { %3141 = vmatmul.msk.f32.vlgmr.msrb.gmra.mxu2 %vm400_vm2, %v929_v0  ;;  %v930_v27 = vmul.f32 %v3530_v12, %v4337_v32  ;;  %v3532_v35 = vpop.eup %3531  ;;  %v3159_v12 = vmul.f32 -1.442695, %v3984_v21 }
 0x3cb   :  { %v931_v34 = vmul.f32 %v3532_v35, %v4355_v40 }
 0x3cf   :  { %v910_v22 = vpop.permute.xlu1 %909 }
 0x3d0   :  { %v916_v42 = vsub.f32 %v910_v22, %v912_v54 }
 0x3d2   :  { %v920_v25 = vsel %vm5133_vm13, %v916_v42, -1e+09  ;;  %3142 = vmatmul.msk.f32.gmra.mxu2 %vm400_vm2, %v930_v27  ;;  %v3160_v27 = vmul.f32 -1.442695, %v4030_v53 }
 0x3d3   :  { %v927_v31 = vmul.f32 1.442695, %v920_v25 }
 0x3d5   :  { %3533 = vpow2.f32 %v927_v31 }
 0x3d6   :  { %3535 = vpow2.f32 %v3158_v20 }
 0x3d7   :  { %3537 = vpow2.f32 %v3157_v9 }
 0x3da   :  { %3143 = vmatmul.msk.f32.gmra.mxu2 %vm400_vm2, %v931_v34 }
 0x3db   :  { %v3534_v36 = vpop.eup %3533 }
 0x3dc   :  { %v932_v61 = vmul.f32 %v3534_v36, %v888_v18  ;;  %v3536_v23 = vpop.eup %3535 }
 0x3dd   :  { %v1423_v45 = vadd.f32 1.0, %v3536_v23  ;;  %v3538_v0 = vpop.eup %3537 }
 0x3de   :  { %v1422_v59 = vadd.f32 1.0, %v3538_v0 }
 0x3df   :  { %3539 = vrcp.f32 %v1423_v45  ;;  %vm1446_vm15 = vweird.f32 %v1423_v45 }
 0x3e0   :  { %3541 = vrcp.f32 %v1422_v59 }
 0x3e1   :  { %3543 = vpow2.f32 %v3159_v12 }
 0x3e2   :  { %3144 = vmatmul.msk.f32.gmra.mxu2 %vm400_vm2, %v932_v61  ;;  %3545 = vpow2.f32 %v3160_v27  ;;  %v1437_v27 = vand.u32 2147483648, %v1422_v59 }
 0x3e5   :  { %v3540_v22 = vpop.eup %3539 }
 0x3e6   :  { %v1442_v42 = vmul.f32 %v3540_v22, %v1423_v45  ;;  %v3542_v31 = vpop.eup %3541  ;;  %vm1447_vm14 = vweird.f32 %v3540_v22 }
 0x3e7   :  { %v3544_v34 = vpop.eup %3543  ;;  %v1427_v36 = vmul.f32 %v3542_v31, %v1422_v59  ;;  %vm1448_vm12 = vmor %vm1446_vm15, %vm1447_vm14  ;;  %vm1432_vm0 = vweird.f32 %v3542_v31  ;;  %vm1431_vm14 = vweird.f32 %v1422_v59 }
 0x3e8   :  { %v1443_v35 = vsub.f32 1.0, %v1442_v42  ;;  %vm1433_vm15 = vmor %vm1431_vm14, %vm1432_vm0 }
 0x416   :  { %v1214_v11 = vpop.f32.mrf.mxu0 }
 0x417   :  { %1360 = vrot.lane.b32.xlu2 %v1214_v11, %s3690_s4  ;;  %v1328_v32 = vpop.f32.mrf.mxu1  ;;  %v1444_v11 = vmul.f32 %v3540_v22, %v1443_v35 }
 0x41e   :  { %v1100_v54 = vpop.f32.mrf.mxu3  ;;  %v1217_v52 = vpop.f32.mrf.mxu0 }
 0x41f   :  { %1362 = vrot.lane.b32.xlu0 %v1217_v52, %s3690_s4  ;;  %1344 = vrot.lane.b32.xlu2 %v1100_v54, %s3691_s27  ;;  %v1331_v19 = vpop.f32.mrf.mxu1  ;;  %v3546_v54 = vpop.eup %3545  ;;  %v1428_v52 = vsub.f32 1.0, %v1427_v36 }
 0x426   :  { %v1103_v40 = vpop.f32.mrf.mxu3  ;;  %v1220_v18 = vpop.f32.mrf.mxu0 }
 0x427   :  { %1346 = vrot.lane.b32.xlu1 %v1103_v40, %s3691_s27  ;;  %1378 = vrot.lane.b32.xlu2 %v1331_v19, %s3679_s25  ;;  %v1445_v40 = vadd.f32 %v3540_v22, %v1444_v11 }
 0x42e   :  { %v1106_v39 = vpop.f32.mrf.mxu3  ;;  %v1223_v51 = vpop.f32.mrf.mxu0 }
 0x42f   :  { %1376 = vrot.lane.b32.xlu1 %v1328_v32, %s3679_s25  ;;  %1348 = vrot.lane.b32.xlu0 %v1106_v39, %s3691_s27  ;;  %v1334_v46 = vpop.f32.mrf.mxu1  ;;  %v4409_v32 = vadd.f32 1.0, %v3544_v34  ;;  %v4412_v39 = vadd.f32 1.0, %v3546_v54 }
 0x430   :  { %1364 = vrot.lane.b32.xlu2 %v1220_v18, %s3690_s4  ;;  %v1452_v18 = vand.u32 2147483648, %v1423_v45 }
 0x431   :  { %3547 = vrcp.f32 %v4409_v32  ;;  %vm1461_vm14 = vweird.f32 %v4409_v32  ;;  %vm1476_vm8 = vweird.f32 %v4412_v39 }
 0x432   :  { %v1453_v23 = vor.u32 1.1754944e-38, %v1452_v18  ;;  %3549 = vrcp.f32 %v4412_v39 }
 0x436   :  { %v1109_v55 = vpop.f32.mrf.mxu3 }
 0x437   :  { %1366 = vrot.lane.b32.xlu0 %v1223_v51, %s3690_s4  ;;  %1350 = vrot.lane.b32.xlu1 %v1109_v55, %s3691_s27  ;;  %v1337_v8 = vpop.f32.mrf.mxu1  ;;  %v1429_v51 = vmul.f32 %v3542_v31, %v1428_v52  ;;  %v1450_v55 = vand.u32 2147483647, %v1423_v45  ;;  %v4423_v0 = vpop.eup %3547 }
 0x438   :  { %1382 = vrot.lane.b32.xlu2 %v1337_v8, %s3679_s25  ;;  %v1449_v8 = vsel %vm1448_vm12, %v3540_v22, %v1445_v40  ;;  %v1435_v22 = vand.u32 2147483647, %v1422_v59  ;;  %v1457_v52 = vmul.f32 %v4423_v0, %v4409_v32  ;;  %vm1498_vm12 = vcmask 523264  }
 0x439   :  { %v1430_v12 = vadd.f32 %v3542_v31, %v1429_v51  ;;  %vm1451_vm13 = vcmp.eq.f32.partialorder %v1450_v55, 8.507059e+37  ;;  %vm1462_vm0 = vweird.f32 %v4423_v0 }
 0x43a   :  { %v1454_v35 = vsel %vm1451_vm13, %v1453_v23, %v1449_v8  ;;  %v4433_v8 = vpop.eup %3549  ;;  %vm1436_vm13 = vcmp.eq.f32.partialorder %v1435_v22, 8.507059e+37 }
 0x43b   :  { %v1434_v18 = vsel %vm1433_vm15, %v3542_v31, %v1430_v12  ;;  %v1487_v51 = vmul.f32 %v1454_v35, %v3960_v1  ;;  %vm1463_vm15 = vmor %vm1461_vm14, %vm1462_vm0 }
 0x43f   :  { %1380 = vrot.lane.b32.xlu1 %v1334_v46, %s3679_s25  ;;  %v4417_v46 = vld [vmem:[%s5124_s12] sm:$0x3] }
 0x440   :  { %v4420_v9 = vperm.slane %v4417_v46, 0 }
 0x442   :  { %v1403_v54 = vmul.f32 %v4420_v9, %v4154_v3  ;;  %v1458_v3 = vsub.f32 1.0, %v1457_v52  ;;  %v1402_v1 = vmul.f32 %v4420_v9, %v4164_v26 }
 0x44d   :  { %v986_v61 = vpop.f32.mrf.mxu2 }
 0x455   :  { %v989_v20 = vpop.f32.mrf.mxu2 }
 0x471   :  { %v1361_v25 = vpop.permute.xlu2 %1360 }
 0x479   :  { %v1345_v19 = vpop.permute.xlu2 %1344 }
 0x47a   :  { %v1388_v59 = vsel %vm356_vm1, %v986_v61, %v1345_v19 }
 0x47b   :  { %v1392_v31 = vsel %vm400_vm2, %v1388_v59, %v1361_v25 }
 0x481   :  { %v1379_v36 = vpop.permute.xlu2 %1378 }
 0x491   :  { %v1363_v34 = vpop.permute.xlu0 %1362 }
 0x499   :  { %v1347_v42 = vpop.permute.xlu1 %1346 }
 0x49a   :  { %v1389_v45 = vsel %vm356_vm1, %v989_v20, %v1347_v42  ;;  %v1438_v20 = vor.u32 1.1754944e-38, %v1437_v27 }
 0x49b   :  { %v1393_v11 = vsel %vm400_vm2, %v1389_v45, %v1363_v34  ;;  %v1472_v34 = vmul.f32 %v4433_v8, %v4412_v39  ;;  %v992_v45 = vpop.f32.mrf.mxu2 }
 0x49c   :  { %v1398_v40 = vsel %vm1396_vm10, %v1393_v11, %v1379_v36  ;;  %v1439_v42 = vsel %vm1436_vm13, %v1438_v20, %v1434_v18  ;;  %v1459_v11 = vmul.f32 %v4423_v0, %v1458_v3  ;;  %v1365_v18 = vpop.permute.xlu2 %1364  ;;  %v1465_v20 = vand.u32 2147483647, %v4409_v32 }
 0x49d   :  { %v1407_v55 = vadd.f32 %v1403_v54, %v1398_v40  ;;  %v1486_v35 = vmul.f32 %v1439_v42, %v3956_v60  ;;  %v1473_v54 = vsub.f32 1.0, %v1472_v34  ;;  %vm1477_vm13 = vweird.f32 %v4433_v8 }
 0x49e   :  { %v1460_v52 = vadd.f32 %v4423_v0, %v1459_v11  ;;  %vm1466_vm9 = vcmp.eq.f32.partialorder %v1465_v20, 8.507059e+37  ;;  %vm1478_vm0 = vmor %vm1476_vm8, %vm1477_vm13  ;;  %v1404_v11 = vmul.f32 %v4420_v9, %v4141_v43 }
 0x49f   :  { %v4436_v23 = vmul.f32 %v1487_v51, %v1407_v55  ;;  %v1474_v40 = vmul.f32 %v4433_v8, %v1473_v54  ;;  %v1467_v55 = vand.u32 2147483648, %v4409_v32  ;;  %v1480_v32 = vand.u32 2147483647, %v4412_v39 }
 0x4a0   :  { %v1464_v34 = vsel %vm1463_vm15, %v4423_v0, %v1460_v52 }
 0x4a1   :  { %v1377_v12 = vpop.permute.xlu1 %1376  ;;  %v1495_v27 = vmul.f32 %v4436_v23, %v4436_v23  ;;  %v1349_v19 = vpop.permute.xlu0 %1348  ;;  %vm1481_vm14 = vcmp.eq.f32.partialorder %v1480_v32, 8.507059e+37  ;;  %v3292_v32 = vld [vmem:[%s5125_s13 + $0x10] sm:$0xff] }
 0x4a2   :  { %v1397_v61 = vsel %vm1396_vm10, %v1392_v31, %v1377_v12  ;;  %v1475_v31 = vadd.f32 %v4433_v8, %v1474_v40  ;;  %v1482_v12 = vand.u32 2147483648, %v4412_v39  ;;  %v1405_v40 = vmul.f32 %v4420_v9, %v4161_v6 }
 0x4a3   :  { %v1406_v22 = vadd.f32 %v1402_v1, %v1397_v61  ;;  %v1502_v36 = vsel %vm1498_vm12, %v1495_v27, 0.0  ;;  %v995_v59 = vpop.f32.mrf.mxu2  ;;  %v1468_v1 = vor.u32 1.1754944e-38, %v1467_v55  ;;  %v1390_v27 = vsel %vm356_vm1, %v992_v45, %v1349_v19 }
 0x4a4   :  { %1503 = vadd.xlane.f32.xlu1 %v1502_v36  ;;  %v1479_v0 = vsel %vm1478_vm0, %v4433_v8, %v1475_v31  ;;  %v1394_v36 = vsel %vm400_vm2, %v1390_v27, %v1365_v18  ;;  %v3692_v6 = vmov 64.0  }
 0x4a5   :  { %v4449_v25 = vmul.f32 %v1486_v35, %v1406_v22  ;;  %v1469_v35 = vsel %vm1466_vm9, %v1468_v1, %v1464_v34  ;;  %v1383_v22 = vpop.permute.xlu2 %1382  ;;  %3551 = vrcp.f32 %v3692_v6  ;;  %v3293_v1 = vld [vmem:[%s5125_s13 + $0x18] sm:$0xff] }
 0x4a6   :  { %v1488_v39 = vmul.f32 %v1469_v35, %v3984_v21  ;;  %1619 = vmatpush.bf16.msra.mxu2 %v3293_v1 }
 0x4a7   :  { %v1494_v26 = vmul.f32 %v4449_v25, %v4449_v25 }
 0x4a9   :  { %v1351_v60 = vpop.permute.xlu1 %1350  ;;  %v1499_v51 = vsel %vm1498_vm12, %v1494_v26, 0.0  ;;  %v1367_v42 = vpop.permute.xlu0 %1366  ;;  %v1483_v26 = vor.u32 1.1754944e-38, %v1482_v12 }
 0x4aa   :  { %1500 = vadd.xlane.f32.xlu0 %v1499_v51  ;;  %v1391_v3 = vsel %vm356_vm1, %v995_v59, %v1351_v60  ;;  %1620 = vmatpush.bf16.msra.mxu2 %v3292_v32 }
 0x4ab   :  { %v1395_v61 = vsel %vm400_vm2, %v1391_v3, %v1367_v42  ;;  %v1484_v8 = vsel %vm1481_vm14, %v1483_v26, %v1479_v0  ;;  %v3552_v9 = vpop.eup %3551 }
 0x4ac   :  { %v1400_v45 = vsel %vm1396_vm10, %v1395_v61, %v1383_v22  ;;  %v1489_v51 = vmul.f32 %v1484_v8, %v4030_v53  ;;  %v1512_v42 = vmul.f32 64.0, %v3552_v9  ;;  %vm1516_vm8 = vweird.f32 %v3552_v9 }
 0x4ad   :  { %v1409_v18 = vadd.f32 %v1405_v40, %v1400_v45  ;;  %v3290_v45 = vld [vmem:[%s5125_s13] sm:$0xff] }
 0x4ae   :  { %v1513_v3 = vsub.f32 1.0, %v1512_v42 }
 0x4af   :  { %v4484_v20 = vmul.f32 %v1489_v51, %v1409_v18 }
 0x4b0   :  { %v1514_v53 = vmul.f32 %v3552_v9, %v1513_v3 }
 0x4b1   :  { %v1381_v54 = vpop.permute.xlu1 %1380  ;;  %v1497_v21 = vmul.f32 %v4484_v20, %v4484_v20 }
 0x4b2   :  { %v1399_v19 = vsel %vm1396_vm10, %v1394_v36, %v1381_v54  ;;  %v1515_v34 = vadd.f32 %v3552_v9, %v1514_v53 }
 0x4b3   :  { %v1408_v52 = vadd.f32 %v1404_v11, %v1399_v19  ;;  %v1508_v59 = vsel %vm1498_vm12, %v1497_v21, 0.0  ;;  %v3291_v11 = vld [vmem:[%s5125_s13 + $0x8] sm:$0xff] }
 0x4b4   :  { %v4489_v31 = vsel %vm1516_vm8, %v3552_v9, %v1515_v34  ;;  %1621 = vmatpush.bf16.msra.mxu2 %v3291_v11  ;;  %v1570_v9 = vperm.slane %v4417_v46, 1 }
 0x4b5   :  { %v4478_v60 = vmul.f32 %v1488_v39, %v1408_v52 }
 0x4b7   :  { %v1496_v43 = vmul.f32 %v4478_v60, %v4478_v60 }
 0x4b8   :  { %1622 = vmatpush.bf16.msra.mxu2 %v3290_v45 }
 0x4b9   :  { %v1505_v55 = vsel %vm1498_vm12, %v1496_v43, 0.0 }
 0x4ba   :  { %1506 = vadd.xlane.f32.xlu2 %v1505_v55 }
 0x4bc   :  { %2134 = vmatpush.msrb.mxu2 %v4231_v4 }
 0x4be   :  { %2135 = vmatpush.msrb.mxu2 %v4236_v24 }
 0x4c0   :  { %2136 = vmatpush.msrb.mxu2 %v4255_v37 }
 0x4c2   :  { %1509 = vadd.xlane.f32.xlu2 %v1508_v59  ;;  %2137 = vmatpush.msrb.mxu2 %v4261_v33 }
 0x517   :  { %v1504_v12 = vpop.xlane.xlu1 %1503 }
 0x518   :  { %v1519_v27 = vmul.f32 %v4489_v31, %v1504_v12 }
 0x51a   :  { %v1523_v61 = vadd.f32 1e-05, %v1519_v27 }
 0x51c   :  { %3553 = vrsqrt.f32 %v1523_v61  ;;  %vm1542_vm15 = vweird.f32 %v1523_v61 }
 0x51d   :  { %v1501_v35 = vpop.xlane.xlu0 %1500 }
 0x51e   :  { %v1518_v0 = vmul.f32 %v4489_v31, %v1501_v35 }
 0x520   :  { %v1522_v22 = vadd.f32 1e-05, %v1518_v0 }
 0x522   :  { %v3554_v36 = vpop.eup %3553  ;;  %3555 = vrsqrt.f32 %v1522_v22  ;;  %vm1532_vm14 = vweird.f32 %v1522_v22 }
 0x523   :  { %v1537_v54 = vmul.f32 %v3554_v36, %v1523_v61  ;;  %vm1543_vm9 = vweird.f32 %v3554_v36 }
 0x524   :  { %vm1544_vm13 = vmor %vm1542_vm15, %vm1543_vm9 }
 0x525   :  { %v1538_v26 = vmul.f32 %v3554_v36, %v1537_v54 }
 0x527   :  { %v1539_v19 = vmul.f32 0.5, %v1538_v26 }
 0x528   :  { %v3556_v39 = vpop.eup %3555 }
 0x529   :  { %v1540_v52 = vsub.f32 1.5, %v1539_v19  ;;  %v1527_v40 = vmul.f32 %v3556_v39, %v1522_v22  ;;  %vm1533_vm0 = vweird.f32 %v3556_v39 }
 0x52a   :  { %vm1534_vm8 = vmor %vm1532_vm14, %vm1533_vm0 }
 0x52b   :  { %v1541_v8 = vmul.f32 %v3554_v36, %v1540_v52  ;;  %v1528_v18 = vmul.f32 %v3556_v39, %v1527_v40 }
 0x52d   :  { %v1529_v51 = vmul.f32 0.5, %v1528_v18  ;;  %v1507_v43 = vpop.xlane.xlu2 %1506  ;;  %v1545_v21 = vsel %vm1544_vm13, %v3554_v36, %v1541_v8 }
 0x52e   :  { %v1520_v55 = vmul.f32 %v4489_v31, %v1507_v43  ;;  %v1567_v24 = vmul.f32 %v1545_v21, %v4436_v23 }
 0x52f   :  { %v1530_v59 = vsub.f32 1.5, %v1529_v51 }
 0x530   :  { %v1524_v6 = vadd.f32 1e-05, %v1520_v55  ;;  %v1572_v53 = vmul.f32 %v1570_v9, %v1567_v24  ;;  %v3693_v24 = vmov 32.0  }
 0x531   :  { %v1531_v4 = vmul.f32 %v3556_v39, %v1530_v59 }
 0x532   :  { %3557 = vrsqrt.f32 %v1524_v6  ;;  %vm1552_vm15 = vweird.f32 %v1524_v6 }
 0x533   :  { %v1535_v42 = vsel %vm1534_vm8, %v3556_v39, %v1531_v4 }
 0x534   :  { %v1566_v37 = vmul.f32 %v1535_v42, %v4449_v25 }
 0x535   :  { %v1510_v3 = vpop.xlane.xlu2 %1509 }
 0x536   :  { %v1571_v34 = vmul.f32 %v1570_v9, %v1566_v37  ;;  %v1521_v1 = vmul.f32 %v4489_v31, %v1510_v3 }
 0x538   :  { %v3558_v12 = vpop.eup %3557  ;;  %v1525_v27 = vadd.f32 1e-05, %v1521_v1  ;;  %v1575_v33 = vpack.c.bf16 %v1572_v53, %v1571_v34 }
 0x539   :  { %v1547_v32 = vmul.f32 %v3558_v12, %v1524_v6  ;;  %vm1553_vm9 = vweird.f32 %v3558_v12 }
 0x53a   :  { %3559 = vrsqrt.f32 %v1525_v27  ;;  %3177 = vmatmul.msk.bf16.vlgmr.msra.gmra.mxu2 %vm1498_vm12, %v1575_v33  ;;  %vm1554_vm13 = vmor %vm1552_vm15, %vm1553_vm9  ;;  %vm1562_vm14 = vweird.f32 %v1525_v27 }
 0x53b   :  { %v1548_v46 = vmul.f32 %v3558_v12, %v1547_v32  ;;  %3561 = vrcp.f32 %v3693_v24 }
 0x53d   :  { %v1549_v61 = vmul.f32 0.5, %v1548_v46 }
 0x53f   :  { %v1550_v23 = vsub.f32 1.5, %v1549_v61 }
 0x540   :  { %v3560_v35 = vpop.eup %3559 }
 0x541   :  { %v1557_v0 = vmul.f32 %v3560_v35, %v1525_v27  ;;  %v1551_v22 = vmul.f32 %v3558_v12, %v1550_v23  ;;  %vm1563_vm0 = vweird.f32 %v3560_v35  ;;  %v3562_v42 = vpop.eup %3561 }
 0x542   :  { %vm1564_vm8 = vmor %vm1562_vm14, %vm1563_vm0  ;;  %v1652_v37 = vmul.f32 32.0, %v3562_v42  ;;  %vm1656_vm9 = vweird.f32 %v3562_v42 }
 0x543   :  { %v1558_v25 = vmul.f32 %v3560_v35, %v1557_v0  ;;  %v1555_v11 = vsel %vm1554_vm13, %v3558_v12, %v1551_v22 }
 0x544   :  { %v1568_v45 = vmul.f32 %v1555_v11, %v4478_v60 }
 0x545   :  { %v1559_v36 = vmul.f32 0.5, %v1558_v25 }
 0x546   :  { %v1573_v52 = vmul.f32 %v1570_v9, %v1568_v45 }
 0x547   :  { %v1560_v54 = vsub.f32 1.5, %v1559_v36 }
 0x549   :  { %v1561_v26 = vmul.f32 %v3560_v35, %v1560_v54 }
 0x54b   :  { %v1565_v19 = vsel %vm1564_vm8, %v3560_v35, %v1561_v26 }
 0x54c   :  { %v1569_v39 = vmul.f32 %v1565_v19, %v4484_v20 }
 0x54e   :  { %v1574_v40 = vmul.f32 %v1570_v9, %v1569_v39 }
 0x550   :  { %v1576_v8 = vpack.c.bf16 %v1574_v40, %v1573_v52 }
 0x552   :  { %3178 = vmatmul.msk.bf16.gmra.mxu2 %vm1498_vm12, %v1576_v8  ;;  %v3295_v8 = vld [vmem:[%s5116_s7 + $0x18] sm:$0xff] }
 0x553   :  { %1775 = vmatpush.bf16.msra.mxu3 %v3295_v8 }
 0x5bd   :  { %v1624_v18 = vpop.f32.mrf.mxu2 }
 0x5be   :  { %v1635_v51 = vadd.f32 %v1624_v18, %v3934_v49 }
 0x5c0   :  { %v1639_v43 = vsel %vm400_vm2, %v1635_v51, 0.0 }
 0x5c1   :  { %1640 = vadd.xlane.f32.xlu0 %v1639_v43 }
 0x5c5   :  { %v1626_v55 = vpop.f32.mrf.mxu2 }
 0x5c6   :  { %v1636_v21 = vadd.f32 %v1626_v55, %v3936_v50  ;;  %v1653_v50 = vsub.f32 1.0, %v1652_v37 }
 0x5c8   :  { %v1642_v59 = vsel %vm400_vm2, %v1636_v21, 0.0  ;;  %v1654_v3 = vmul.f32 %v3562_v42, %v1653_v50  ;;  %v1634_v50 = vld [vmem:[%s5126_s14] sm:$0x3] }
 0x5c9   :  { %1643 = vadd.xlane.f32.xlu1 %v1642_v59 }
 0x5ca   :  { %v1655_v53 = vadd.f32 %v3562_v42, %v1654_v3 }
 0x5cc   :  { %v4526_v34 = vsel %vm1656_vm9, %v3562_v42, %v1655_v53 }
 0x5d5   :  { %v1629_v60 = vpop.f32.mrf.mxu2 }
 0x5d6   :  { %v1637_v20 = vadd.f32 %v1629_v60, %v3948_v57  ;;  %v3294_v60 = vld [vmem:[%s5116_s7 + $0x10] sm:$0xff] }
 0x5d7   :  { %1776 = vmatpush.bf16.msra.mxu3 %v3294_v60 }
 0x5d8   :  { %v1645_v6 = vsel %vm400_vm2, %v1637_v20, 0.0 }
 0x5d9   :  { %1646 = vadd.xlane.f32.xlu2 %v1645_v6 }
 0x5dd   :  { %v1631_v4 = vpop.f32.mrf.mxu2 }
 0x5de   :  { %v1638_v9 = vadd.f32 %v1631_v4, %v3950_v58 }
 0x5e0   :  { %v1648_v49 = vsel %vm400_vm2, %v1638_v9, 0.0 }
 0x5e1   :  { %1649 = vadd.xlane.f32.xlu0 %v1648_v49  ;;  %v3296_v49 = vld [vmem:[%s5117_s8 + $0x10] sm:$0xff] }
 0x634   :  { %v1641_v57 = vpop.xlane.xlu0 %1640 }
 0x635   :  { %v1658_v1 = vmul.f32 %v4526_v34, %v1641_v57 }
 0x637   :  { %v1662_v12 = vsub.f32 %v1635_v51, %v1658_v1 }
 0x639   :  { %v1666_v27 = vmul.f32 %v1662_v12, %v1662_v12 }
 0x63b   :  { %v1670_v58 = vsel %vm400_vm2, %v1666_v27, 0.0 }
 0x63c   :  { %1671 = vadd.xlane.f32.xlu1 %v1670_v58  ;;  %v1644_v33 = vpop.xlane.xlu1 %1643  ;;  %v1734_v58 = vperm.slane %v1634_v50, 0 }
 0x63d   :  { %v1659_v32 = vmul.f32 %v4526_v34, %v1644_v33 }
 0x63f   :  { %v1663_v46 = vsub.f32 %v1636_v21, %v1659_v32 }
 0x641   :  { %v1667_v61 = vmul.f32 %v1663_v46, %v1663_v46 }
 0x643   :  { %v1673_v23 = vsel %vm400_vm2, %v1667_v61, 0.0 }
 0x644   :  { %1674 = vadd.xlane.f32.xlu2 %v1673_v23 }
 0x64c   :  { %v1647_v35 = vpop.xlane.xlu2 %1646 }
 0x64d   :  { %v1660_v0 = vmul.f32 %v4526_v34, %v1647_v35  ;;  %v1739_v35 = vperm.slane %v1634_v50, 1 }
 0x64f   :  { %v4533_v22 = vsub.f32 %v1637_v20, %v1660_v0  ;;  %v3297_v20 = vld [vmem:[%s5117_s8 + $0x18] sm:$0xff] }
 0x650   :  { %1811 = vmatpush.bf16.msrb.mxu0 %v3297_v20 }
 0x651   :  { %v1668_v25 = vmul.f32 %v4533_v22, %v4533_v22 }
 0x653   :  { %v1676_v36 = vsel %vm400_vm2, %v1668_v25, 0.0 }
 0x654   :  { %1677 = vadd.xlane.f32.xlu0 %v1676_v36  ;;  %v1650_v11 = vpop.xlane.xlu0 %1649  ;;  %1812 = vmatpush.bf16.msrb.mxu0 %v3296_v49  ;;  %v3207_v36 = vld [vmem:[%s5118_s11 + $0x2] sm:$0x3] }
 0x655   :  { %v1661_v54 = vmul.f32 %v4526_v34, %v1650_v11 }
 0x657   :  { %v4539_v26 = vsub.f32 %v1638_v9, %v1661_v54  ;;  %v1826_v54 = vperm.slane %v3207_v36, 0 }
 0x659   :  { %v1669_v45 = vmul.f32 %v4539_v26, %v4539_v26 }
 0x65b   :  { %v1679_v19 = vsel %vm400_vm2, %v1669_v45, 0.0  ;;  %v1871_v45 = vmul.f32 1.442695, %v3207_v36  ;;  %v3208_v36 = vld [vmem:[%s5121_s9 + $0x4] sm:$0xf] }
 0x65c   :  { %1680 = vadd.xlane.f32.xlu1 %v1679_v19  ;;  %1828 = vrot.lane.b32.xlu2 %v1826_v54, %s3677_s30 }
 0x6af   :  { %v1672_v39 = vpop.xlane.xlu1 %1671 }
 0x6b0   :  { %v1682_v52 = vmul.f32 %v1672_v39, %v4526_v34 }
 0x6b2   :  { %v1686_v40 = vadd.f32 1e-05, %v1682_v52 }
 0x6b4   :  { %3563 = vrsqrt.f32 %v1686_v40  ;;  %vm1696_vm13 = vweird.f32 %v1686_v40 }
 0x6b7   :  { %v1675_v18 = vpop.xlane.xlu2 %1674 }
 0x6b8   :  { %v1683_v51 = vmul.f32 %v1675_v18, %v4526_v34 }
 0x6ba   :  { %v3564_v43 = vpop.eup %3563  ;;  %v1687_v55 = vadd.f32 1e-05, %v1683_v51 }
 0x6bb   :  { %v1691_v21 = vmul.f32 %v3564_v43, %v1686_v40  ;;  %vm1697_vm15 = vweird.f32 %v3564_v43 }
 0x6bc   :  { %3565 = vrsqrt.f32 %v1687_v55  ;;  %vm1698_vm0 = vmor %vm1696_vm13, %vm1697_vm15  ;;  %vm1706_vm8 = vweird.f32 %v1687_v55 }
 0x6bd   :  { %v1692_v59 = vmul.f32 %v3564_v43, %v1691_v21 }
 0x6bf   :  { %v1693_v6 = vmul.f32 0.5, %v1692_v59 }
 0x6c1   :  { %v1694_v4 = vsub.f32 1.5, %v1693_v6 }
 0x6c2   :  { %v3566_v9 = vpop.eup %3565 }
 0x6c3   :  { %v1695_v24 = vmul.f32 %v3564_v43, %v1694_v4  ;;  %v1701_v42 = vmul.f32 %v3566_v9, %v1687_v55  ;;  %vm1707_vm14 = vweird.f32 %v3566_v9 }
 0x6c4   :  { %vm1708_vm9 = vmor %vm1706_vm8, %vm1707_vm14 }
 0x6c5   :  { %v1702_v37 = vmul.f32 %v3566_v9, %v1701_v42  ;;  %v1699_v3 = vsel %vm1698_vm0, %v3564_v43, %v1695_v24 }
 0x6c6   :  { %v1730_v33 = vmul.f32 %v1699_v3, %v1662_v12 }
 0x6c7   :  { %v1703_v53 = vmul.f32 0.5, %v1702_v37  ;;  %v1678_v57 = vpop.xlane.xlu0 %1677 }
 0x6c8   :  { %v1684_v1 = vmul.f32 %v1678_v57, %v4526_v34  ;;  %v1735_v0 = vmul.f32 %v1734_v58, %v1730_v33 }
 0x6c9   :  { %v1704_v27 = vsub.f32 1.5, %v1703_v53 }
 0x6ca   :  { %v1688_v32 = vadd.f32 1e-05, %v1684_v1  ;;  %v4567_v52 = vadd.f32 %v1739_v35, %v1735_v0 }
 0x6cb   :  { %v1705_v61 = vmul.f32 %v3566_v9, %v1704_v27 }
 0x6cc   :  { %3567 = vrsqrt.f32 %v1688_v32  ;;  %vm1716_vm13 = vweird.f32 %v1688_v32 }
 0x6cd   :  { %v1709_v23 = vsel %vm1708_vm9, %v3566_v9, %v1705_v61  ;;  %3569 = vpow2.f32 %v1871_v45  ;;  %v1878_v45 = vperm.slane %v3208_v36, 3 }
 0x6ce   :  { %v1731_v25 = vmul.f32 %v1709_v23, %v1663_v46  ;;  %v4590_v23 = vpop.permute.xlu2 %1828 }
 0x6cf   :  { %v1681_v11 = vpop.xlane.xlu1 %1680 }
 0x6d0   :  { %v1736_v19 = vmul.f32 %v1734_v58, %v1731_v25  ;;  %v1685_v39 = vmul.f32 %v1681_v11, %v4526_v34 }
 0x6d2   :  { %v3568_v12 = vpop.eup %3567  ;;  %v4569_v40 = vadd.f32 %v1739_v35, %v1736_v19  ;;  %v1689_v8 = vadd.f32 1e-05, %v1685_v39 }
 0x6d3   :  { %v1711_v46 = vmul.f32 %v3568_v12, %v1688_v32  ;;  %v3570_v43 = vpop.eup %3569  ;;  %vm1717_vm15 = vweird.f32 %v3568_v12 }
 0x6d4   :  { %3571 = vrsqrt.f32 %v1689_v8  ;;  %v1744_v18 = vpack.c.bf16 %v4569_v40, %v4567_v52  ;;  %v1873_v21 = vsub.f32 0.0, %v3570_v43  ;;  %vm1718_vm0 = vmor %vm1716_vm13, %vm1717_vm15  ;;  %vm1726_vm8 = vweird.f32 %v1689_v8 }
 0x6d5   :  { %v1712_v51 = vmul.f32 %v3568_v12, %v1711_v46 }
 0x6d6   :  { %3191 = vmatmul.msk.bf16.vlgmr.msra.gmra.mxu3 %vm400_vm2, %v1744_v18  ;;  %3205 = vmatmul.msk.bf16.vlgmr.msrb.gmra.mxu0 %vm400_vm2, %v1744_v18  ;;  %v2033_v20 = vperm.slane %v1873_v21, 1 }
 0x6d7   :  { %v1713_v55 = vmul.f32 0.5, %v1712_v51 }
 0x6d8   :  { %2035 = vrot.lane.b32.xlu0 %v2033_v20, %s3677_s30 }
 0x6d9   :  { %v1714_v59 = vsub.f32 1.5, %v1713_v55  ;;  %v3462_v55 = vld [vmem:[%s5120_s10 + $0x1] ss:$0 sm:$0xff] }
 0x6da   :  { %v3572_v60 = vpop.eup %3571 }
 0x6db   :  { %v1715_v6 = vmul.f32 %v3568_v12, %v1714_v59  ;;  %v1721_v4 = vmul.f32 %v3572_v60, %v1689_v8  ;;  %vm1727_vm14 = vweird.f32 %v3572_v60  ;;  %v1902_v8 = vperm.slane %v3208_v36, 2 }
 0x6dc   :  { %vm1728_vm9 = vmor %vm1726_vm8, %vm1727_vm14 }
 0x6dd   :  { %v1722_v9 = vmul.f32 %v3572_v60, %v1721_v4  ;;  %v1719_v49 = vsel %vm1718_vm0, %v3568_v12, %v1715_v6 }
 0x6de   :  { %v1732_v37 = vmul.f32 %v1719_v49, %v4533_v22 }
 0x6df   :  { %v1723_v24 = vmul.f32 0.5, %v1722_v9 }
 0x6e0   :  { %v1737_v57 = vmul.f32 %v1734_v58, %v1732_v37 }
 0x6e1   :  { %v1724_v42 = vsub.f32 1.5, %v1723_v24 }
 0x6e2   :  { %v4578_v27 = vadd.f32 %v1739_v35, %v1737_v57 }
 0x6e3   :  { %v1725_v50 = vmul.f32 %v3572_v60, %v1724_v42 }
 0x6e5   :  { %v1729_v3 = vsel %vm1728_vm9, %v3572_v60, %v1725_v50  ;;  %v1923_v50 = vperm.slane %v3208_v36, 1 }
 0x6e6   :  { %v1733_v53 = vmul.f32 %v1729_v3, %v4539_v26 }
 0x6e8   :  { %v1738_v1 = vmul.f32 %v1734_v58, %v1733_v53 }
 0x6ea   :  { %v4580_v33 = vadd.f32 %v1739_v35, %v1738_v1 }
 0x6ec   :  { %v1745_v32 = vpack.c.bf16 %v4580_v33, %v4578_v27 }
 0x6ee   :  { %3192 = vmatmul.msk.bf16.gmra.mxu3 %vm400_vm2, %v1745_v32  ;;  %3206 = vmatmul.msk.bf16.gmra.mxu0 %vm400_vm2, %v1745_v32 }
 0x753   :  { %v4586_v22 = vpop.f32.mrf.mxu0 }
 0x754   :  { %v1890_v39 = vrot.slane %v4586_v22, 7  ;;  %v1911_v24 = vrot.slane %v4586_v22, 6 }
 0x759   :  { %v4588_v61 = vpop.f32.mrf.mxu3 }
 0x75b   :  { %v1816_v35 = vpop.f32.mrf.mxu0 }
 0x75c   :  { %v1891_v54 = vrot.slane %v1816_v35, 7  ;;  %v1880_v12 = vmul.f32 %v1878_v45, %v1816_v35  ;;  %v1912_v18 = vrot.slane %v1816_v35, 6  ;;  %v1933_v42 = vrot.slane %v1816_v35, 5 }
 0x75e   :  { %v1896_v46 = vsel %vm238_vm11, %v1890_v39, %v1891_v54  ;;  %v1887_v6 = vadd.f32 %v3462_v55, %v1880_v12  ;;  %v1917_v53 = vsel %vm565_vm3, %v1911_v24, %v1912_v18 }
 0x75f   :  { %v1904_v4 = vmul.f32 %v1902_v8, %v1896_v46 }
 0x761   :  { %v4592_v26 = vpop.f32.mrf.mxu3 }
 0x762   :  { %v4596_v58 = vadd.f32 %v4590_v23, %v4592_v26 }
 0x764   :  { %v1840_v0 = vand.u32 2147483647, %v4596_v58 }
 0x766   :  { %v1844_v25 = vsub.f32 0.0, %v1840_v0  ;;  %v1932_v0 = vrot.slane %v4586_v22, 5 }
 0x768   :  { %v1849_v11 = vmul.f32 1.442695, %v1844_v25  ;;  %v1908_v25 = vadd.f32 %v1904_v4, %v1887_v6 }
 0x76a   :  { %3573 = vpow2.f32 %v1849_v11 }
 0x76b   :  { %v4602_v19 = vpop.f32.mrf.mxu0 }
 0x76c   :  { %v1892_v51 = vrot.slane %v4602_v19, 7  ;;  %v1913_v43 = vrot.slane %v4602_v19, 6  ;;  %v1881_v21 = vmul.f32 %v1878_v45, %v4602_v19  ;;  %v1934_v20 = vrot.slane %v4602_v19, 5 }
 0x76e   :  { %v1895_v59 = vsel %vm238_vm11, %v1891_v54, %v1892_v51  ;;  %v1916_v60 = vsel %vm565_vm3, %v1912_v18, %v1913_v43  ;;  %v1888_v57 = vadd.f32 %v3462_v55, %v1881_v21  ;;  %v1937_v1 = vsel %vm599_vm4, %v1933_v42, %v1934_v20 }
 0x76f   :  { %v1900_v9 = vsel %vm526_vm5, %v1895_v59, 0.0  ;;  %v1921_v3 = vsel %vm559_vm6, %v1916_v60, 0.0  ;;  %v1944_v54 = vperm.slane %v3208_v36, 0  ;;  %v1925_v59 = vmul.f32 %v1923_v50, %v1917_v53 }
 0x770   :  { %v3574_v49 = vpop.eup %3573  ;;  %v1905_v37 = vmul.f32 %v1902_v8, %v1900_v9  ;;  %v1926_v46 = vmul.f32 %v1923_v50, %v1921_v3  ;;  %v1938_v18 = vsel %vm599_vm4, %v1932_v0, %v1933_v42  ;;  %v1942_v21 = vsel %vm593_vm7, %v1937_v1, 0.0 }
 0x771   :  { %v4629_v32 = vpop.f32.mrf.mxu3  ;;  %v1856_v35 = vadd.f32 1.0, %v3574_v49  ;;  %v1947_v10 = vmul.f32 %v1944_v54, %v1942_v21  ;;  %v1929_v4 = vadd.f32 %v1925_v59, %v1908_v25  ;;  %v1879_v49 = vmul.f32 %v1878_v45, %v4586_v22 }
 0x772   :  { %v1909_v12 = vadd.f32 %v1905_v37, %v1888_v57  ;;  %v4638_v60 = vadd.f32 %v4590_v23, %v4629_v32  ;;  %v4644_v42 = vadd.f32 %v4590_v23, %v4588_v61  ;;  %v1946_v56 = vmul.f32 %v1944_v54, %v1938_v18 }
 0x773   :  { %v1821_v11 = vpop.f32.mrf.mxu0  ;;  %3575 = vlog2.f32 %v1856_v35  ;;  %vm5145_vm5 = vcmp.ge.s32.totalorder %v3881_v48, 1  ;;  %v1886_v18 = vadd.f32 %v3462_v55, %v1879_v49 }
 0x774   :  { %v1930_v9 = vadd.f32 %v1926_v46, %v1909_v12  ;;  %v1882_v16 = vmul.f32 %v1878_v45, %v1821_v11  ;;  %v1893_v6 = vrot.slane %v1821_v11, 7  ;;  %v1841_v36 = vand.u32 2147483647, %v4638_v60 }
 0x775   :  { %v1914_v1 = vrot.slane %v1821_v11, 6  ;;  %v4655_v45 = vadd.f32 %v1946_v56, %v1929_v4 }
 0x776   :  { %v4646_v37 = vadd.f32 %v1947_v10, %v1930_v9  ;;  %v1845_v3 = vsub.f32 0.0, %v1841_v36  ;;  %v1894_v53 = vsel %vm238_vm11, %v1892_v51, %v1893_v6  ;;  %v1897_v57 = vsel %vm238_vm11, %v1893_v6, %v1890_v39 }
 0x777   :  { %v1889_v35 = vadd.f32 %v3462_v55, %v1882_v16  ;;  %v1898_v22 = vsel %vm5145_vm5, %v1897_v57, 0.0  ;;  %v1906_v10 = vmul.f32 %v1902_v8, %v1894_v53  ;;  %v1839_v51 = vand.u32 2147483647, %v4644_v42 }
 0x778   :  { %v3212_v25 = vmul.f32 -1.442695, %v4646_v37  ;;  %v1851_v12 = vmul.f32 1.442695, %v1845_v3  ;;  %v1903_v46 = vmul.f32 %v1902_v8, %v1898_v22  ;;  %v1915_v39 = vsel %vm565_vm3, %v1913_v43, %v1914_v1 }
 0x779   :  { %v3576_v59 = vpop.eup %3575  ;;  %v1910_v21 = vadd.f32 %v1906_v10, %v1889_v35  ;;  %v1918_v16 = vsel %vm565_vm3, %v1914_v1, %v1911_v24  ;;  %v3211_v9 = vmul.f32 -1.442695, %v4655_v45  ;;  %vm5146_vm11 = vcmp.ge.s32.totalorder %v3881_v48, 2  ;;  %v4665_v8 = vpop.f32.mrf.mxu3 }
 0x77a   :  { %3577 = vpow2.f32 %v3212_v25  ;;  %v1907_v6 = vadd.f32 %v1903_v46, %v1886_v18  ;;  %v1919_v4 = vsel %vm5146_vm11, %v1918_v16, 0.0  ;;  %v1935_v36 = vrot.slane %v1821_v11, 5  ;;  %v4687_v10 = vpop.permute.xlu0 %2035 }
 0x77b   :  { %3579 = vpow2.f32 %v1851_v12  ;;  %v1862_v55 = vmul.f32 0.6931472, %v3576_v59  ;;  %v1927_v49 = vmul.f32 %v1923_v50, %v1915_v39  ;;  %v1843_v56 = vsub.f32 0.0, %v1839_v51 }
 0x77c   :  { %v1836_v3 = vmax.f32 %v4596_v58, 0.0  ;;  %v1924_v53 = vmul.f32 %v1923_v50, %v1919_v4  ;;  %v1936_v24 = vsel %vm599_vm4, %v1934_v20, %v1935_v36  ;;  %v1939_v1 = vsel %vm599_vm4, %v1935_v36, %v1932_v0 }
 0x77d   :  { %v1931_v57 = vadd.f32 %v1927_v49, %v1910_v21  ;;  %v4676_v11 = vadd.f32 %v4590_v23, %v4665_v8  ;;  %3581 = vpow2.f32 %v3211_v9  ;;  %vm5147_vm3 = vcmp.ge.s32.totalorder %v3881_v48, 3 }
 0x77e   :  { %v1928_v22 = vadd.f32 %v1924_v53, %v1907_v6  ;;  %v1940_v58 = vsel %vm5147_vm3, %v1939_v1, 0.0  ;;  %v4680_v50 = vadd.f32 %v1862_v55, %v1836_v3  ;;  %v1948_v46 = vmul.f32 %v1944_v54, %v1936_v24 }
 0x77f   :  { %v1945_v12 = vmul.f32 %v1944_v54, %v1940_v58  ;;  %v1842_v23 = vand.u32 2147483647, %v4676_v11  ;;  %v1847_v0 = vmul.f32 1.442695, %v1843_v56  ;;  %v1837_v6 = vmax.f32 %v4638_v60, 0.0 }
 0x780   :  { %v3578_v43 = vpop.eup %3577  ;;  %v4684_v20 = vadd.f32 %v1948_v46, %v1931_v57  ;;  %v2039_v51 = vmul.f32 %v4687_v10, %v4680_v50 }
 0x781   :  { %v3580_v25 = vpop.eup %3579  ;;  %v1967_v35 = vadd.f32 1.0, %v3578_v43  ;;  %v4682_v2 = vadd.f32 %v1945_v12, %v1928_v22  ;;  %v1846_v18 = vsub.f32 0.0, %v1842_v23 }
 0x782   :  { %v1857_v19 = vadd.f32 1.0, %v3580_v25  ;;  %v3213_v48 = vmul.f32 -1.442695, %v4684_v20  ;;  %2048 = vrot.lane.b32.xlu2 %v2039_v51, %s3677_s30 }
 0x783   :  { %3583 = vrcp.f32 %v1967_v35  ;;  %v3210_v59 = vmul.f32 -1.442695, %v4682_v2  ;;  %v3582_v54 = vpop.eup %3581  ;;  %v1853_v39 = vmul.f32 1.442695, %v1846_v18  ;;  %v2010_v49 = vand.u32 2147483648, %v1967_v35 }
 0x784   :  { %3585 = vlog2.f32 %v1857_v19  ;;  %v4695_v36 = vadd.f32 1.0, %v3582_v54  ;;  %v2008_v43 = vand.u32 2147483647, %v1967_v35  ;;  %vm2004_vm6 = vweird.f32 %v1967_v35 }
 0x785   :  { %3587 = vpow2.f32 %v3210_v59  ;;  %v2011_v19 = vor.u32 1.1754944e-38, %v2010_v49 }
 0x786   :  { %3589 = vpow2.f32 %v3213_v48  ;;  %vm2009_vm15 = vcmp.eq.f32.partialorder %v2008_v43, 8.507059e+37 }
 0x787   :  { %3591 = vpow2.f32 %v1847_v0 }
 0x788   :  { %3593 = vpow2.f32 %v1853_v39 }
 0x789   :  { %v3584_v21 = vpop.eup %3583  ;;  %3595 = vrcp.f32 %v4695_v36 }
 0x78a   :  { %v3586_v16 = vpop.eup %3585  ;;  %v2000_v9 = vmul.f32 %v3584_v21, %v1967_v35  ;;  %vm2005_vm4 = vweird.f32 %v3584_v21 }
 0x78b   :  { %v1864_v4 = vmul.f32 0.6931472, %v3586_v16  ;;  %v3588_v3 = vpop.eup %3587  ;;  %vm2006_vm7 = vmor %vm2004_vm6, %vm2005_vm4  ;;  %vm1989_vm6 = vweird.f32 %v4695_v36 }
 0x78c   :  { %v2001_v55 = vsub.f32 1.0, %v2000_v9  ;;  %v3590_v57 = vpop.eup %3589  ;;  %v1965_v24 = vadd.f32 1.0, %v3588_v3 }
 0x78d   :  { %v4697_v56 = vadd.f32 %v1864_v4, %v1837_v6  ;;  %v3592_v25 = vpop.eup %3591  ;;  %v1968_v22 = vadd.f32 1.0, %v3590_v57 }
 0x78e   :  { %v2002_v53 = vmul.f32 %v3584_v21, %v2001_v55  ;;  %v3594_v58 = vpop.eup %3593  ;;  %3597 = vrcp.f32 %v1965_v24  ;;  %v1855_v46 = vadd.f32 1.0, %v3592_v25  ;;  %v1980_v16 = vand.u32 2147483648, %v1965_v24 }
 0x78f   :  { %v2040_v1 = vmul.f32 %v4687_v10, %v4697_v56  ;;  %3599 = vrcp.f32 %v1968_v22  ;;  %v1858_v59 = vadd.f32 1.0, %v3594_v58  ;;  %v4706_v48 = vpop.eup %3595  ;;  %v1978_v55 = vand.u32 2147483647, %v1965_v24 }
 0x790   :  { %v2003_v60 = vadd.f32 %v3584_v21, %v2002_v53  ;;  %v1985_v39 = vmul.f32 %v4706_v48, %v4695_v36  ;;  %v2025_v49 = vand.u32 2147483648, %v1968_v22  ;;  %v2023_v43 = vand.u32 2147483647, %v1968_v22 }
 0x791   :  { %2050 = vrot.lane.b32.xlu0 %v2040_v1, %s3677_s30  ;;  %3601 = vlog2.f32 %v1858_v59  ;;  %vm1974_vm14 = vweird.f32 %v1965_v24  ;;  %vm2019_vm9 = vweird.f32 %v1968_v22  ;;  %vm1979_vm5 = vcmp.eq.f32.partialorder %v1978_v55, 8.507059e+37 }
 0x792   :  { %v2007_v12 = vsel %vm2006_vm7, %v3584_v21, %v2003_v60  ;;  %3603 = vlog2.f32 %v1855_v46  ;;  %v1986_v1 = vsub.f32 1.0, %v1985_v39  ;;  %v1981_v60 = vor.u32 1.1754944e-38, %v1980_v16 }
 0x793   :  { %v2012_v23 = vsel %vm2009_vm15, %v2011_v19, %v2007_v12  ;;  %v2026_v46 = vor.u32 1.1754944e-38, %v2025_v49  ;;  %vm2024_vm3 = vcmp.eq.f32.partialorder %v2023_v43, 8.507059e+37  ;;  %v1835_v39 = vmax.f32 %v4644_v42, 0.0  ;;  %v3669_v43 = vld [vmem:[%s5122_s3] sm:$0xff] }
 0x794   :  { %v4704_v0 = vmul.f32 %v2012_v23, %v4646_v37  ;;  %v3598_v35 = vpop.eup %3597  ;;  %v1838_v37 = vmax.f32 %v4676_v11, 0.0  ;;  %vm1990_vm4 = vweird.f32 %v4706_v48  ;;  %v1995_v42 = vand.u32 2147483648, %v4695_v36 }
 0x795   :  { %v3600_v18 = vpop.eup %3599  ;;  %v1970_v51 = vmul.f32 %v3598_v35, %v1965_v24  ;;  %vm1975_vm13 = vweird.f32 %v3598_v35  ;;  %vm1991_vm7 = vmor %vm1989_vm6, %vm1990_vm4  ;;  %vm5158_vm4 = vcmp.gt.f32.partialorder %v4207_v28, 0.5 }
 0x796   :  { %2158 = vrot.lane.b32.xlu2 %v4704_v0, %s3677_s30  ;;  %v2015_v54 = vmul.f32 %v3600_v18, %v1968_v22  ;;  %vm2020_vm0 = vweird.f32 %v3600_v18  ;;  %vm1976_vm8 = vmor %vm1974_vm14, %vm1975_vm13  ;;  %v1987_v22 = vmul.f32 %v4706_v48, %v1986_v1  ;;  %vm5150_vm13 = vcmp.gt.f32.partialorder %v4193_v38, 0.5 }
 0x797   :  { %v1971_v21 = vsub.f32 1.0, %v1970_v51  ;;  %v3602_v6 = vpop.eup %3601  ;;  %vm2021_vm11 = vmor %vm2019_vm9, %vm2020_vm0  ;;  %vm5154_vm9 = vcmp.gt.f32.partialorder %v4200_v41, 0.5 }
 0x798   :  { %v2016_v9 = vsub.f32 1.0, %v2015_v54  ;;  %v3604_v3 = vpop.eup %3603  ;;  %v1866_v57 = vmul.f32 0.6931472, %v3602_v6  ;;  %vm5151_vm0 = vmmov %vm5150_vm13 }
 0x799   :  { %v1972_v4 = vmul.f32 %v3598_v35, %v1971_v21  ;;  %v1860_v11 = vmul.f32 0.6931472, %v3604_v3  ;;  %vm5152_vm14 = vmmov %vm5151_vm0 }
 0x79a   :  { %v2017_v53 = vmul.f32 %v3600_v18, %v2016_v9  ;;  %v4713_v19 = vadd.f32 %v1866_v57, %v1838_v37  ;;  %v1996_v9 = vor.u32 1.1754944e-38, %v1995_v42  ;;  %vm5159_vm6 = vmmov %vm5158_vm4 }
 0x79b   :  { %v1973_v25 = vadd.f32 %v3598_v35, %v1972_v4 }
 0x79c   :  { %v2018_v58 = vadd.f32 %v3600_v18, %v2017_v53  ;;  %v2041_v51 = vmul.f32 %v4687_v10, %v4713_v19 }
 0x79d   :  { %v1977_v12 = vsel %vm1976_vm8, %v3598_v35, %v1973_v25  ;;  %v4728_v35 = vadd.f32 %v1860_v11, %v1835_v39  ;;  %v3670_v11 = vld [vmem:[%s5122_s3 + $0x8] sm:$0xff]  ;;  %vm5153_vm8 = vmmov %vm5151_vm0 }
 0x79e   :  { %v1982_v23 = vsel %vm1979_vm5, %v1981_v60, %v1977_v12  ;;  %v2022_v59 = vsel %vm2021_vm11, %v3600_v18, %v2018_v58  ;;  %2052 = vrot.lane.b32.xlu1 %v2041_v51, %s3677_s30  ;;  %vm5155_vm5 = vmmov %vm5154_vm9 }
 0x79f   :  { %v2027_v54 = vsel %vm2024_vm3, %v2026_v46, %v2022_v59  ;;  %v4718_v24 = vmul.f32 %v1982_v23, %v4682_v2  ;;  %v1988_v2 = vadd.f32 %v4706_v48, %v1987_v22  ;;  %v2038_v18 = vmul.f32 %v4687_v10, %v4728_v35  ;;  %v3671_v23 = vld [vmem:[%s5122_s3 + $0x10] sm:$0xff]  ;;  %vm5156_vm11 = vmmov %vm5155_vm5 }
 0x7a0   :  { %v4723_v21 = vmul.f32 %v2027_v54, %v4684_v20  ;;  %v1993_v20 = vand.u32 2147483647, %v4695_v36  ;;  %v3672_v54 = vld [vmem:[%s5122_s3 + $0x18] sm:$0xff]  ;;  %vm5157_vm3 = vmmov %vm5155_vm5 }
 0x7a1   :  { %2146 = vrot.lane.b32.xlu2 %v4718_v24, %s3679_s25  ;;  %v1992_v16 = vsel %vm1991_vm7, %v4706_v48, %v1988_v2  ;;  %vm5160_vm7 = vmmov %vm5158_vm4 }
 0x7a2   :  { %2160 = vrot.lane.b32.xlu0 %v4723_v21, %s3677_s30  ;;  %vm1994_vm15 = vcmp.eq.f32.partialorder %v1993_v20, 8.507059e+37 }
 0x7a3   :  { %v1997_v37 = vsel %vm1994_vm15, %v1996_v9, %v1992_v16  ;;  %vm5161_vm15 = vcmp.gt.f32.partialorder %v4214_v44, 0.5 }
 0x7a4   :  { %v4746_v6 = vmul.f32 %v1997_v37, %v4655_v45 }
 0x7a6   :  { %2046 = vrot.lane.b32.xlu1 %v2038_v18, %s3677_s30 }
 0x7a9   :  { %2150 = vrot.lane.b32.xlu2 %v4704_v0, %s3679_s25 }
 0x7aa   :  { %2154 = vrot.lane.b32.xlu0 %v4718_v24, %s3677_s30 }
 0x7ae   :  { %2156 = vrot.lane.b32.xlu1 %v4746_v6, %s3677_s30 }
 0x7b1   :  { %2365 = vperm.xlu2 %3407, %v4713_v19  }
 0x7b6   :  { %2148 = vrot.lane.b32.xlu1 %v4746_v6, %s3679_s25 }
 0x7b9   :  { %3409 = vset.pattern.permute.xlu2 %v3680_v5 }
 0x7ba   :  { %2593 = vperm.xlu2 %3409, %v4713_v19  }
 0x7be   :  { %2152 = vrot.lane.b32.xlu1 %v4723_v21, %s3679_s25 }
 0x7c2   :  { %2589 = vperm.xlu2 %3409, %v4697_v56  }
 0x7c6   :  { %2361 = vperm.xlu1 %3408, %v4697_v56  }
 0x7ca   :  { %2585 = vperm.xlu2 %3409, %v4680_v50  }
 0x7ce   :  { %2357 = vperm.xlu1 %3408, %v4680_v50  }
 0x7d2   :  { %2581 = vperm.xlu2 %3409, %v4728_v35  }
 0x7d6   :  { %2353 = vperm.xlu1 %3408, %v4728_v35  }
 0x7da   :  { %3411 = vset.pattern.permute.xlu2 %v3681_v15 }
 0x7db   :  { %2471 = vperm.xlu2 %3411, %v4680_v50  }
 0x7dc   :  { %v2049_v45 = vpop.permute.xlu2 %2048 }
 0x7de   :  { %3410 = vset.pattern.permute.xlu1 %v3681_v15 }
 0x7df   :  { %2479 = vperm.xlu1 %3410, %v4713_v19  }
 0x7e3   :  { %3443 = vset.pattern.permute.xlu2 %v3684_v13 }
 0x7e7   :  { %2475 = vperm.xlu1 %3410, %v4697_v56  }
 0x7ef   :  { %2467 = vperm.xlu1 %3410, %v4728_v35  }
 0x7f0   :  { %v2159_v10 = vpop.permute.xlu2 %2158 }
 0x7f7   :  { %3445 = vset.pattern.permute.xlu1 %v3683_v7 }
 0x7fb   :  { %v2147_v36 = vpop.permute.xlu2 %2146 }
 0x803   :  { %v2151_v48 = vpop.permute.xlu2 %2150  ;;  %v2051_v55 = vpop.permute.xlu0 %2050 }
 0x80b   :  { %v2366_v4 = vpop.permute.xlu2 %2365 }
 0x80c   :  { %v2371_v22 = vmul.f32 %v2366_v4, %v4723_v21 }
 0x810   :  { %v2053_v49 = vpop.permute.xlu1 %2052 }
 0x811   :  { %2070 = vmatpush.msrb.mxu1 %v2053_v49 }
 0x813   :  { %2071 = vmatpush.msrb.mxu1 %v2051_v55 }
 0x814   :  { %v2161_v3 = vpop.permute.xlu0 %2160  ;;  %v2594_v15 = vpop.permute.xlu2 %2593 }
 0x815   :  { %3219 = vmatpush.xpose.msk.msrb.mxu3 %vm356_vm1, %v2161_v3  ;;  %2072 = vmatpush.msrb.mxu1 %v2049_v45  ;;  %v2599_v1 = vmul.f32 %v2594_v15, %v4723_v21 }
 0x818   :  { %v2047_v53 = vpop.permute.xlu1 %2046 }
 0x819   :  { %3220 = vmatpush.xpose.msk.msrb.mxu3 %vm356_vm1, %v2159_v10  ;;  %2073 = vmatpush.msrb.mxu1 %v2047_v53 }
 0x81a   :  { %2087 = vxpose.xlu0.b32.start [1/4] (short) (narrow) %v2047_v53, 8  ;;  %3214 = vmatmul.msk.f32.vlgmr.msrb.gmra.mxu1 %vm400_vm2, %v3669_v43 }
 0x81c   :  { %v2590_v57 = vpop.permute.xlu2 %2589  ;;  %v2155_v12 = vpop.permute.xlu0 %2154 }
 0x81d   :  { %v2598_v25 = vmul.f32 %v2590_v57, %v4704_v0 }
 0x81f   :  { %v3418_v60 = vpack.i.bf16 %v2598_v25, %v2599_v1 }
 0x820   :  { %v2157_v58 = vpop.permute.xlu1 %2156 }
 0x821   :  { %3419 = vrot.lane.b32.xlu2 %v3418_v60, %s3686_s22  ;;  %3221 = vmatpush.xpose.msk.msrb.mxu3 %vm356_vm1, %v2157_v58 }
 0x822   :  { %2088 = vxpose.xlu0.b32.cont [2/4] (short) (narrow) %v2049_v45, 8  ;;  %3215 = vmatmul.msk.f32.gmra.mxu1 %vm400_vm2, %v3670_v11 }
 0x824   :  { %v2586_v51 = vpop.permute.xlu2 %2585 }
 0x825   :  { %3222 = vmatpush.xpose.msk.msrb.mxu3 %vm356_vm1, %v2155_v12  ;;  %v2597_v9 = vmul.f32 %v2586_v51, %v4746_v6 }
 0x828   :  { %3223 = vmatmul.msk.f32.vlgmr.msrb.gmra.mxu3 %vm356_vm1, %v2147_v36  ;;  %v2149_v46 = vpop.permute.xlu1 %2148 }
 0x82a   :  { %2089 = vxpose.xlu0.b32.cont [3/4] (short) (narrow) %v2051_v55, 8  ;;  %3216 = vmatmul.msk.f32.gmra.mxu1 %vm400_vm2, %v3671_v23 }
 0x82c   :  { %v2582_v20 = vpop.permute.xlu2 %2581 }
 0x82d   :  { %v2596_v18 = vmul.f32 %v2582_v20, %v4718_v24 }
 0x82f   :  { %v3428_v37 = vpack.i.bf16 %v2596_v18, %v2597_v9 }
 0x830   :  { %3224 = vmatmul.msk.f32.gmra.mxu3 %vm356_vm1, %v2149_v46  ;;  %v2153_v59 = vpop.permute.xlu1 %2152 }
 0x832   :  { %2090 = vxpose.xlu0.b32.end [4/4] (short) (narrow) %v2053_v49, 8  ;;  %3217 = vmatmul.msk.f32.gmra.mxu1 %vm400_vm2, %v3672_v54 }
 0x835   :  { %v2472_v53 = vpop.permute.xlu2 %2471 }
 0x836   :  { %v2483_v57 = vmul.f32 %v2472_v53, %v4746_v6 }
 0x838   :  { %3225 = vmatmul.msk.f32.gmra.mxu3 %vm356_vm1, %v2151_v48  ;;  %v2362_v39 = vpop.permute.xlu1 %2361 }
 0x839   :  { %v2370_v2 = vmul.f32 %v2362_v39, %v4704_v0 }
 0x83b   :  { %v3413_v42 = vpack.i.bf16 %v2370_v2, %v2371_v22 }
 0x83d   :  { %3414 = vrot.lane.b32.xlu1 %v3413_v42, %s3682_s19 }
 0x840   :  { %3226 = vmatmul.msk.f32.gmra.mxu3 %vm356_vm1, %v2153_v59  ;;  %v2358_v16 = vpop.permute.xlu1 %2357 }
 0x841   :  { %v2369_v10 = vmul.f32 %v2358_v16, %v4746_v6 }
 0x845   :  { %3429 = vrot.lane.b32.xlu1 %v3428_v37, %s3686_s22 }
 0x848   :  { %v2354_v45 = vpop.permute.xlu1 %2353 }
 0x849   :  { %v2368_v36 = vmul.f32 %v2354_v45, %v4718_v24 }
 0x84b   :  { %v3423_v48 = vpack.i.bf16 %v2368_v36, %v2369_v10  ;;  %v5148_v10 = vmov 0   ;;  %v5149_v36 = vmov 64  }
 0x84d   :  { %3424 = vrot.lane.b32.xlu2 %v3423_v48, %s3682_s19 }
 0x851   :  { %v2480_v4 = vpop.permute.xlu1 %2479 }
 0x852   :  { %v2485_v49 = vmul.f32 %v2480_v4, %v4723_v21 }
 0x859   :  { %v2476_v55 = vpop.permute.xlu1 %2475 }
 0x85a   :  { %v2484_v3 = vmul.f32 %v2476_v55, %v4704_v0 }
 0x85c   :  { %v3433_v15 = vpack.i.bf16 %v2484_v3, %v2485_v49 }
 0x85e   :  { %3434 = vrot.lane.b32.xlu2 %v3433_v15, %s3685_s2 }
 0x861   :  { %v2468_v43 = vpop.permute.xlu1 %2467 }
 0x862   :  { %v2482_v1 = vmul.f32 %v2468_v43, %v4718_v24 }
 0x864   :  { %v3438_v25 = vpack.i.bf16 %v2482_v1, %v2483_v57 }
 0x866   :  { %3439 = vrot.lane.b32.xlu1 %v3438_v25, %s3685_s2 }
 0x87b   :  { %v3420_v60 = vpop.permute.xlu2 %3419 }
 0x87c   :  { %v3421_v58 = vunpack.i.l.bf16 %v3420_v60  ;;  %v3422_v11 = vunpack.i.h.bf16 %v3420_v60 }
 0x87e   :  { %2640 = vmatpush.msra.mxu3 %v3421_v58 }
 0x880   :  { %2641 = vmatpush.msra.mxu3 %v3422_v11 }
 0x897   :  { %v2075_v12 = vpop.f32.mrf.mxu1 }
 0x898   :  { %2544 = vperm.xlu2 %3443, %v2075_v12  }
 0x899   :  { %3412 = vset.pattern.permute.xlu0 %v3683_v7 }
 0x89f   :  { %v2078_v46 = vpop.f32.mrf.mxu1 }
 0x8a0   :  { %2316 = vperm.xlu0 %3412, %v2075_v12   ;;  %3444 = vset.pattern.permute.xlu2 %v3687_v47 }
 0x8a1   :  { %2320 = vperm.xlu1 %3445, %v2078_v46   ;;  %2430 = vperm.xlu2 %3444, %v2075_v12  }
 0x8a7   :  { %v2081_v23 = vpop.f32.mrf.mxu1  ;;  %v3425_v51 = vpop.permute.xlu2 %3424 }
 0x8a8   :  { %3460 = vset.pattern.permute.xlu0 %v3680_v5  ;;  %v3426_v22 = vunpack.i.l.bf16 %v3425_v51  ;;  %v3427_v5 = vunpack.i.h.bf16 %v3425_v51 }
 0x8a9   :  { %3446 = vset.pattern.permute.xlu1 %v3684_v13  ;;  %3448 = vset.pattern.permute.xlu2 %v3683_v7 }
 0x8aa   :  { %2548 = vperm.xlu1 %3446, %v2078_v46   ;;  %2324 = vperm.xlu2 %3448, %v2081_v23  }
 0x8af   :  { %v3415_v59 = vpop.permute.xlu1 %3414  ;;  %v2084_v16 = vpop.f32.mrf.mxu1 }
 0x8b0   :  { %v3416_v54 = vunpack.i.l.bf16 %v3415_v59  ;;  %v3417_v39 = vunpack.i.h.bf16 %v3415_v59 }
 0x8b2   :  { %3447 = vset.pattern.permute.xlu1 %v3687_v47  ;;  %3449 = vset.pattern.permute.xlu2 %v3684_v13 }
 0x8b3   :  { %2434 = vperm.xlu1 %3447, %v2078_v46   ;;  %2412 = vmatpush.msra.mxu2 %v3416_v54 }
 0x8b4   :  { %2552 = vperm.xlu2 %3449, %v2081_v23  }
 0x8b5   :  { %2413 = vmatpush.msra.mxu2 %v3417_v39 }
 0x8b7   :  { %2414 = vmatpush.msra.mxu2 %v3426_v22  ;;  %v3430_v2 = vpop.permute.xlu1 %3429 }
 0x8b8   :  { %v3431_v42 = vunpack.i.l.bf16 %v3430_v2  ;;  %v3435_v20 = vpop.permute.xlu2 %3434  ;;  %v3432_v9 = vunpack.i.h.bf16 %v3430_v2 }
 0x8b9   :  { %v3436_v18 = vunpack.i.l.bf16 %v3435_v20  ;;  %2415 = vmatpush.msra.mxu2 %v3427_v5  ;;  %v3437_v37 = vunpack.i.h.bf16 %v3435_v20 }
 0x8ba   :  { %2642 = vmatpush.msra.mxu3 %v3431_v42 }
 0x8bb   :  { %2438 = vperm.xlu1 %3447, %v2081_v23   ;;  %2526 = vmatpush.msra.mxu1 %v3436_v18 }
 0x8bc   :  { %3450 = vset.pattern.permute.xlu2 %v3683_v7  ;;  %2643 = vmatpush.msra.mxu3 %v3432_v9 }
 0x8bd   :  { %2328 = vperm.xlu2 %3450, %v2084_v16   ;;  %2527 = vmatpush.msra.mxu1 %v3437_v37 }
 0x8be   :  { %v2103_v45 = vpop.trf.xlu0 }
 0x8bf   :  { %3218 = vmatmul.msk.f32.vlgmr.msrb.gmra.mxu2 %vm400_vm2, %v2103_v45 }
 0x8c3   :  { %3451 = vset.pattern.permute.xlu1 %v3684_v13 }
 0x8c4   :  { %2556 = vperm.xlu1 %3451, %v2084_v16  }
 0x8c5   :  { %3452 = vset.pattern.permute.xlu2 %v3687_v47 }
 0x8c6   :  { %2442 = vperm.xlu2 %3452, %v2084_v16  }
 0x8cc   :  { %3453 = vset.pattern.permute.xlu1 %v5148_v10 }
 0x8cd   :  { %2211 = vperm.xlu1 %3453, %v2075_v12  }
 0x8ce   :  { %3454 = vset.pattern.permute.xlu2 %v5149_v36 }
 0x8cf   :  { %2267 = vperm.xlu2 %3454, %v4713_v19  }
 0x8d5   :  { %3455 = vset.pattern.permute.xlu1 %v5149_v36 }
 0x8d6   :  { %2262 = vperm.xlu1 %3455, %v4697_v56  }
 0x8d7   :  { %3456 = vset.pattern.permute.xlu2 %v5148_v10 }
 0x8d8   :  { %2216 = vperm.xlu2 %3456, %v2078_v46   ;;  %v3440_v7 = vpop.permute.xlu1 %3439 }
 0x8d9   :  { %v3441_v13 = vunpack.i.l.bf16 %v3440_v7  ;;  %v3442_v48 = vunpack.i.h.bf16 %v3440_v7 }
 0x8db   :  { %2528 = vmatpush.msra.mxu1 %v3441_v13 }
 0x8dd   :  { %2529 = vmatpush.msra.mxu1 %v3442_v48 }
 0x8de   :  { %2257 = vperm.xlu1 %3455, %v4680_v50  }
 0x8e0   :  { %3457 = vset.pattern.permute.xlu2 %v5149_v36 }
 0x8e1   :  { %2252 = vperm.xlu2 %3457, %v4728_v35  }
 0x8e6   :  { %3458 = vset.pattern.permute.xlu1 %v5148_v10 }
 0x8e7   :  { %2221 = vperm.xlu1 %3458, %v2081_v23  }
 0x8e9   :  { %3459 = vset.pattern.permute.xlu2 %v5148_v10 }
 0x8ea   :  { %2226 = vperm.xlu2 %3459, %v2084_v16  }
 0x8f2   :  { %v2545_v47 = vpop.permute.xlu2 %2544 }
 0x8fb   :  { %v2431_v56 = vpop.permute.xlu2 %2430 }
 0x904   :  { %v4835_v19 = vpop.permute.xlu2 %2324 }
 0x90e   :  { %v4837_v4 = vpop.permute.xlu2 %2552 }
 0x912   :  { %v2317_v23 = vpop.permute.xlu0 %2316 }
 0x913   :  { %v2321_v55 = vpop.permute.xlu1 %2320 }
 0x917   :  { %v4839_v49 = vpop.permute.xlu2 %2328 }
 0x91c   :  { %v2549_v50 = vpop.permute.xlu1 %2548 }
 0x920   :  { %v4841_v3 = vpop.permute.xlu2 %2442 }
 0x925   :  { %v2435_v15 = vpop.permute.xlu1 %2434 }
 0x929   :  { %v2268_v35 = vpop.permute.xlu2 %2267 }
 0x92a   :  { %v2273_v53 = vmul.f32 %v2268_v35, %v4723_v21 }
 0x92c   :  { %2298 = vmatpush.msra.mxu0 %v2273_v53 }
 0x92d   :  { %v2439_v43 = vpop.permute.xlu1 %2438 }
 0x932   :  { %v2217_v25 = vpop.permute.xlu2 %2216 }
 0x936   :  { %v4844_v57 = vpop.permute.xlu1 %2556 }
 0x93f   :  { %v2212_v1 = vpop.permute.xlu1 %2211 }
 0x942   :  { %v2139_v60 = vpop.f32.mrf.mxu2 }
 0x943   :  { %v4846_v58 = vperm.slane %v2139_v60, 0  ;;  %v4848_v11 = vperm.slane %v2139_v60, 1  ;;  %v4850_v12 = vperm.slane %v2139_v60, 2  ;;  %v4852_v46 = vperm.slane %v2139_v60, 3 }
 0x945   :  { %v2230_v59 = vsub.f32 %v2212_v1, %v4846_v58  ;;  %v2332_v51 = vsub.f32 %v2317_v23, %v4848_v11  ;;  %v2446_v54 = vsub.f32 %v2431_v56, %v4850_v12  ;;  %v2560_v39 = vsub.f32 %v2545_v47, %v4852_v46  ;;  %v2195_v47 = vpop.f32.mrf.mxu3 }
 0x946   :  { %v2333_v22 = vsub.f32 %v2321_v55, %v4848_v11  ;;  %v2447_v5 = vsub.f32 %v2435_v15, %v4850_v12  ;;  %v2561_v18 = vsub.f32 %v2549_v50, %v4852_v46  ;;  %v2231_v10 = vsub.f32 %v2217_v25, %v4846_v58  ;;  %v2253_v50 = vpop.permute.xlu2 %2252 }
 0x947   :  { %v2234_v2 = vsel %vm5150_vm13, %v2230_v59, -1e+09  ;;  %v2336_v42 = vsel %vm5151_vm0, %v2332_v51, -1e+09  ;;  %v2450_v20 = vsel %vm5152_vm14, %v2446_v54, -1e+09  ;;  %v2334_v1 = vsub.f32 %v4835_v19, %v4848_v11  ;;  %vm5162_vm13 = vmmov %vm5161_vm15 }
 0x948   :  { %v2238_v16 = vmul.f32 1.442695, %v2234_v2  ;;  %v2340_v9 = vmul.f32 1.442695, %v2336_v42  ;;  %v2454_v37 = vmul.f32 1.442695, %v2450_v20  ;;  %v2263_v45 = vpop.permute.xlu1 %2262  ;;  %v2448_v60 = vsub.f32 %v2439_v43, %v4850_v12  ;;  %vm5163_vm0 = vmmov %vm5158_vm4 }
 0x949   :  { %v2564_v36 = vsel %vm5153_vm8, %v2560_v39, -1e+09  ;;  %v2272_v7 = vmul.f32 %v2263_v45, %v4704_v0  ;;  %v2337_v13 = vsel %vm5154_vm9, %v2333_v22, -1e+09  ;;  %v2451_v56 = vsel %vm5155_vm5, %v2447_v5, -1e+09  ;;  %vm5164_vm14 = vmmov %vm5162_vm13 }
 0x94a   :  { %3605 = vpow2.f32 %v2238_v16  ;;  %v2568_v48 = vmul.f32 1.442695, %v2564_v36  ;;  %v2565_v55 = vsel %vm5156_vm11, %v2561_v18, -1e+09  ;;  %v2342_v38 = vmul.f32 1.442695, %v2337_v13  ;;  %vm5165_vm8 = vmmov %vm5162_vm13 }
 0x94b   :  { %3607 = vpow2.f32 %v2340_v9  ;;  %2299 = vmatpush.msra.mxu0 %v2272_v7  ;;  %v2235_v15 = vsel %vm5157_vm3, %v2231_v10, -1e+09  ;;  %v2456_v35 = vmul.f32 1.442695, %v2451_v56  ;;  %v2570_v53 = vmul.f32 1.442695, %v2565_v55 }
 0x94c   :  { %3609 = vpow2.f32 %v2454_v37  ;;  %v2240_v25 = vmul.f32 1.442695, %v2235_v15  ;;  %v2562_v51 = vsub.f32 %v4837_v4, %v4852_v46  ;;  %v2338_v5 = vsel %vm5158_vm4, %v2334_v1, -1e+09 }
 0x94d   :  { %3611 = vpow2.f32 %v2568_v48  ;;  %v2270_v2 = vmul.f32 %v2253_v50, %v4718_v24  ;;  %v2452_v42 = vsel %vm5159_vm6, %v2448_v60, -1e+09  ;;  %v2198_v16 = vpop.f32.mrf.mxu3  ;;  %v2344_v9 = vmul.f32 1.442695, %v2338_v5 }
 0x94e   :  { %3613 = vpow2.f32 %v2342_v38  ;;  %v2566_v18 = vsel %vm5160_vm7, %v2562_v51, -1e+09  ;;  %v2227_v45 = vpop.permute.xlu2 %2226  ;;  %v2458_v10 = vmul.f32 1.442695, %v2452_v42  ;;  %v2335_v36 = vsub.f32 %v4839_v49, %v4848_v11 }
 0x94f   :  { %3615 = vpow2.f32 %v2456_v35  ;;  %v2572_v13 = vmul.f32 1.442695, %v2566_v18  ;;  %v2449_v48 = vsub.f32 %v4841_v3, %v4850_v12  ;;  %v2563_v56 = vsub.f32 %v4844_v57, %v4852_v46 }
 0x950   :  { %v3606_v23 = vpop.eup %3605  ;;  %v2258_v59 = vpop.permute.xlu1 %2257  ;;  %3617 = vpow2.f32 %v2570_v53  ;;  %v2233_v50 = vsub.f32 %v2227_v45, %v4846_v58  ;;  %v2339_v49 = vsel %vm5161_vm15, %v2335_v36, -1e+09 }
 0x951   :  { %v3608_v54 = vpop.eup %3607  ;;  %v2271_v39 = vmul.f32 %v2258_v59, %v4746_v6  ;;  %3619 = vpow2.f32 %v2240_v25  ;;  %v2246_v20 = vmul.f32 %v3606_v23, %v2195_v47  ;;  %v2453_v3 = vsel %vm5162_vm13, %v2449_v48, -1e+09 }
 0x952   :  { %v3610_v41 = vpop.eup %3609  ;;  %v2348_v22 = vmul.f32 %v3608_v54, %v2195_v47  ;;  %3621 = vpow2.f32 %v2344_v9  ;;  %v2346_v1 = vmul.f32 1.442695, %v2339_v49  ;;  %v2237_v25 = vsel %vm5165_vm8, %v2233_v50, -1e+09 }
 0x953   :  { %v3612_v19 = vpop.eup %3611  ;;  %2300 = vmatpush.msra.mxu0 %v2271_v39  ;;  %v2462_v43 = vmul.f32 %v3610_v41, %v2195_v47  ;;  %3623 = vpow2.f32 %v2458_v10  ;;  %v2460_v28 = vmul.f32 1.442695, %v2453_v3  ;;  %v2244_v39 = vmul.f32 1.442695, %v2237_v25 }
 0x954   :  { %3232 = vmatmul.msk.f32.vlgmr.msra.gmra.mxu2 %vm400_vm2, %v2348_v22  ;;  %v2576_v4 = vmul.f32 %v3612_v19, %v2195_v47  ;;  %v3614_v37 = vpop.eup %3613  ;;  %3625 = vpow2.f32 %v2572_v13  ;;  %v3245_v49 = vmul.f32 -1.442695, %v4592_v26 }
 0x955   :  { %3236 = vmatmul.msk.f32.vlgmr.msra.gmra.mxu1 %vm400_vm2, %v2462_v43  ;;  %2301 = vmatpush.msra.mxu0 %v2270_v2  ;;  %v3616_v7 = vpop.eup %3615  ;;  %v2349_v35 = vmul.f32 %v3614_v37, %v2198_v16  ;;  %v2201_v23 = vpop.f32.mrf.mxu3 }
 0x956   :  { %3240 = vmatmul.msk.f32.vlgmr.msra.gmra.mxu3 %vm400_vm2, %v2576_v4  ;;  %3228 = vmatmul.msk.f32.vlgmr.msra.gmra.mxu0 %vm400_vm2, %v2246_v20  ;;  %v3618_v47 = vpop.eup %3617  ;;  %v2463_v11 = vmul.f32 %v3616_v7, %v2198_v16 }
 0x957   :  { %v3620_v55 = vpop.eup %3619  ;;  %v2577_v12 = vmul.f32 %v3618_v47, %v2198_v16 }
 0x958   :  { %v2247_v46 = vmul.f32 %v3620_v55, %v2198_v16  ;;  %v3622_v60 = vpop.eup %3621 }
 0x959   :  { %v2222_v38 = vpop.permute.xlu1 %2221  ;;  %v3624_v51 = vpop.eup %3623  ;;  %v2350_v41 = vmul.f32 %v3622_v60, %v2201_v23 }
 0x95a   :  { %v2232_v15 = vsub.f32 %v2222_v38, %v4846_v58  ;;  %v2567_v58 = vsel %vm5164_vm14, %v2563_v56, -1e+09  ;;  %v3626_v54 = vpop.eup %3625  ;;  %v2464_v22 = vmul.f32 %v3624_v51, %v2201_v23 }
 0x95b   :  { %v2574_v59 = vmul.f32 1.442695, %v2567_v58  ;;  %v2578_v44 = vmul.f32 %v3626_v54, %v2201_v23  ;;  %v3247_v58 = vmul.f32 -1.442695, %v4665_v8 }
 0x95c   :  { %v2236_v57 = vsel %vm5163_vm0, %v2232_v15, -1e+09  ;;  %3233 = vmatmul.msk.f32.gmra.mxu2 %vm400_vm2, %v2349_v35  ;;  %v3244_v35 = vmul.f32 -1.442695, %v4588_v61 }
 0x95d   :  { %v2242_v53 = vmul.f32 1.442695, %v2236_v57  ;;  %3237 = vmatmul.msk.f32.gmra.mxu1 %vm400_vm2, %v2463_v11  ;;  %v2204_v4 = vpop.f32.mrf.mxu3  ;;  %v3246_v57 = vmul.f32 -1.442695, %v4629_v32 }
 0x95e   :  { %3241 = vmatmul.msk.f32.gmra.mxu3 %vm400_vm2, %v2577_v12  ;;  %3229 = vmatmul.msk.f32.gmra.mxu0 %vm400_vm2, %v2247_v46 }
 0x95f   :  { %3627 = vpow2.f32 %v2242_v53 }
 0x960   :  { %3629 = vpow2.f32 %v2346_v1 }
 0x961   :  { %3631 = vpow2.f32 %v2460_v28 }
 0x962   :  { %3633 = vpow2.f32 %v2574_v59 }
 0x963   :  { %3635 = vpow2.f32 %v2244_v39 }
 0x964   :  { %3234 = vmatmul.msk.f32.gmra.mxu2 %vm400_vm2, %v2350_v41  ;;  %3637 = vpow2.f32 %v3244_v35 }
 0x965   :  { %v3628_v5 = vpop.eup %3627  ;;  %3238 = vmatmul.msk.f32.gmra.mxu1 %vm400_vm2, %v2464_v22  ;;  %3639 = vpow2.f32 %v3245_v49 }
 0x966   :  { %3242 = vmatmul.msk.f32.gmra.mxu3 %vm400_vm2, %v2578_v44  ;;  %v2248_v19 = vmul.f32 %v3628_v5, %v2201_v23  ;;  %v3630_v2 = vpop.eup %3629 }
 0x967   :  { %v3632_v43 = vpop.eup %3631  ;;  %v2351_v20 = vmul.f32 %v3630_v2, %v2204_v4 }
 0x968   :  { %3230 = vmatmul.msk.f32.gmra.mxu0 %vm400_vm2, %v2248_v19  ;;  %v3634_v42 = vpop.eup %3633  ;;  %v2465_v16 = vmul.f32 %v3632_v43, %v2204_v4 }
 0x969   :  { %v3636_v18 = vpop.eup %3635  ;;  %v2579_v9 = vmul.f32 %v3634_v42, %v2204_v4 }
 0x96a   :  { %v2249_v37 = vmul.f32 %v3636_v18, %v2204_v4  ;;  %v3638_v11 = vpop.eup %3637 }
 0x96b   :  { %v2738_v3 = vadd.f32 1.0, %v3638_v11  ;;  %v3640_v12 = vpop.eup %3639 }
 0x96c   :  { %3235 = vmatmul.msk.f32.gmra.mxu2 %vm400_vm2, %v2351_v20  ;;  %v2739_v46 = vadd.f32 1.0, %v3640_v12 }
 0x96d   :  { %3239 = vmatmul.msk.f32.gmra.mxu1 %vm400_vm2, %v2465_v16  ;;  %3641 = vrcp.f32 %v2738_v3  ;;  %v2753_v43 = vand.u32 2147483648, %v2738_v3  ;;  %vm2747_vm5 = vweird.f32 %v2738_v3  ;;  %v2751_v42 = vand.u32 2147483647, %v2738_v3  ;;  %v4955_v16 = vld [vmem:[%s5124_s12 + $0x2] sm:$0x3] }
 0x96e   :  { %3243 = vmatmul.msk.f32.gmra.mxu3 %vm400_vm2, %v2579_v9  ;;  %3643 = vpow2.f32 %v3246_v57  ;;  %vm2762_vm6 = vweird.f32 %v2739_v46 }
 0x96f   :  { %3645 = vrcp.f32 %v2739_v46  ;;  %vm2752_vm3 = vcmp.eq.f32.partialorder %v2751_v42, 8.507059e+37 }
 0x970   :  { %3231 = vmatmul.msk.f32.gmra.mxu0 %vm400_vm2, %v2249_v37  ;;  %3647 = vpow2.f32 %v3247_v58  ;;  %v2754_v37 = vor.u32 1.1754944e-38, %v2753_v43 }
 0x973   :  { %v3642_v53 = vpop.eup %3641 }
 0x974   :  { %v3644_v1 = vpop.eup %3643  ;;  %v2743_v25 = vmul.f32 %v3642_v53, %v2738_v3  ;;  %vm2748_vm9 = vweird.f32 %v3642_v53 }
 0x975   :  { %v4942_v28 = vadd.f32 1.0, %v3644_v1  ;;  %v3646_v60 = vpop.eup %3645  ;;  %vm2749_vm11 = vmor %vm2747_vm5, %vm2748_vm9 }
 0x976   :  { %v2744_v23 = vsub.f32 1.0, %v2743_v25  ;;  %v3648_v51 = vpop.eup %3647  ;;  %v2758_v54 = vmul.f32 %v3646_v60, %v2739_v46  ;;  %vm2763_vm4 = vweird.f32 %v3646_v60 }
 0x977   :  { %3649 = vrcp.f32 %v4942_v28  ;;  %v4945_v41 = vadd.f32 1.0, %v3648_v51  ;;  %vm2764_vm7 = vmor %vm2762_vm6, %vm2763_vm4  ;;  %vm2777_vm0 = vweird.f32 %v4942_v28 }
 0x978   :  { %v2745_v39 = vmul.f32 %v3642_v53, %v2744_v23  ;;  %v2759_v22 = vsub.f32 1.0, %v2758_v54 }
 0x979   :  { %3651 = vrcp.f32 %v4945_v41  ;;  %vm2792_vm5 = vweird.f32 %v4945_v41 }
 0x97a   :  { %v2746_v2 = vadd.f32 %v3642_v53, %v2745_v39  ;;  %v2760_v4 = vmul.f32 %v3646_v60, %v2759_v22 }
 0x97c   :  { %v2750_v9 = vsel %vm2749_vm11, %v3642_v53, %v2746_v2 }
 0x97d   :  { %v4947_v19 = vpop.eup %3649 }
 0x97e   :  { %v2773_v20 = vmul.f32 %v4947_v19, %v4942_v28  ;;  %vm2778_vm13 = vweird.f32 %v4947_v19 }
 0x97f   :  { %vm2779_vm14 = vmor %vm2777_vm0, %vm2778_vm13 }
 0x9d2   :  { %v2531_v45 = vpop.f32.mrf.mxu1 }
 0x9d3   :  { %2677 = vrot.lane.b32.xlu1 %v2531_v45, %s3690_s4  ;;  %v2303_v44 = vpop.f32.mrf.mxu0  ;;  %v2761_v45 = vadd.f32 %v3646_v60, %v2760_v4 }
 0x9d5   :  { %v2765_v11 = vsel %vm2764_vm7, %v3646_v60, %v2761_v45 }
 0x9d7   :  { %v2417_v10 = vpop.f32.mrf.mxu2 }
 0x9d9   :  { %v2645_v36 = vpop.f32.mrf.mxu3 }
 0x9da   :  { %v2534_v7 = vpop.f32.mrf.mxu1 }
 0x9db   :  { %2679 = vrot.lane.b32.xlu0 %v2534_v7, %s3690_s4  ;;  %2661 = vrot.lane.b32.xlu1 %v2417_v10, %s3691_s27  ;;  %v4960_v7 = vpop.eup %3651 }
 0x9dc   :  { %v2788_v3 = vmul.f32 %v4960_v7, %v4945_v41  ;;  %vm2793_vm9 = vweird.f32 %v4960_v7 }
 0x9dd   :  { %vm2794_vm11 = vmor %vm2792_vm5, %vm2793_vm9 }
 0x9de   :  { %v2789_v23 = vsub.f32 1.0, %v2788_v3 }
 0x9df   :  { %v2420_v13 = vpop.f32.mrf.mxu2 }
 0x9e0   :  { %2663 = vrot.lane.b32.xlu2 %v2420_v13, %s3691_s27  ;;  %v2755_v13 = vsel %vm2752_vm3, %v2754_v37, %v2750_v9  ;;  %v2790_v42 = vmul.f32 %v4960_v7, %v2789_v23 }
 0x9e1   :  { %v2648_v48 = vpop.f32.mrf.mxu3  ;;  %v2802_v49 = vmul.f32 %v2755_v13, %v4588_v61 }
 0x9e2   :  { %v2537_v47 = vpop.f32.mrf.mxu1 }
 0x9e3   :  { %2695 = vrot.lane.b32.xlu1 %v2648_v48, %s3679_s25  ;;  %v2768_v48 = vand.u32 2147483648, %v2739_v46 }
 0x9e5   :  { %v2769_v12 = vor.u32 1.1754944e-38, %v2768_v48  ;;  %v2798_v48 = vand.u32 2147483648, %v4945_v41 }
 0x9e7   :  { %v2423_v56 = vpop.f32.mrf.mxu2 }
 0x9e8   :  { %2693 = vrot.lane.b32.xlu2 %v2645_v36, %s3679_s25  ;;  %2665 = vrot.lane.b32.xlu0 %v2423_v56, %s3691_s27  ;;  %v4958_v36 = vperm.slane %v4955_v16, 0 }
 0x9e9   :  { %v2651_v55 = vpop.f32.mrf.mxu3 }
 0x9ea   :  { %v2540_v50 = vpop.f32.mrf.mxu1  ;;  %v2719_v61 = vmul.f32 %v4958_v36, %v4746_v6  ;;  %v2781_v6 = vand.u32 2147483647, %v4942_v28 }
 0x9eb   :  { %2681 = vrot.lane.b32.xlu1 %v2537_v47, %s3690_s4  ;;  %v2774_v47 = vsub.f32 1.0, %v2773_v20 }
 0x9ec   :  { %vm2782_vm8 = vcmp.eq.f32.partialorder %v2781_v6, 8.507059e+37 }
 0x9ed   :  { %v2775_v58 = vmul.f32 %v4947_v19, %v2774_v47 }
 0x9ef   :  { %v2426_v38 = vpop.f32.mrf.mxu2  ;;  %v2776_v39 = vadd.f32 %v4947_v19, %v2775_v58 }
 0x9f0   :  { %2683 = vrot.lane.b32.xlu0 %v2540_v50, %s3690_s4  ;;  %2667 = vrot.lane.b32.xlu2 %v2426_v38, %s3691_s27  ;;  %v2306_v50 = vpop.f32.mrf.mxu0 }
 0x9f1   :  { %v2654_v15 = vpop.f32.mrf.mxu3  ;;  %v2780_v20 = vsel %vm2779_vm14, %v4947_v19, %v2776_v39  ;;  %v2720_v19 = vmul.f32 %v4958_v36, %v4704_v0  ;;  %v3299_v39 = vld [vmem:[%s5125_s13 + $0x28] sm:$0xff] }
 0x9f3   :  { %2699 = vrot.lane.b32.xlu1 %v2654_v15, %s3679_s25  ;;  %v2718_v15 = vmul.f32 %v4958_v36, %v4718_v24 }
 0x9f8   :  { %2697 = vrot.lane.b32.xlu2 %v2651_v55, %s3679_s25  ;;  %v2766_v55 = vand.u32 2147483647, %v2739_v46 }
 0x9fa   :  { %vm2767_vm15 = vcmp.eq.f32.partialorder %v2766_v55, 8.507059e+37  ;;  %v2796_v55 = vand.u32 2147483647, %v4945_v41 }
 0x9fb   :  { %v2770_v1 = vsel %vm2767_vm15, %v2769_v12, %v2765_v11  ;;  %v2799_v11 = vor.u32 1.1754944e-38, %v2798_v48 }
 0x9fc   :  { %vm2797_vm3 = vcmp.eq.f32.partialorder %v2796_v55, 8.507059e+37 }
 0xa3a   :  { %v2664_v59 = vpop.permute.xlu2 %2663 }
 0xa3b   :  { %v2706_v24 = vsel %vm356_vm1, %v2306_v50, %v2664_v59  ;;  %v2783_v59 = vand.u32 2147483648, %v4942_v28 }
 0xa42   :  { %v2694_v18 = vpop.permute.xlu2 %2693 }
 0xa45   :  { %v2678_v5 = vpop.permute.xlu1 %2677 }
 0xa4a   :  { %v2668_v25 = vpop.permute.xlu2 %2667 }
 0xa4d   :  { %v2662_v10 = vpop.permute.xlu1 %2661  ;;  %v2680_v46 = vpop.permute.xlu0 %2679 }
 0xa4e   :  { %v2705_v56 = vsel %vm356_vm1, %v2303_v44, %v2662_v10  ;;  %v2710_v51 = vsel %vm400_vm2, %v2706_v24, %v2680_v46  ;;  %v2803_v44 = vmul.f32 %v2770_v1, %v4592_v26  ;;  %v2784_v26 = vor.u32 1.1754944e-38, %v2783_v59 }
 0xa4f   :  { %v2709_v38 = vsel %vm400_vm2, %v2705_v56, %v2678_v5  ;;  %v2309_v5 = vpop.f32.mrf.mxu0  ;;  %v2791_v10 = vadd.f32 %v4960_v7, %v2790_v42 }
 0xa50   :  { %v2713_v35 = vsel %vm1396_vm10, %v2709_v38, %v2694_v18  ;;  %v2785_v45 = vsel %vm2782_vm8, %v2784_v26, %v2780_v20 }
 0xa51   :  { %v2722_v57 = vadd.f32 %v2718_v15, %v2713_v35  ;;  %v2804_v38 = vmul.f32 %v2785_v45, %v4629_v32  ;;  %v2795_v35 = vsel %vm2794_vm11, %v4960_v7, %v2791_v10  ;;  %v2721_v32 = vmul.f32 %v4958_v36, %v4723_v21  ;;  %v3301_v21 = vld [vmem:[%s5125_s13 + $0x38] sm:$0xff]  ;;  %v3300_v36 = vld [vmem:[%s5125_s13 + $0x30] sm:$0xff] }
 0xa52   :  { %v2698_v47 = vpop.permute.xlu2 %2697  ;;  %v2800_v58 = vsel %vm2797_vm3, %v2799_v11, %v2795_v35  ;;  %2928 = vmatpush.bf16.msrb.mxu0 %v3301_v21 }
 0xa53   :  { %v4971_v53 = vmul.f32 %v2802_v49, %v2722_v57  ;;  %v2805_v24 = vmul.f32 %v2800_v58, %v4665_v8 }
 0xa55   :  { %v2696_v60 = vpop.permute.xlu1 %2695  ;;  %v2810_v54 = vmul.f32 %v4971_v53, %v4971_v53 }
 0xa56   :  { %v2714_v22 = vsel %vm1396_vm10, %v2710_v51, %v2696_v60  ;;  %2929 = vmatpush.bf16.msrb.mxu0 %v3300_v36 }
 0xa57   :  { %v2723_v2 = vadd.f32 %v2719_v61, %v2714_v22  ;;  %v2814_v43 = vsel %vm1498_vm12, %v2810_v54, 0.0  ;;  %v2312_v49 = vpop.f32.mrf.mxu0 }
 0xa58   :  { %2815 = vadd.xlane.f32.xlu0 %v2814_v43  ;;  %v2708_v3 = vsel %vm356_vm1, %v2312_v49, %v2668_v25 }
 0xa59   :  { %v4988_v4 = vmul.f32 %v2803_v44, %v2723_v2 }
 0xa5a   :  { %v2666_v18 = vpop.permute.xlu0 %2665  ;;  %2930 = vmatpush.bf16.msrb.mxu0 %v3299_v39 }
 0xa5b   :  { %v2707_v9 = vsel %vm356_vm1, %v2309_v5, %v2666_v18  ;;  %v2811_v37 = vmul.f32 %v4988_v4, %v4988_v4  ;;  %v3298_v5 = vld [vmem:[%s5125_s13 + $0x20] sm:$0xff] }
 0xa5d   :  { %v2682_v28 = vpop.permute.xlu1 %2681  ;;  %v2817_v13 = vsel %vm1498_vm12, %v2811_v37, 0.0 }
 0xa5e   :  { %v2711_v56 = vsel %vm400_vm2, %v2707_v9, %v2682_v28  ;;  %2818 = vadd.xlane.f32.xlu2 %v2817_v13  ;;  %2931 = vmatpush.bf16.msrb.mxu0 %v3298_v5 }
 0xa5f   :  { %v2715_v50 = vsel %vm1396_vm10, %v2711_v56, %v2698_v47 }
 0xa60   :  { %v2724_v15 = vadd.f32 %v2720_v19, %v2715_v50 }
 0xa62   :  { %v2684_v0 = vpop.permute.xlu0 %2683  ;;  %v5007_v57 = vmul.f32 %v2804_v38, %v2724_v15  ;;  %v2878_v15 = vperm.slane %v4955_v16, 1 }
 0xa63   :  { %v2712_v12 = vsel %vm400_vm2, %v2708_v3, %v2684_v0 }
 0xa64   :  { %v2812_v41 = vmul.f32 %v5007_v57, %v5007_v57 }
 0xa65   :  { %v2700_v46 = vpop.permute.xlu1 %2699 }
 0xa66   :  { %v2716_v7 = vsel %vm1396_vm10, %v2712_v12, %v2700_v46  ;;  %v2820_v1 = vsel %vm1498_vm12, %v2812_v41, 0.0 }
 0xa67   :  { %v2725_v25 = vadd.f32 %v2721_v32, %v2716_v7  ;;  %2821 = vadd.xlane.f32.xlu1 %v2820_v1 }
 0xa69   :  { %v5017_v23 = vmul.f32 %v2805_v24, %v2725_v25 }
 0xa6b   :  { %v2813_v51 = vmul.f32 %v5017_v23, %v5017_v23 }
 0xa6d   :  { %v2823_v61 = vsel %vm1498_vm12, %v2813_v51, 0.0 }
 0xa6e   :  { %2824 = vadd.xlane.f32.xlu0 %v2823_v61 }
 0xacb   :  { %v2816_v8 = vpop.xlane.xlu0 %2815 }
 0xacc   :  { %v2826_v60 = vmul.f32 %v2816_v8, %v4489_v31 }
 0xace   :  { %v2830_v54 = vadd.f32 1e-05, %v2826_v60 }
 0xad0   :  { %3653 = vrsqrt.f32 %v2830_v54  ;;  %vm2840_vm10 = vweird.f32 %v2830_v54 }
 0xad1   :  { %v2819_v22 = vpop.xlane.xlu2 %2818 }
 0xad2   :  { %v2827_v44 = vmul.f32 %v2819_v22, %v4489_v31 }
 0xad4   :  { %v2831_v59 = vadd.f32 1e-05, %v2827_v44 }
 0xad6   :  { %v3654_v2 = vpop.eup %3653  ;;  %3655 = vrsqrt.f32 %v2831_v59  ;;  %vm2850_vm7 = vweird.f32 %v2831_v59 }
 0xad7   :  { %v2835_v43 = vmul.f32 %v3654_v2, %v2830_v54  ;;  %vm2841_vm1 = vweird.f32 %v3654_v2 }
 0xad8   :  { %vm2842_vm4 = vmor %vm2840_vm10, %vm2841_vm1 }
 0xad9   :  { %v2836_v6 = vmul.f32 %v3654_v2, %v2835_v43 }
 0xada   :  { %v2822_v42 = vpop.xlane.xlu1 %2821 }
 0xadb   :  { %v2837_v20 = vmul.f32 0.5, %v2836_v6  ;;  %v2828_v18 = vmul.f32 %v2822_v42, %v4489_v31 }
 0xadc   :  { %v3656_v26 = vpop.eup %3655 }
 0xadd   :  { %v2838_v9 = vsub.f32 1.5, %v2837_v20  ;;  %v2845_v37 = vmul.f32 %v3656_v26, %v2831_v59  ;;  %v2832_v45 = vadd.f32 1e-05, %v2828_v18  ;;  %vm2851_vm6 = vweird.f32 %v3656_v26 }
 0xade   :  { %vm2852_vm15 = vmor %vm2850_vm7, %vm2851_vm6 }
 0xadf   :  { %v2839_v10 = vmul.f32 %v3654_v2, %v2838_v9  ;;  %v2846_v28 = vmul.f32 %v3656_v26, %v2845_v37  ;;  %3657 = vrsqrt.f32 %v2832_v45  ;;  %vm2860_vm0 = vweird.f32 %v2832_v45 }
 0xae1   :  { %v2847_v13 = vmul.f32 0.5, %v2846_v28  ;;  %v2825_v48 = vpop.xlane.xlu0 %2824  ;;  %v2843_v19 = vsel %vm2842_vm4, %v3654_v2, %v2839_v10 }
 0xae2   :  { %v2829_v47 = vmul.f32 %v2825_v48, %v4489_v31  ;;  %v2874_v35 = vmul.f32 %v2843_v19, %v4971_v53 }
 0xae3   :  { %v2848_v56 = vsub.f32 1.5, %v2847_v13 }
 0xae4   :  { %v2833_v55 = vadd.f32 1e-05, %v2829_v47  ;;  %v2879_v12 = vmul.f32 %v2878_v15, %v2874_v35 }
 0xae5   :  { %v3658_v50 = vpop.eup %3657  ;;  %v2849_v38 = vmul.f32 %v3656_v26, %v2848_v56 }
 0xae6   :  { %v2855_v49 = vmul.f32 %v3658_v50, %v2832_v45  ;;  %3659 = vrsqrt.f32 %v2833_v55  ;;  %vm2861_vm13 = vweird.f32 %v3658_v50  ;;  %vm2870_vm9 = vweird.f32 %v2833_v55 }
 0xae7   :  { %v2853_v11 = vsel %vm2852_vm15, %v3656_v26, %v2849_v38  ;;  %vm2862_vm14 = vmor %vm2860_vm0, %vm2861_vm13 }
 0xae8   :  { %v2875_v3 = vmul.f32 %v2853_v11, %v4988_v4  ;;  %v2856_v0 = vmul.f32 %v3658_v50, %v2855_v49 }
 0xaea   :  { %v2880_v31 = vmul.f32 %v2878_v15, %v2875_v3  ;;  %v2857_v58 = vmul.f32 0.5, %v2856_v0  ;;  %v3302_v3 = vld [vmem:[%s5127_s6] sm:$0xff] }
 0xaec   :  { %v3660_v41 = vpop.eup %3659  ;;  %v2858_v32 = vsub.f32 1.5, %v2857_v58  ;;  %v2883_v46 = vpack.c.bf16 %v2880_v31, %v2879_v12 }
 0xaed   :  { %v2865_v7 = vmul.f32 %v3660_v41, %v2833_v55  ;;  %vm2871_vm8 = vweird.f32 %v3660_v41 }
 0xaee   :  { %3272 = vmatmul.msk.bf16.vlgmr.msrb.gmra.mxu0 %vm1498_vm12, %v2883_v46  ;;  %v2859_v1 = vmul.f32 %v3658_v50, %v2858_v32  ;;  %vm2872_vm5 = vmor %vm2870_vm9, %vm2871_vm8  ;;  %vm185_vm8 = vcmp.eq.f32.partialorder %v3825_v62, inf  ;;  %vm187_vm9 = vcmp.eq.f32.partialorder %v3825_v62, 0.0 }
 0xaef   :  { %v2866_v16 = vmul.f32 %v3660_v41, %v2865_v7 }
 0xaf0   :  { %v2863_v24 = vsel %vm2862_vm14, %v3658_v50, %v2859_v1 }
 0xaf1   :  { %v2867_v53 = vmul.f32 0.5, %v2866_v16  ;;  %v2876_v51 = vmul.f32 %v2863_v24, %v5007_v57 }
 0xaf3   :  { %v2868_v25 = vsub.f32 1.5, %v2867_v53  ;;  %v2881_v36 = vmul.f32 %v2878_v15, %v2876_v51 }
 0xaf5   :  { %v2869_v4 = vmul.f32 %v3660_v41, %v2868_v25 }
 0xaf7   :  { %v2873_v61 = vsel %vm2872_vm5, %v3660_v41, %v2869_v4  ;;  %vm5166_vm5 = vcmask 31744  }
 0xaf8   :  { %v2877_v21 = vmul.f32 %v2873_v61, %v5017_v23  ;;  %v3274_v61 = vld [vmem:[%s5126_s14 + $0x2] sm:$0x3] }
 0xafa   :  { %v2882_v8 = vmul.f32 %v2878_v15, %v2877_v21  ;;  %v3303_v15 = vld [vmem:[%s5127_s6 + $0x8] sm:$0xff] }
 0xafb   :  { %3077 = vmatpush.bf16.msrb.mxu2 %v3303_v15 }
 0xafc   :  { %v2884_v60 = vpack.c.bf16 %v2882_v8, %v2881_v36 }
 0xafe   :  { %3273 = vmatmul.msk.bf16.gmra.mxu0 %vm1498_vm12, %v2884_v60 }
 0xaff   :  { %3078 = vmatpush.bf16.msrb.mxu2 %v3302_v3 }
 0xb6b   :  { %v2933_v54 = vpop.f32.mrf.mxu0 }
 0xb6c   :  { %v2945_v39 = vadd.f32 %v2933_v54, %v4567_v52 }
 0xb6e   :  { %v2949_v22 = vsel %vm400_vm2, %v2945_v39, 0.0 }
 0xb6f   :  { %2950 = vadd.xlane.f32.xlu2 %v2949_v22  ;;  %v3037_v22 = vperm.slane %v3274_v61, 0 }
 0xb73   :  { %v2935_v44 = vpop.f32.mrf.mxu0 }
 0xb74   :  { %v2946_v59 = vadd.f32 %v2935_v44, %v4569_v40 }
 0xb76   :  { %v2952_v5 = vsel %vm400_vm2, %v2946_v59, 0.0 }
 0xb77   :  { %2953 = vadd.xlane.f32.xlu1 %v2952_v5 }
 0xb7b   :  { %v2938_v57 = vpop.f32.mrf.mxu0 }
 0xb7c   :  { %v2947_v23 = vadd.f32 %v2938_v57, %v4578_v27 }
 0xb7e   :  { %v2955_v2 = vsel %vm400_vm2, %v2947_v23, 0.0 }
 0xb7f   :  { %2956 = vadd.xlane.f32.xlu0 %v2955_v2 }
 0xb83   :  { %v2940_v43 = vpop.f32.mrf.mxu0 }
 0xb84   :  { %v2948_v6 = vadd.f32 %v2940_v43, %v4580_v33  ;;  %v3042_v43 = vperm.slane %v3274_v61, 1 }
 0xb86   :  { %v2958_v52 = vsel %vm400_vm2, %v2948_v6, 0.0 }
 0xb87   :  { %2959 = vadd.xlane.f32.xlu2 %v2958_v52 }
 0xbe2   :  { %v2951_v42 = vpop.xlane.xlu2 %2950 }
 0xbe3   :  { %v2961_v20 = vmul.f32 %v2951_v42, %v4526_v34 }
 0xbe5   :  { %v2965_v18 = vsub.f32 %v2945_v39, %v2961_v20 }
 0xbe7   :  { %v2969_v40 = vmul.f32 %v2965_v18, %v2965_v18 }
 0xbe9   :  { %v2973_v26 = vsel %vm400_vm2, %v2969_v40, 0.0 }
 0xbea   :  { %2974 = vadd.xlane.f32.xlu1 %v2973_v26  ;;  %v2954_v9 = vpop.xlane.xlu1 %2953 }
 0xbeb   :  { %v2962_v27 = vmul.f32 %v2954_v9, %v4526_v34 }
 0xbed   :  { %v5056_v37 = vsub.f32 %v2946_v59, %v2962_v27 }
 0xbef   :  { %v2970_v45 = vmul.f32 %v5056_v37, %v5056_v37 }
 0xbf1   :  { %v2976_v33 = vsel %vm400_vm2, %v2970_v45, 0.0 }
 0xbf2   :  { %2977 = vadd.xlane.f32.xlu0 %v2976_v33  ;;  %v2957_v10 = vpop.xlane.xlu0 %2956 }
 0xbf3   :  { %v2963_v28 = vmul.f32 %v2957_v10, %v4526_v34 }
 0xbf5   :  { %v5062_v13 = vsub.f32 %v2947_v23, %v2963_v28 }
 0xbf7   :  { %v2971_v48 = vmul.f32 %v5062_v13, %v5062_v13 }
 0xbf9   :  { %v2979_v47 = vsel %vm400_vm2, %v2971_v48, 0.0 }
 0xbfa   :  { %2980 = vadd.xlane.f32.xlu2 %v2979_v47  ;;  %v2960_v19 = vpop.xlane.xlu2 %2959 }
 0xbfb   :  { %v2964_v56 = vmul.f32 %v2960_v19, %v4526_v34 }
 0xbfd   :  { %v5068_v55 = vsub.f32 %v2948_v6, %v2964_v56 }
 0xbff   :  { %v2972_v50 = vmul.f32 %v5068_v55, %v5068_v55 }
 0xc01   :  { %v2982_v38 = vsel %vm400_vm2, %v2972_v50, 0.0 }
 0xc02   :  { %2983 = vadd.xlane.f32.xlu1 %v2982_v38 }
 0xc5d   :  { %v2975_v35 = vpop.xlane.xlu1 %2974 }
 0xc5e   :  { %v2985_v49 = vmul.f32 %v2975_v35, %v4526_v34 }
 0xc60   :  { %v2989_v11 = vadd.f32 1e-05, %v2985_v49 }
 0xc62   :  { %3661 = vrsqrt.f32 %v2989_v11  ;;  %vm2999_vm11 = vweird.f32 %v2989_v11 }
 0xc65   :  { %v2978_v0 = vpop.xlane.xlu0 %2977 }
 0xc66   :  { %v2986_v12 = vmul.f32 %v2978_v0, %v4526_v34 }
 0xc68   :  { %v3662_v31 = vpop.eup %3661  ;;  %v2990_v58 = vadd.f32 1e-05, %v2986_v12 }
 0xc69   :  { %v2994_v41 = vmul.f32 %v3662_v31, %v2989_v11  ;;  %vm3000_vm12 = vweird.f32 %v3662_v31  ;;  %v184_v11 = vmul.f32 %v3839_v14, %v3825_v62  ;;  %v196_v14 = vmul.f32 %v3841_v17, %v3827_v63 }
 0xc6a   :  { %3663 = vrsqrt.f32 %v2990_v58  ;;  %vm3001_vm3 = vmor %vm2999_vm11, %vm3000_vm12  ;;  %vm3009_vm10 = vweird.f32 %v2990_v58  ;;  %vm199_vm12 = vcmp.eq.f32.partialorder %v3827_v63, 0.0 }
 0xc6b   :  { %v2995_v32 = vmul.f32 %v3662_v31, %v2994_v41  ;;  %v186_v0 = vsel %vm185_vm8, %v3825_v62, %v184_v11  ;;  %vm5167_vm11 = vmmov %vm5166_vm5 }
 0xc6d   :  { %v2996_v46 = vmul.f32 0.5, %v2995_v32  ;;  %v2981_v7 = vpop.xlane.xlu2 %2980  ;;  %v200_v32 = vand.u32 2147483648, %v3827_v63 }
 0xc6e   :  { %v2987_v1 = vmul.f32 %v2981_v7, %v4526_v34 }
 0xc6f   :  { %v2997_v16 = vsub.f32 1.5, %v2996_v46 }
 0xc70   :  { %v3664_v53 = vpop.eup %3663  ;;  %v2991_v24 = vadd.f32 1e-05, %v2987_v1 }
 0xc71   :  { %v2998_v25 = vmul.f32 %v3662_v31, %v2997_v16  ;;  %v3004_v4 = vmul.f32 %v3664_v53, %v2990_v58  ;;  %vm3010_vm1 = vweird.f32 %v3664_v53 }
 0xc72   :  { %3665 = vrsqrt.f32 %v2991_v24  ;;  %vm3011_vm4 = vmor %vm3009_vm10, %vm3010_vm1  ;;  %vm3019_vm7 = vweird.f32 %v2991_v24 }
 0xc73   :  { %v3005_v51 = vmul.f32 %v3664_v53, %v3004_v4  ;;  %v3002_v21 = vsel %vm3001_vm3, %v3662_v31, %v2998_v25 }
 0xc74   :  { %v3033_v44 = vmul.f32 %v3002_v21, %v2965_v18 }
 0xc75   :  { %v3006_v36 = vmul.f32 0.5, %v3005_v51  ;;  %v2984_v8 = vpop.xlane.xlu1 %2983 }
 0xc76   :  { %v2988_v60 = vmul.f32 %v2984_v8, %v4526_v34  ;;  %v3038_v6 = vmul.f32 %v3037_v22, %v3033_v44 }
 0xc77   :  { %v3007_v54 = vsub.f32 1.5, %v3006_v36 }
 0xc78   :  { %v3666_v39 = vpop.eup %3665  ;;  %v2992_v59 = vadd.f32 1e-05, %v2988_v60  ;;  %v3043_v26 = vadd.f32 %v3042_v43, %v3038_v6 }
 0xc79   :  { %v3008_v5 = vmul.f32 %v3664_v53, %v3007_v54  ;;  %v3014_v57 = vmul.f32 %v3666_v39, %v2991_v24  ;;  %vm3020_vm6 = vweird.f32 %v3666_v39 }
 0xc7a   :  { %3667 = vrsqrt.f32 %v2992_v59  ;;  %vm3021_vm15 = vmor %vm3019_vm7, %vm3020_vm6  ;;  %vm3029_vm0 = vweird.f32 %v2992_v59 }
 0xc7b   :  { %v3012_v23 = vsel %vm3011_vm4, %v3664_v53, %v3008_v5  ;;  %v3015_v2 = vmul.f32 %v3666_v39, %v3014_v57 }
 0xc7c   :  { %v3034_v52 = vmul.f32 %v3012_v23, %v5056_v37 }
 0xc7d   :  { %v3016_v42 = vmul.f32 0.5, %v3015_v2 }
 0xc7e   :  { %v3039_v20 = vmul.f32 %v3037_v22, %v3034_v52 }
 0xc7f   :  { %v3017_v34 = vsub.f32 1.5, %v3016_v42 }
 0xc80   :  { %v3668_v40 = vpop.eup %3667  ;;  %v3044_v9 = vadd.f32 %v3042_v43, %v3039_v20 }
 0xc81   :  { %v3018_v27 = vmul.f32 %v3666_v39, %v3017_v34  ;;  %v3024_v18 = vmul.f32 %v3668_v40, %v2992_v59  ;;  %vm3030_vm13 = vweird.f32 %v3668_v40 }
 0xc82   :  { %v3047_v45 = vpack.c.bf16 %v3044_v9, %v3043_v26  ;;  %vm3031_vm14 = vmor %vm3029_vm0, %vm3030_vm13 }
 0xc83   :  { %v3025_v33 = vmul.f32 %v3668_v40, %v3024_v18  ;;  %v3022_v10 = vsel %vm3021_vm15, %v3666_v39, %v3018_v27 }
 0xc84   :  { %3283 = vmatmul.msk.bf16.vlgmr.msrb.gmra.mxu2 %vm400_vm2, %v3047_v45  ;;  %v3035_v37 = vmul.f32 %v3022_v10, %v5062_v13  ;;  %v188_v13 = vand.u32 2147483648, %v3825_v62 }
 0xc85   :  { %v3026_v28 = vmul.f32 0.5, %v3025_v33 }
 0xc86   :  { %v3040_v50 = vmul.f32 %v3037_v22, %v3035_v37 }
 0xc87   :  { %v3027_v48 = vsub.f32 1.5, %v3026_v28 }
 0xc88   :  { %v3045_v15 = vadd.f32 %v3042_v43, %v3040_v50 }
 0xc89   :  { %v3028_v47 = vmul.f32 %v3668_v40, %v3027_v48 }
 0xc8b   :  { %v3032_v19 = vsel %vm3031_vm14, %v3668_v40, %v3028_v47 }
 0xc8c   :  { %v3036_v56 = vmul.f32 %v3032_v19, %v5068_v55  ;;  %v189_v55 = vsel %vm187_vm9, %v188_v13, %v186_v0 }
 0xc8e   :  { %v3041_v38 = vmul.f32 %v3037_v22, %v3036_v56 }
 0xc90   :  { %v3046_v35 = vadd.f32 %v3042_v43, %v3041_v38 }
 0xc92   :  { %v3048_v49 = vpack.c.bf16 %v3046_v35, %v3045_v15 }
 0xc94   :  { %3284 = vmatmul.msk.bf16.gmra.mxu2 %vm400_vm2, %v3048_v49  ;;  %vm197_vm2 = vcmp.eq.f32.partialorder %v3827_v63, inf }
 0xc95   :  { %v198_v62 = vsel %vm197_vm2, %v3827_v63, %v196_v14 }
 0xc96   :  { %v201_v46 = vsel %vm199_vm12, %v200_v32, %v198_v62 }
 0xd07   :  { %v3080_v3 = vpop.f32.mrf.mxu2 }
 0xd0f   :  { %v3081_v12 = vpop.f32.mrf.mxu2 }
 0xd10   :  { %v3088_v31 = vmul.f32 %v3081_v12, %v189_v55 }
 0xd12   :  { %v3090_v58 = vadd.f32 %v3088_v31, %v3790_v29 }
 0xd14   :  { %3092 = vst.msk [vmem:[%s5128_s15] sm:$0xff] %vm5166_vm5, %v3090_v58 }
 0xd17   :  { %v3084_v41 = vpop.f32.mrf.mxu2 }
 0xd1f   :  { %v3085_v7 = vpop.f32.mrf.mxu2 }
 0xd20   :  { %v3089_v29 = vmul.f32 %v3085_v7, %v201_v46 }
 0xd22   :  { %v3091_v1 = vadd.f32 %v3089_v29, %v3792_v30 }
 0xd24   :  { %3093 = vst.msk [vmem:[%s5128_s15 + $0x8] sm:$0xff] %vm5167_vm11, %v3091_v1 }

</bundles_post_ra>
